<compile_context>
chip_gen: v7x
topology: tpu7x:2x2x1
jax: 0.10.0
libtpu: 0.0.40
codegen_flags: <defaults>
</compile_context>

<pallas_src>
import jax
import jax.numpy as jnp
from jax import lax
from jax.experimental import pallas as pl
from jax.experimental.pallas import tpu as pltpu

RMS_EPS = 1e-6        # config.rms_norm_eps (attn_norm, mlp_norm, g_norm swish-gate)
BITLIN_EPS = 1e-8     # BitLinear's internal RMSNorm eps
LANE = 128

_VMEM_LIMIT = None


def _vmem_limit():
    """Per-generation VMEM budget: capacity minus headroom, capped at 100 MiB."""
    global _VMEM_LIMIT
    if _VMEM_LIMIT is None:
        cap = 128 << 20
        try:
            cap = int(getattr(pltpu.get_tpu_info(), "vmem_capacity_bytes", cap))
        except Exception:
            pass
        _VMEM_LIMIT = int(max(32 << 20, min(cap - (16 << 20), 100 << 20)))
    return _VMEM_LIMIT


def _smem_spec():
    return pl.BlockSpec(memory_space=pltpu.MemorySpace.SMEM)


def _pick_tile(n, candidates):
    """Largest candidate tile that divides n; falls back to the full dimension."""
    for c in candidates:
        if n >= c and n % c == 0:
            return c
    return n


def _row_tiling(m, row_bytes):
    """(row_tile, padded_rows).  Keeps ~3 buffered copies of a row tile under ~16 MiB
    and, if no candidate divides m, pads m up to a tile multiple instead of using a
    single (possibly VMEM-oversized) block."""
    budget = 16 << 20
    for c in (256, 128):
        if m % c == 0 and 3 * c * row_bytes <= budget:
            return c, m
    if m <= 128:
        return m, m
    c = 128
    return c, ((m + c - 1) // c) * c


def _pad_rows(x, mp):
    return x if x.shape[0] == mp else jnp.pad(x, ((0, mp - x.shape[0]), (0, 0)))


# --------------------------------------------------------------------------- BitLinear core

def _prequant_weight(w):
    """BitLinear weight_quant, hoisted out of the forward (done once per weight).

    Returns (wq, descale): wq holds the exact ternary integers {-1,0,1} in bf16,
    descale = max(mean|w|, 1e-5) is the scalar applied AFTER the integer matmul.
    """
    m = jnp.maximum(jnp.mean(jnp.abs(w)), 1e-5)
    wq = jnp.clip(jnp.round(w / m), -1.0, 1.0).astype(jnp.bfloat16)
    return wq, m.reshape(1, 1).astype(jnp.float32)


def _bitlinear_rms(x, bln_w):
    """BitLinear's internal RMSNorm (eps=1e-8), incl. its elementwise weight."""
    var = jnp.mean(x * x, axis=-1, keepdims=True)
    return x * lax.rsqrt(var + BITLIN_EPS) * bln_w


def _quant_to_scratch(xn, xq_scr, amax_scr):
    """Per-row abs-max int8 activation quant (activation_quant), staged in VMEM so the
    prologue runs once per row tile and is reused by every output-column tile."""
    amax = jnp.maximum(jnp.max(jnp.abs(xn), axis=-1, keepdims=True), 1e-5)
    xq_scr[...] = jnp.clip(jnp.round(xn * (127.0 / amax)), -128.0, 127.0).astype(jnp.bfloat16)
    amax_scr[...] = amax


def _dequant_dot(xq_scr, amax_scr, w_ref, dsc_ref):
    """Integer-valued bf16 MXU matmul (exact: |acts| <= 127, weights in {-1,0,1}, f32
    accumulation) followed by activation/weight dequantization."""
    acc = lax.dot_general(xq_scr[...], w_ref[...], (((1,), (1,)), ((), ())),
                          preferred_element_type=jnp.float32)
    return acc * (amax_scr[...] * (dsc_ref[0, 0] * (1.0 / 127.0)))


# --------------------------------------------------------------------------- kernels

def _norm_bitlinear_kernel(x_ref, prew_ref, blnw_ref, w_ref, dsc_ref, out_ref,
                           xq_scr, amax_scr):
    """RMSNorm (attn_norm / mlp_norm) -> BitLinear.
    grid = (row tiles "parallel", output-column tiles "arbitrary")."""
    @pl.when(pl.program_id(1) == 0)
    def _():
        x = x_ref[...]
        var = jnp.mean(x * x, axis=-1, keepdims=True)
        h = x * lax.rsqrt(var + RMS_EPS) * prew_ref[...]
        _quant_to_scratch(_bitlinear_rms(h, blnw_ref[...]), xq_scr, amax_scr)
    out_ref[...] = _dequant_dot(xq_scr, amax_scr, w_ref, dsc_ref)


def _gated_bitlinear_kernel(o_ref, g_ref, gnw_ref, blnw_ref, w_ref, dsc_ref,
                            res_ref, out_ref, xq_scr, amax_scr):
    """FusedRMSNormSwishGate -> o_proj BitLinear -> + residual add."""
    @pl.when(pl.program_id(1) == 0)
    def _():
        o = o_ref[...]
        g = g_ref[...]
        var = jnp.mean(o * o, axis=-1, keepdims=True)
        x = (o * lax.rsqrt(var + RMS_EPS) * gnw_ref[...]) * (g * jax.nn.sigmoid(g))
        _quant_to_scratch(_bitlinear_rms(x, blnw_ref[...]), xq_scr, amax_scr)
    out_ref[...] = res_ref[...] + _dequant_dot(xq_scr, amax_scr, w_ref, dsc_ref)


def _swiglu_bitlinear_kernel(y_ref, blnw_ref, w_ref, dsc_ref, res_ref, out_ref,
                             xq_scr, amax_scr):
    """swiglu(gate, y) -> down_proj BitLinear -> + residual add."""
    @pl.when(pl.program_id(1) == 0)
    def _():
        y = y_ref[...]                                   # (tm, 2*I) = [gate | y]
        half = y.shape[-1] // 2
        gate = y[:, :half]
        z = gate * jax.nn.sigmoid(gate) * y[:, half:]
        _quant_to_scratch(_bitlinear_rms(z, blnw_ref[...]), xq_scr, amax_scr)
    out_ref[...] = res_ref[...] + _dequant_dot(xq_scr, amax_scr, w_ref, dsc_ref)


def _recurrence_kernel(i_ref, f_ref, o_ref, a_scr, b_scr, h_scr):
    """fused_recurrent_hgrn:  h_t = sigmoid(f_t)*h_{t-1} + silu(i_t)*(1-sigmoid(f_t)),
    o_t = h_t, h_{-1} = 0  (sigmoid(f) == exp(logsigmoid(f)) of the reference).

    Layout: time is the leading (un-tiled) block axis and B*D is packed densely into
    the (sublane, lane) dims, so every per-timestep slice is a dense (Gs,128) tile.
    grid = (feature tiles "parallel", time chunks "arbitrary"); hidden state is
    carried across time chunks in VMEM scratch.
    """
    @pl.when(pl.program_id(1) == 0)
    def _():
        h_scr[...] = jnp.zeros_like(h_scr)

    i = i_ref[...]
    a = jax.nn.sigmoid(f_ref[...])
    # transcendentals hoisted out of the serial chain; only the MAC stays serial
    a_scr[...] = a
    b_scr[...] = i * jax.nn.sigmoid(i) * (1.0 - a)

    tc = i_ref.shape[0]

    def body(t, h):
        h = a_scr[t] * h + b_scr[t]
        o_ref[t] = h
        return h

    # Partial unroll (8 = sublane count) lets the scheduler overlap the next step's
    # loads with the current MAC.
    # TODO(synk): for very long T, replace the serial inner loop with a within-chunk
    #             associative scan (Hillis-Steele over the Tc axis), keeping only the
    #             chunk-to-chunk carry serial.
    unroll = 8 if tc % 8 == 0 else True
    h_scr[...] = lax.fori_loop(0, tc, body, h_scr[...], unroll=unroll)


# --------------------------------------------------------------------------- wrappers

def norm_bitlinear(x, pre_w, bln_w, wq, dsc):
    """pre-RMSNorm (eps=1e-6) + BitLinear, tiled over (rows, output columns)."""
    M, K = x.shape
    N = wq.shape[0]
    tm, Mp = _row_tiling(M, 4 * K)
    tn = _pick_tile(N, (512, 256, 128))
    xp = _pad_rows(x, Mp)
    out = pl.pallas_call(
        _norm_bitlinear_kernel,
        out_shape=jax.ShapeDtypeStruct((Mp, N), jnp.float32),
        grid=(Mp // tm, N // tn),
        in_specs=[
            pl.BlockSpec((tm, K), lambda m, n: (m, 0)),   # activations (row tile)
            pl.BlockSpec((1, K), lambda m, n: (0, 0)),    # pre-norm weight
            pl.BlockSpec((1, K), lambda m, n: (0, 0)),    # BitLinear RMSNorm weight
            pl.BlockSpec((tn, K), lambda m, n: (n, 0)),   # ternary weight (col tile)
            _smem_spec(),                                 # weight descale scalar
        ],
        out_specs=pl.BlockSpec((tm, tn), lambda m, n: (m, n)),
        scratch_shapes=[pltpu.VMEM((tm, K), jnp.bfloat16),   # quantized activation
                        pltpu.VMEM((tm, 1), jnp.float32)],   # per-row abs-max
        compiler_params=pltpu.CompilerParams(
            dimension_semantics=("parallel", "arbitrary"),
            vmem_limit_bytes=_vmem_limit()),
    )(xp, pre_w.reshape(1, K), bln_w.reshape(1, K), wq, dsc)
    return out if Mp == M else out[:M]


def gated_bitlinear(o, g, res, gn_w, bln_w, wq, dsc):
    """FusedRMSNormSwishGate + o_proj BitLinear + residual add."""
    M, D = o.shape
    N = wq.shape[0]
    tm, Mp = _row_tiling(M, 4 * (2 * D))
    tn = _pick_tile(N, (512, 256, 128))
    op, gp, rp = _pad_rows(o, Mp), _pad_rows(g, Mp), _pad_rows(res, Mp)
    out = pl.pallas_call(
        _gated_bitlinear_kernel,
        out_shape=jax.ShapeDtypeStruct((Mp, N), jnp.float32),
        grid=(Mp // tm, N // tn),
        in_specs=[
            pl.BlockSpec((tm, D), lambda m, n: (m, 0)),   # recurrence output o
            pl.BlockSpec((tm, D), lambda m, n: (m, 0)),   # gate g
            pl.BlockSpec((1, D), lambda m, n: (0, 0)),    # g_norm (swish-gate) weight
            pl.BlockSpec((1, D), lambda m, n: (0, 0)),    # o_proj BitLinear RMSNorm weight
            pl.BlockSpec((tn, D), lambda m, n: (n, 0)),   # ternary o_w (col tile)
            _smem_spec(),
            pl.BlockSpec((tm, tn), lambda m, n: (m, n)),  # residual (block input x)
        ],
        out_specs=pl.BlockSpec((tm, tn), lambda m, n: (m, n)),
        scratch_shapes=[pltpu.VMEM((tm, D), jnp.bfloat16),
                        pltpu.VMEM((tm, 1), jnp.float32)],
        compiler_params=pltpu.CompilerParams(
            dimension_semantics=("parallel", "arbitrary"),
            vmem_limit_bytes=_vmem_limit()),
    )(op, gp, gn_w.reshape(1, D), bln_w.reshape(1, D), wq, dsc, rp)
    return out if Mp == M else out[:M]


def swiglu_bitlinear(y, res, bln_w, wq, dsc):
    """swiglu + down_proj BitLinear + residual add."""
    M, N2 = y.shape
    N, I = wq.shape
    tm, Mp = _row_tiling(M, 4 * N2)
    tn = _pick_tile(N, (512, 256, 128))
    yp, rp = _pad_rows(y, Mp), _pad_rows(res, Mp)
    out = pl.pallas_call(
        _swiglu_bitlinear_kernel,
        out_shape=jax.ShapeDtypeStruct((Mp, N), jnp.float32),
        grid=(Mp // tm, N // tn),
        in_specs=[
            pl.BlockSpec((tm, N2), lambda m, n: (m, 0)),  # gate_proj output [gate | y]
            pl.BlockSpec((1, I), lambda m, n: (0, 0)),    # down_proj BitLinear RMSNorm weight
            pl.BlockSpec((tn, I), lambda m, n: (n, 0)),   # ternary dp_w (col tile)
            _smem_spec(),
            pl.BlockSpec((tm, tn), lambda m, n: (m, n)),  # residual s
        ],
        out_specs=pl.BlockSpec((tm, tn), lambda m, n: (m, n)),
        scratch_shapes=[pltpu.VMEM((tm, I), jnp.bfloat16),
                        pltpu.VMEM((tm, 1), jnp.float32)],
        compiler_params=pltpu.CompilerParams(
            dimension_semantics=("parallel", "arbitrary"),
            vmem_limit_bytes=_vmem_limit()),
    )(yp, bln_w.reshape(1, I), wq, dsc, rp)
    return out if Mp == M else out[:M]


def _pick_gtile(G):
    """Feature-tile for the recurrence: multiple of 8 (sublane) or the full extent;
    prefer >= 2 tiles so the "parallel" axis can shard across both TCs (v7x)."""
    for c in (64, 32, 16, 8):
        if G % c == 0 and G // c >= 2:
            return c
    for c in (64, 32, 16, 8):
        if G % c == 0:
            return c
    return G


def hgrn_recurrence(i_tm, f_tm, B, T, D):
    """fused_recurrent_hgrn.  Inputs/outputs are (T*B, D) with rows ordered (t, b),
    so reshaping to (T, B*D) gives a dense per-timestep feature row."""
    N = B * D
    Np = pl.cdiv(N, LANE) * LANE
    i2 = i_tm.reshape(T, N)
    f2 = f_tm.reshape(T, N)
    if Np != N:
        i2 = jnp.pad(i2, ((0, 0), (0, Np - N)))
        f2 = jnp.pad(f2, ((0, 0), (0, Np - N)))
    G = Np // LANE
    i3 = i2.reshape(T, G, LANE)
    f3 = f2.reshape(T, G, LANE)
    Gs = _pick_gtile(G)
    Tc = _pick_tile(T, (64, 32, 16, 8))
    idx = lambda g, t: (t, g, 0)
    o3 = pl.pallas_call(
        _recurrence_kernel,
        out_shape=jax.ShapeDtypeStruct((T, G, LANE), jnp.float32),
        grid=(G // Gs, T // Tc),
        in_specs=[pl.BlockSpec((Tc, Gs, LANE), idx),
                  pl.BlockSpec((Tc, Gs, LANE), idx)],
        out_specs=pl.BlockSpec((Tc, Gs, LANE), idx),
        scratch_shapes=[pltpu.VMEM((Tc, Gs, LANE), jnp.float32),   # sigmoid(f) chunk
                        pltpu.VMEM((Tc, Gs, LANE), jnp.float32),   # input-gate chunk
                        pltpu.VMEM((Gs, LANE), jnp.float32)],      # carried hidden state
        compiler_params=pltpu.CompilerParams(
            dimension_semantics=("parallel", "arbitrary"),
            vmem_limit_bytes=_vmem_limit()),
    )(i3, f3)
    o = o3.reshape(T, Np)
    if Np != N:
        o = o[:, :N]
    return o.reshape(T * B, D)


# --------------------------------------------------------------------------- block

def hgrn_bit_block(x, qp):
    """HGRNBitBlock.forward (layer_idx=0, no cache/mask). Returns hidden_states."""
    B, T, H = x.shape
    D = qp["i_w_q"].shape[0]
    M = T * B
    # (t, b)-major row ordering so the recurrence sees time-contiguous dense features
    xf = jnp.transpose(x, (1, 0, 2)).reshape(M, H).astype(jnp.float32)

    # attn_norm + BitLinear i/f/g projections (each fused + N-tiled; the shared
    # attn_norm prologue runs only once per row tile per call, so the duplication
    # across the three calls is negligible compute).
    i = norm_bitlinear(xf, qp["attn_norm_w"], qp["i_norm_w"], qp["i_w_q"], qp["i_w_s"])
    f = norm_bitlinear(xf, qp["attn_norm_w"], qp["f_norm_w"], qp["f_w_q"], qp["f_w_s"])
    g = norm_bitlinear(xf, qp["attn_norm_w"], qp["g_norm_w"], qp["g_w_q"], qp["g_w_s"])

    # fused_recurrent_hgrn (head split is elementwise-irrelevant)
    o = hgrn_recurrence(i, f, B, T, D)

    # g_norm swish-gate + o_proj + residual add  ->  new residual stream s
    s = gated_bitlinear(o, g, xf, qp["gnorm_w"], qp["o_norm_w"], qp["o_w_q"], qp["o_w_s"])

    # mlp_norm + gate_proj
    y = norm_bitlinear(s, qp["mlp_norm_w"], qp["gp_norm_w"], qp["gp_w_q"], qp["gp_w_s"])

    # swiglu + down_proj + residual add
    out = swiglu_bitlinear(y, s, qp["dp_norm_w"], qp["dp_w_q"], qp["dp_w_s"])

    return jnp.transpose(out.reshape(T, B, H), (1, 0, 2))


# --------------------------------------------------------------------------- params

def prequantize_params(p):
    """Hoist BitLinear weight_quant out of the forward: done once, reused every call."""
    raw = ("i_w", "f_w", "g_w", "o_w", "gp_w", "dp_w")
    q = {k: v for k, v in p.items() if k not in raw}
    for name in raw:
        wq, s = _prequant_weight(p[name])
        q[name + "_q"] = wq
        q[name + "_s"] = s
    return q


def init_params(key, hidden_size, expand_ratio=1, hidden_ratio=4):
    D = int(hidden_size * expand_ratio)
    inter = int(hidden_size * hidden_ratio * 2 / 3)
    inter = 256 * ((inter + 256 - 1) // 256)
    ks = jax.random.split(key, 16)

    def w(k, shape, scale=0.05):
        return scale * jax.random.normal(k, shape, jnp.float32)

    def nw(k, n):
        return jnp.ones((n,), jnp.float32) + 0.01 * jax.random.normal(k, (n,), jnp.float32)

    return {
        "attn_norm_w": nw(ks[0], hidden_size),
        "i_norm_w": nw(ks[1], hidden_size), "i_w": w(ks[2], (D, hidden_size)),
        "f_norm_w": nw(ks[3], hidden_size), "f_w": w(ks[4], (D, hidden_size)),
        "g_norm_w": nw(ks[5], hidden_size), "g_w": w(ks[6], (D, hidden_size)),
        "gnorm_w": nw(ks[7], D),
        "o_norm_w": nw(ks[8], D), "o_w": w(ks[9], (hidden_size, D)),
        "mlp_norm_w": nw(ks[10], hidden_size),
        "gp_norm_w": nw(ks[11], hidden_size), "gp_w": w(ks[12], (2 * inter, hidden_size)),
        "dp_norm_w": nw(ks[13], inter), "dp_w": w(ks[14], (hidden_size, inter)),
    }


if __name__ == "__main__":
    key = jax.random.PRNGKey(0)
    kx, kp = jax.random.split(key)
    B, T, H = 2, 8, 64
    x = jax.random.normal(kx, (B, T, H), jnp.float32)
    params = init_params(kp, H)
    qparams = prequantize_params(params)     # weight quant hoisted out of the forward

    out = jax.jit(hgrn_bit_block)(x, qparams)
    out = jax.block_until_ready(out)
    assert out.shape == (B, T, H) and out.dtype == jnp.float32
    assert bool(jnp.all(jnp.isfinite(out)))
    print("KERNEL_OK")
</pallas_src>

<mosaic_0001>
module attributes {stable_mosaic.version = 11 : i64} {
  func.func @_recurrence_kernel(%arg0: i32, %arg1: i32, %arg2: memref<8x1x128xf32, #tpu.memory_space<vmem>>, %arg3: memref<8x1x128xf32, #tpu.memory_space<vmem>>, %arg4: memref<8x1x128xf32, #tpu.memory_space<vmem>>, %arg5: memref<8x1x128xf32, #tpu.memory_space<vmem>>, %arg6: memref<8x1x128xf32, #tpu.memory_space<vmem>>, %arg7: memref<1x128xf32, #tpu.memory_space<vmem>>) attributes {dimension_semantics = [#tpu.dimension_semantics<parallel>, #tpu.dimension_semantics<arbitrary>], iteration_bounds = array<i64: 1, 1>, scalar_prefetch = 0 : i64, scratch_operands = 3 : i64, tpu.core_type = #tpu.core_type<tc>, window_params = [{transform_indices = @transform_0, window_bounds = array<i64: 8, 1, 128>}, {transform_indices = @transform_1, window_bounds = array<i64: 8, 1, 128>}, {transform_indices = @transform_2, window_bounds = array<i64: 8, 1, 128>}]} {
    %c0_i32 = arith.constant 0 : i32
    %0 = arith.cmpi eq, %arg1, %c0_i32 : i32
    %1 = arith.extui %0 : i1 to i32
    %c0_i32_0 = arith.constant 0 : i32
    %2 = arith.cmpi ne, %1, %c0_i32_0 : i32
    scf.if %2 {
      %cst_67 = arith.constant 0.000000e+00 : f32
      %119 = vector.broadcast %cst_67 : f32 to vector<1x128xf32>
      %c0_68 = arith.constant 0 : index
      %c0_69 = arith.constant 0 : index
      %120 = vector.load %arg7[%c0_68, %c0_69] : memref<1x128xf32, #tpu.memory_space<vmem>>, vector<1x128xf32>
      tpu.vector_store %arg7[%c0_68, %c0_69], %119 {strides = array<i32>} : memref<1x128xf32, #tpu.memory_space<vmem>>, vector<1x128xf32>,
    } else {
    }
    %c0 = arith.constant 0 : index
    %c0_1 = arith.constant 0 : index
    %c0_2 = arith.constant 0 : index
    %3 = vector.load %arg2[%c0, %c0_1, %c0_2] : memref<8x1x128xf32, #tpu.memory_space<vmem>>, vector<8x1x128xf32>
    %c0_3 = arith.constant 0 : index
    %c0_4 = arith.constant 0 : index
    %c0_5 = arith.constant 0 : index
    %4 = vector.load %arg3[%c0_3, %c0_4, %c0_5] : memref<8x1x128xf32, #tpu.memory_space<vmem>>, vector<8x1x128xf32>
    %5 = arith.negf %4 : vector<8x1x128xf32>
    %6 = math.exp %5 : vector<8x1x128xf32>
    %cst = arith.constant 1.000000e+00 : f32
    %7 = vector.broadcast %cst : f32 to vector<8x1x128xf32>
    %8 = arith.addf %7, %6 : vector<8x1x128xf32>
    %9 = arith.divf %7, %8 : vector<8x1x128xf32>
    %c0_6 = arith.constant 0 : index
    %c0_7 = arith.constant 0 : index
    %c0_8 = arith.constant 0 : index
    %10 = vector.load %arg5[%c0_6, %c0_7, %c0_8] : memref<8x1x128xf32, #tpu.memory_space<vmem>>, vector<8x1x128xf32>
    tpu.vector_store %arg5[%c0_6, %c0_7, %c0_8], %9 {strides = array<i32>} : memref<8x1x128xf32, #tpu.memory_space<vmem>>, vector<8x1x128xf32>,
    %11 = arith.negf %3 : vector<8x1x128xf32>
    %12 = math.exp %11 : vector<8x1x128xf32>
    %cst_9 = arith.constant 1.000000e+00 : f32
    %13 = vector.broadcast %cst_9 : f32 to vector<8x1x128xf32>
    %14 = arith.addf %13, %12 : vector<8x1x128xf32>
    %15 = arith.divf %13, %14 : vector<8x1x128xf32>
    %16 = arith.mulf %3, %15 : vector<8x1x128xf32>
    %cst_10 = arith.constant 1.000000e+00 : f32
    %17 = vector.broadcast %cst_10 : f32 to vector<8x1x128xf32>
    %18 = arith.subf %17, %9 : vector<8x1x128xf32>
    %19 = arith.mulf %16, %18 : vector<8x1x128xf32>
    %c0_11 = arith.constant 0 : index
    %c0_12 = arith.constant 0 : index
    %c0_13 = arith.constant 0 : index
    %20 = vector.load %arg6[%c0_11, %c0_12, %c0_13] : memref<8x1x128xf32, #tpu.memory_space<vmem>>, vector<8x1x128xf32>
    tpu.vector_store %arg6[%c0_11, %c0_12, %c0_13], %19 {strides = array<i32>} : memref<8x1x128xf32, #tpu.memory_space<vmem>>, vector<8x1x128xf32>,
    %c0_14 = arith.constant 0 : index
    %c0_15 = arith.constant 0 : index
    %21 = vector.load %arg7[%c0_14, %c0_15] : memref<1x128xf32, #tpu.memory_space<vmem>>, vector<1x128xf32>
    %c0_i32_16 = arith.constant 0 : i32
    %22 = arith.index_cast %c0_i32_16 : i32 to index
    %c0_17 = arith.constant 0 : index
    %c0_18 = arith.constant 0 : index
    %23 = vector.load %arg5[%22, %c0_17, %c0_18] : memref<8x1x128xf32, #tpu.memory_space<vmem>>, vector<1x1x128xf32>
    %24 = vector.shape_cast %23 : vector<1x1x128xf32> to vector<1x128xf32>
    %25 = arith.mulf %24, %21 : vector<1x128xf32>
    %26 = arith.index_cast %c0_i32_16 : i32 to index
    %c0_19 = arith.constant 0 : index
    %c0_20 = arith.constant 0 : index
    %27 = vector.load %arg6[%26, %c0_19, %c0_20] : memref<8x1x128xf32, #tpu.memory_space<vmem>>, vector<1x1x128xf32>
    %28 = vector.shape_cast %27 : vector<1x1x128xf32> to vector<1x128xf32>
    %29 = arith.addf %25, %28 : vector<1x128xf32>
    %30 = arith.index_cast %c0_i32_16 : i32 to index
    %c0_21 = arith.constant 0 : index
    %c0_22 = arith.constant 0 : index
    %31 = vector.load %arg4[%30, %c0_21, %c0_22] : memref<8x1x128xf32, #tpu.memory_space<vmem>>, vector<1x1x128xf32>
    %32 = vector.shape_cast %31 : vector<1x1x128xf32> to vector<1x128xf32>
    %33 = vector.shape_cast %29 : vector<1x128xf32> to vector<1x1x128xf32>
    tpu.vector_store %arg4[%30, %c0_21, %c0_22], %33 {strides = array<i32>} : memref<8x1x128xf32, #tpu.memory_space<vmem>>, vector<1x1x128xf32>,
    %c1_i32 = arith.constant 1 : i32
    %34 = arith.index_cast %c1_i32 : i32 to index
    %c0_23 = arith.constant 0 : index
    %c0_24 = arith.constant 0 : index
    %35 = vector.load %arg5[%34, %c0_23, %c0_24] : memref<8x1x128xf32, #tpu.memory_space<vmem>>, vector<1x1x128xf32>
    %36 = vector.shape_cast %35 : vector<1x1x128xf32> to vector<1x128xf32>
    %37 = arith.mulf %36, %29 : vector<1x128xf32>
    %38 = arith.index_cast %c1_i32 : i32 to index
    %c0_25 = arith.constant 0 : index
    %c0_26 = arith.constant 0 : index
    %39 = vector.load %arg6[%38, %c0_25, %c0_26] : memref<8x1x128xf32, #tpu.memory_space<vmem>>, vector<1x1x128xf32>
    %40 = vector.shape_cast %39 : vector<1x1x128xf32> to vector<1x128xf32>
    %41 = arith.addf %37, %40 : vector<1x128xf32>
    %42 = arith.index_cast %c1_i32 : i32 to index
    %c0_27 = arith.constant 0 : index
    %c0_28 = arith.constant 0 : index
    %43 = vector.load %arg4[%42, %c0_27, %c0_28] : memref<8x1x128xf32, #tpu.memory_space<vmem>>, vector<1x1x128xf32>
    %44 = vector.shape_cast %43 : vector<1x1x128xf32> to vector<1x128xf32>
    %45 = vector.shape_cast %41 : vector<1x128xf32> to vector<1x1x128xf32>
    tpu.vector_store %arg4[%42, %c0_27, %c0_28], %45 {strides = array<i32>} : memref<8x1x128xf32, #tpu.memory_space<vmem>>, vector<1x1x128xf32>,
    %c2_i32 = arith.constant 2 : i32
    %46 = arith.index_cast %c2_i32 : i32 to index
    %c0_29 = arith.constant 0 : index
    %c0_30 = arith.constant 0 : index
    %47 = vector.load %arg5[%46, %c0_29, %c0_30] : memref<8x1x128xf32, #tpu.memory_space<vmem>>, vector<1x1x128xf32>
    %48 = vector.shape_cast %47 : vector<1x1x128xf32> to vector<1x128xf32>
    %49 = arith.mulf %48, %41 : vector<1x128xf32>
    %50 = arith.index_cast %c2_i32 : i32 to index
    %c0_31 = arith.constant 0 : index
    %c0_32 = arith.constant 0 : index
    %51 = vector.load %arg6[%50, %c0_31, %c0_32] : memref<8x1x128xf32, #tpu.memory_space<vmem>>, vector<1x1x128xf32>
    %52 = vector.shape_cast %51 : vector<1x1x128xf32> to vector<1x128xf32>
    %53 = arith.addf %49, %52 : vector<1x128xf32>
    %54 = arith.index_cast %c2_i32 : i32 to index
    %c0_33 = arith.constant 0 : index
    %c0_34 = arith.constant 0 : index
    %55 = vector.load %arg4[%54, %c0_33, %c0_34] : memref<8x1x128xf32, #tpu.memory_space<vmem>>, vector<1x1x128xf32>
    %56 = vector.shape_cast %55 : vector<1x1x128xf32> to vector<1x128xf32>
    %57 = vector.shape_cast %53 : vector<1x128xf32> to vector<1x1x128xf32>
    tpu.vector_store %arg4[%54, %c0_33, %c0_34], %57 {strides = array<i32>} : memref<8x1x128xf32, #tpu.memory_space<vmem>>, vector<1x1x128xf32>,
    %c3_i32 = arith.constant 3 : i32
    %58 = arith.index_cast %c3_i32 : i32 to index
    %c0_35 = arith.constant 0 : index
    %c0_36 = arith.constant 0 : index
    %59 = vector.load %arg5[%58, %c0_35, %c0_36] : memref<8x1x128xf32, #tpu.memory_space<vmem>>, vector<1x1x128xf32>
    %60 = vector.shape_cast %59 : vector<1x1x128xf32> to vector<1x128xf32>
    %61 = arith.mulf %60, %53 : vector<1x128xf32>
    %62 = arith.index_cast %c3_i32 : i32 to index
    %c0_37 = arith.constant 0 : index
    %c0_38 = arith.constant 0 : index
    %63 = vector.load %arg6[%62, %c0_37, %c0_38] : memref<8x1x128xf32, #tpu.memory_space<vmem>>, vector<1x1x128xf32>
    %64 = vector.shape_cast %63 : vector<1x1x128xf32> to vector<1x128xf32>
    %65 = arith.addf %61, %64 : vector<1x128xf32>
    %66 = arith.index_cast %c3_i32 : i32 to index
    %c0_39 = arith.constant 0 : index
    %c0_40 = arith.constant 0 : index
    %67 = vector.load %arg4[%66, %c0_39, %c0_40] : memref<8x1x128xf32, #tpu.memory_space<vmem>>, vector<1x1x128xf32>
    %68 = vector.shape_cast %67 : vector<1x1x128xf32> to vector<1x128xf32>
    %69 = vector.shape_cast %65 : vector<1x128xf32> to vector<1x1x128xf32>
    tpu.vector_store %arg4[%66, %c0_39, %c0_40], %69 {strides = array<i32>} : memref<8x1x128xf32, #tpu.memory_space<vmem>>, vector<1x1x128xf32>,
    %c4_i32 = arith.constant 4 : i32
    %70 = arith.index_cast %c4_i32 : i32 to index
    %c0_41 = arith.constant 0 : index
    %c0_42 = arith.constant 0 : index
    %71 = vector.load %arg5[%70, %c0_41, %c0_42] : memref<8x1x128xf32, #tpu.memory_space<vmem>>, vector<1x1x128xf32>
    %72 = vector.shape_cast %71 : vector<1x1x128xf32> to vector<1x128xf32>
    %73 = arith.mulf %72, %65 : vector<1x128xf32>
    %74 = arith.index_cast %c4_i32 : i32 to index
    %c0_43 = arith.constant 0 : index
    %c0_44 = arith.constant 0 : index
    %75 = vector.load %arg6[%74, %c0_43, %c0_44] : memref<8x1x128xf32, #tpu.memory_space<vmem>>, vector<1x1x128xf32>
    %76 = vector.shape_cast %75 : vector<1x1x128xf32> to vector<1x128xf32>
    %77 = arith.addf %73, %76 : vector<1x128xf32>
    %78 = arith.index_cast %c4_i32 : i32 to index
    %c0_45 = arith.constant 0 : index
    %c0_46 = arith.constant 0 : index
    %79 = vector.load %arg4[%78, %c0_45, %c0_46] : memref<8x1x128xf32, #tpu.memory_space<vmem>>, vector<1x1x128xf32>
    %80 = vector.shape_cast %79 : vector<1x1x128xf32> to vector<1x128xf32>
    %81 = vector.shape_cast %77 : vector<1x128xf32> to vector<1x1x128xf32>
    tpu.vector_store %arg4[%78, %c0_45, %c0_46], %81 {strides = array<i32>} : memref<8x1x128xf32, #tpu.memory_space<vmem>>, vector<1x1x128xf32>,
    %c5_i32 = arith.constant 5 : i32
    %82 = arith.index_cast %c5_i32 : i32 to index
    %c0_47 = arith.constant 0 : index
    %c0_48 = arith.constant 0 : index
    %83 = vector.load %arg5[%82, %c0_47, %c0_48] : memref<8x1x128xf32, #tpu.memory_space<vmem>>, vector<1x1x128xf32>
    %84 = vector.shape_cast %83 : vector<1x1x128xf32> to vector<1x128xf32>
    %85 = arith.mulf %84, %77 : vector<1x128xf32>
    %86 = arith.index_cast %c5_i32 : i32 to index
    %c0_49 = arith.constant 0 : index
    %c0_50 = arith.constant 0 : index
    %87 = vector.load %arg6[%86, %c0_49, %c0_50] : memref<8x1x128xf32, #tpu.memory_space<vmem>>, vector<1x1x128xf32>
    %88 = vector.shape_cast %87 : vector<1x1x128xf32> to vector<1x128xf32>
    %89 = arith.addf %85, %88 : vector<1x128xf32>
    %90 = arith.index_cast %c5_i32 : i32 to index
    %c0_51 = arith.constant 0 : index
    %c0_52 = arith.constant 0 : index
    %91 = vector.load %arg4[%90, %c0_51, %c0_52] : memref<8x1x128xf32, #tpu.memory_space<vmem>>, vector<1x1x128xf32>
    %92 = vector.shape_cast %91 : vector<1x1x128xf32> to vector<1x128xf32>
    %93 = vector.shape_cast %89 : vector<1x128xf32> to vector<1x1x128xf32>
    tpu.vector_store %arg4[%90, %c0_51, %c0_52], %93 {strides = array<i32>} : memref<8x1x128xf32, #tpu.memory_space<vmem>>, vector<1x1x128xf32>,
    %c6_i32 = arith.constant 6 : i32
    %94 = arith.index_cast %c6_i32 : i32 to index
    %c0_53 = arith.constant 0 : index
    %c0_54 = arith.constant 0 : index
    %95 = vector.load %arg5[%94, %c0_53, %c0_54] : memref<8x1x128xf32, #tpu.memory_space<vmem>>, vector<1x1x128xf32>
    %96 = vector.shape_cast %95 : vector<1x1x128xf32> to vector<1x128xf32>
    %97 = arith.mulf %96, %89 : vector<1x128xf32>
    %98 = arith.index_cast %c6_i32 : i32 to index
    %c0_55 = arith.constant 0 : index
    %c0_56 = arith.constant 0 : index
    %99 = vector.load %arg6[%98, %c0_55, %c0_56] : memref<8x1x128xf32, #tpu.memory_space<vmem>>, vector<1x1x128xf32>
    %100 = vector.shape_cast %99 : vector<1x1x128xf32> to vector<1x128xf32>
    %101 = arith.addf %97, %100 : vector<1x128xf32>
    %102 = arith.index_cast %c6_i32 : i32 to index
    %c0_57 = arith.constant 0 : index
    %c0_58 = arith.constant 0 : index
    %103 = vector.load %arg4[%102, %c0_57, %c0_58] : memref<8x1x128xf32, #tpu.memory_space<vmem>>, vector<1x1x128xf32>
    %104 = vector.shape_cast %103 : vector<1x1x128xf32> to vector<1x128xf32>
    %105 = vector.shape_cast %101 : vector<1x128xf32> to vector<1x1x128xf32>
    tpu.vector_store %arg4[%102, %c0_57, %c0_58], %105 {strides = array<i32>} : memref<8x1x128xf32, #tpu.memory_space<vmem>>, vector<1x1x128xf32>,
    %c7_i32 = arith.constant 7 : i32
    %106 = arith.index_cast %c7_i32 : i32 to index
    %c0_59 = arith.constant 0 : index
    %c0_60 = arith.constant 0 : index
    %107 = vector.load %arg5[%106, %c0_59, %c0_60] : memref<8x1x128xf32, #tpu.memory_space<vmem>>, vector<1x1x128xf32>
    %108 = vector.shape_cast %107 : vector<1x1x128xf32> to vector<1x128xf32>
    %109 = arith.mulf %108, %101 : vector<1x128xf32>
    %110 = arith.index_cast %c7_i32 : i32 to index
    %c0_61 = arith.constant 0 : index
    %c0_62 = arith.constant 0 : index
    %111 = vector.load %arg6[%110, %c0_61, %c0_62] : memref<8x1x128xf32, #tpu.memory_space<vmem>>, vector<1x1x128xf32>
    %112 = vector.shape_cast %111 : vector<1x1x128xf32> to vector<1x128xf32>
    %113 = arith.addf %109, %112 : vector<1x128xf32>
    %114 = arith.index_cast %c7_i32 : i32 to index
    %c0_63 = arith.constant 0 : index
    %c0_64 = arith.constant 0 : index
    %115 = vector.load %arg4[%114, %c0_63, %c0_64] : memref<8x1x128xf32, #tpu.memory_space<vmem>>, vector<1x1x128xf32>
    %116 = vector.shape_cast %115 : vector<1x1x128xf32> to vector<1x128xf32>
    %117 = vector.shape_cast %113 : vector<1x128xf32> to vector<1x1x128xf32>
    tpu.vector_store %arg4[%114, %c0_63, %c0_64], %117 {strides = array<i32>} : memref<8x1x128xf32, #tpu.memory_space<vmem>>, vector<1x1x128xf32>,
    %c8_i32 = arith.constant 8 : i32
    %c0_65 = arith.constant 0 : index
    %c0_66 = arith.constant 0 : index
    %118 = vector.load %arg7[%c0_65, %c0_66] : memref<1x128xf32, #tpu.memory_space<vmem>>, vector<1x128xf32>
    tpu.vector_store %arg7[%c0_65, %c0_66], %113 {strides = array<i32>} : memref<1x128xf32, #tpu.memory_space<vmem>>, vector<1x128xf32>,
    return
  }
  func.func @transform_0(%arg0: i32, %arg1: i32) -> (i32, i32, i32) {
    %c0_i32 = arith.constant 0 : i32
    %c0_i32_0 = arith.constant 0 : i32
    return %arg1, %arg0, %c0_i32 : i32, i32, i32
  }
  func.func @transform_1(%arg0: i32, %arg1: i32) -> (i32, i32, i32) {
    %c0_i32 = arith.constant 0 : i32
    %c0_i32_0 = arith.constant 0 : i32
    return %arg1, %arg0, %c0_i32 : i32, i32, i32
  }
  func.func @transform_2(%arg0: i32, %arg1: i32) -> (i32, i32, i32) {
    %c0_i32 = arith.constant 0 : i32
    %c0_i32_0 = arith.constant 0 : i32
    return %arg1, %arg0, %c0_i32 : i32, i32, i32
  }
}

module attributes {stable_mosaic.version = 11 : i64} {
  func.func @_norm_bitlinear_kernel(%arg0: i32, %arg1: i32, %arg2: memref<16x64xf32, #tpu.memory_space<vmem>>, %arg3: memref<1x64xf32, #tpu.memory_space<vmem>>, %arg4: memref<1x64xf32, #tpu.memory_space<vmem>>, %arg5: memref<64x64xbf16, #tpu.memory_space<vmem>>, %arg6: memref<1x1xf32, #tpu.memory_space<smem>>, %arg7: memref<16x64xf32, #tpu.memory_space<vmem>>, %arg8: memref<16x64xbf16, #tpu.memory_space<vmem>>, %arg9: memref<16x1xf32, #tpu.memory_space<vmem>>) attributes {dimension_semantics = [#tpu.dimension_semantics<parallel>, #tpu.dimension_semantics<arbitrary>], iteration_bounds = array<i64: 1, 1>, scalar_prefetch = 0 : i64, scratch_operands = 2 : i64, tpu.core_type = #tpu.core_type<tc>, window_params = [{transform_indices = @transform_0, window_bounds = array<i64: 16, 64>}, {pipeline_mode = #tpu.pipeline_mode<synchronous>, transform_indices = @transform_1, window_bounds = array<i64: 1, 64>}, {pipeline_mode = #tpu.pipeline_mode<synchronous>, transform_indices = @transform_2, window_bounds = array<i64: 1, 64>}, {transform_indices = @transform_3, window_bounds = array<i64: 64, 64>}, {transform_indices = @transform_4, window_bounds = array<i64: 1, 1>}, {transform_indices = @transform_5, window_bounds = array<i64: 16, 64>}]} {
    %c0_i32 = arith.constant 0 : i32
    %0 = arith.cmpi eq, %arg1, %c0_i32 : i32
    %1 = arith.extui %0 : i1 to i32
    %c0_i32_0 = arith.constant 0 : i32
    %2 = arith.cmpi ne, %1, %c0_i32_0 : i32
    scf.if %2 {
      %c0_11 = arith.constant 0 : index
      %c0_12 = arith.constant 0 : index
      %14 = vector.load %arg2[%c0_11, %c0_12] : memref<16x64xf32, #tpu.memory_space<vmem>>, vector<16x64xf32>
      %15 = arith.mulf %14, %14 : vector<16x64xf32>
      %cst_13 = arith.constant dense<0.000000e+00> : vector<16xf32>
      %16 = vector.multi_reduction <add>, %15, %cst_13 [1] : vector<16x64xf32> to vector<16xf32>
      %17 = vector.shape_cast %16 : vector<16xf32> to vector<16x1xf32>
      %cst_14 = arith.constant 6.400000e+01 : f32
      %18 = vector.broadcast %cst_14 : f32 to vector<16x1xf32>
      %19 = arith.divf %17, %18 : vector<16x1xf32>
      %cst_15 = arith.constant 9.99999997E-7 : f32
      %20 = vector.broadcast %cst_15 : f32 to vector<16x1xf32>
      %21 = arith.addf %19, %20 : vector<16x1xf32>
      %22 = math.rsqrt %21 : vector<16x1xf32>
      %23 = vector.broadcast %22 : vector<16x1xf32> to vector<16x64xf32>
      %24 = arith.mulf %14, %23 : vector<16x64xf32>
      %c0_16 = arith.constant 0 : index
      %c0_17 = arith.constant 0 : index
      %25 = vector.load %arg3[%c0_16, %c0_17] : memref<1x64xf32, #tpu.memory_space<vmem>>, vector<1x64xf32>
      %26 = vector.broadcast %25 : vector<1x64xf32> to vector<16x64xf32>
      %27 = arith.mulf %24, %26 : vector<16x64xf32>
      %c0_18 = arith.constant 0 : index
      %c0_19 = arith.constant 0 : index
      %28 = vector.load %arg4[%c0_18, %c0_19] : memref<1x64xf32, #tpu.memory_space<vmem>>, vector<1x64xf32>
      %29 = arith.mulf %27, %27 : vector<16x64xf32>
      %cst_20 = arith.constant dense<0.000000e+00> : vector<16xf32>
      %30 = vector.multi_reduction <add>, %29, %cst_20 [1] : vector<16x64xf32> to vector<16xf32>
      %31 = vector.shape_cast %30 : vector<16xf32> to vector<16x1xf32>
      %cst_21 = arith.constant 6.400000e+01 : f32
      %32 = vector.broadcast %cst_21 : f32 to vector<16x1xf32>
      %33 = arith.divf %31, %32 : vector<16x1xf32>
      %cst_22 = arith.constant 9.99999993E-9 : f32
      %34 = vector.broadcast %cst_22 : f32 to vector<16x1xf32>
      %35 = arith.addf %33, %34 : vector<16x1xf32>
      %36 = math.rsqrt %35 : vector<16x1xf32>
      %37 = vector.broadcast %36 : vector<16x1xf32> to vector<16x64xf32>
      %38 = arith.mulf %27, %37 : vector<16x64xf32>
      %39 = vector.broadcast %28 : vector<1x64xf32> to vector<16x64xf32>
      %40 = arith.mulf %38, %39 : vector<16x64xf32>
      %41 = math.absf %40 : vector<16x64xf32>
      %cst_23 = arith.constant dense<0xFF800000> : vector<16xf32>
      %42 = vector.multi_reduction <maximumf>, %41, %cst_23 [1] : vector<16x64xf32> to vector<16xf32>
      %43 = vector.shape_cast %42 : vector<16xf32> to vector<16x1xf32>
      %cst_24 = arith.constant 9.99999974E-6 : f32
      %44 = vector.broadcast %cst_24 : f32 to vector<16x1xf32>
      %45 = arith.maximumf %43, %44 : vector<16x1xf32>
      %cst_25 = arith.constant 1.270000e+02 : f32
      %46 = vector.broadcast %cst_25 : f32 to vector<16x1xf32>
      %47 = arith.divf %46, %45 : vector<16x1xf32>
      %48 = vector.broadcast %47 : vector<16x1xf32> to vector<16x64xf32>
      %49 = arith.mulf %40, %48 : vector<16x64xf32>
      %50 = math.roundeven %49 : vector<16x64xf32>
      %cst_26 = arith.constant -1.280000e+02 : f32
      %cst_27 = arith.constant 1.270000e+02 : f32
      %51 = vector.broadcast %cst_26 : f32 to vector<16x64xf32>
      %52 = arith.maximumf %51, %50 : vector<16x64xf32>
      %53 = vector.broadcast %cst_27 : f32 to vector<16x64xf32>
      %54 = arith.minimumf %53, %52 : vector<16x64xf32>
      %55 = arith.truncf %54 : vector<16x64xf32> to vector<16x64xbf16>
      %c0_28 = arith.constant 0 : index
      %c0_29 = arith.constant 0 : index
      %56 = vector.load %arg8[%c0_28, %c0_29] : memref<16x64xbf16, #tpu.memory_space<vmem>>, vector<16x64xbf16>
      tpu.vector_store %arg8[%c0_28, %c0_29], %55 {strides = array<i32>} : memref<16x64xbf16, #tpu.memory_space<vmem>>, vector<16x64xbf16>,
      %c0_30 = arith.constant 0 : index
      %c0_31 = arith.constant 0 : index
      %57 = vector.load %arg9[%c0_30, %c0_31] : memref<16x1xf32, #tpu.memory_space<vmem>>, vector<16x1xf32>
      tpu.vector_store %arg9[%c0_30, %c0_31], %45 {strides = array<i32>} : memref<16x1xf32, #tpu.memory_space<vmem>>, vector<16x1xf32>,
    } else {
    }
    %c0 = arith.constant 0 : index
    %c0_1 = arith.constant 0 : index
    %3 = vector.load %arg8[%c0, %c0_1] : memref<16x64xbf16, #tpu.memory_space<vmem>>, vector<16x64xbf16>
    %c0_2 = arith.constant 0 : index
    %c0_3 = arith.constant 0 : index
    %4 = vector.load %arg5[%c0_2, %c0_3] : memref<64x64xbf16, #tpu.memory_space<vmem>>, vector<64x64xbf16>
    %cst = arith.constant dense<0.000000e+00> : vector<16x64xf32>
    %5 = tpu.matmul %3, %4, %cst {dimension_numbers = #tpu.dot_dimension_numbers<[1], [1], [0], [0], [0, 0, 1, 0], [], []>} : vector<16x64xbf16>, vector<64x64xbf16>, vector<16x64xf32> -> vector<16x64xf32>
    %c0_4 = arith.constant 0 : index
    %c0_5 = arith.constant 0 : index
    %6 = vector.load %arg9[%c0_4, %c0_5] : memref<16x1xf32, #tpu.memory_space<vmem>>, vector<16x1xf32>
    %c0_6 = arith.constant 0 : index
    %c0_7 = arith.constant 0 : index
    %7 = memref.load %arg6[%c0_6, %c0_7] : memref<1x1xf32, #tpu.memory_space<smem>>
    %cst_8 = arith.constant 0.00787401571 : f32
    %8 = arith.mulf %7, %cst_8 : f32
    %9 = vector.broadcast %8 : f32 to vector<16x1xf32>
    %10 = arith.mulf %6, %9 : vector<16x1xf32>
    %11 = vector.broadcast %10 : vector<16x1xf32> to vector<16x64xf32>
    %12 = arith.mulf %5, %11 : vector<16x64xf32>
    %c0_9 = arith.constant 0 : index
    %c0_10 = arith.constant 0 : index
    %13 = vector.load %arg7[%c0_9, %c0_10] : memref<16x64xf32, #tpu.memory_space<vmem>>, vector<16x64xf32>
    tpu.vector_store %arg7[%c0_9, %c0_10], %12 {strides = array<i32>} : memref<16x64xf32, #tpu.memory_space<vmem>>, vector<16x64xf32>,
    return
  }
  func.func @transform_0(%arg0: i32, %arg1: i32) -> (i32, i32) {
    %c0_i32 = arith.constant 0 : i32
    %c0_i32_0 = arith.constant 0 : i32
    return %arg0, %c0_i32 : i32, i32
  }
  func.func @transform_1(%arg0: i32, %arg1: i32) -> (i32, i32) {
    %c0_i32 = arith.constant 0 : i32
    %c0_i32_0 = arith.constant 0 : i32
    %c0_i32_1 = arith.constant 0 : i32
    return %c0_i32, %c0_i32_0 : i32, i32
  }
  func.func @transform_2(%arg0: i32, %arg1: i32) -> (i32, i32) {
    %c0_i32 = arith.constant 0 : i32
    %c0_i32_0 = arith.constant 0 : i32
    %c0_i32_1 = arith.constant 0 : i32
    return %c0_i32, %c0_i32_0 : i32, i32
  }
  func.func @transform_3(%arg0: i32, %arg1: i32) -> (i32, i32) {
    %c0_i32 = arith.constant 0 : i32
    %c0_i32_0 = arith.constant 0 : i32
    return %arg1, %c0_i32 : i32, i32
  }
  func.func @transform_4(%arg0: i32, %arg1: i32) -> (i32, i32) {
    %c0_i32 = arith.constant 0 : i32
    %c0_i32_0 = arith.constant 0 : i32
    %c0_i32_1 = arith.constant 0 : i32
    return %c0_i32, %c0_i32_0 : i32, i32
  }
  func.func @transform_5(%arg0: i32, %arg1: i32) -> (i32, i32) {
    %c0_i32 = arith.constant 0 : i32
    return %arg0, %arg1 : i32, i32
  }
}

module attributes {stable_mosaic.version = 11 : i64} {
  func.func @_gated_bitlinear_kernel(%arg0: i32, %arg1: i32, %arg2: memref<16x64xf32, #tpu.memory_space<vmem>>, %arg3: memref<16x64xf32, #tpu.memory_space<vmem>>, %arg4: memref<1x64xf32, #tpu.memory_space<vmem>>, %arg5: memref<1x64xf32, #tpu.memory_space<vmem>>, %arg6: memref<64x64xbf16, #tpu.memory_space<vmem>>, %arg7: memref<1x1xf32, #tpu.memory_space<smem>>, %arg8: memref<16x64xf32, #tpu.memory_space<vmem>>, %arg9: memref<16x64xf32, #tpu.memory_space<vmem>>, %arg10: memref<16x64xbf16, #tpu.memory_space<vmem>>, %arg11: memref<16x1xf32, #tpu.memory_space<vmem>>) attributes {dimension_semantics = [#tpu.dimension_semantics<parallel>, #tpu.dimension_semantics<arbitrary>], iteration_bounds = array<i64: 1, 1>, scalar_prefetch = 0 : i64, scratch_operands = 2 : i64, tpu.core_type = #tpu.core_type<tc>, window_params = [{transform_indices = @transform_0, window_bounds = array<i64: 16, 64>}, {transform_indices = @transform_1, window_bounds = array<i64: 16, 64>}, {pipeline_mode = #tpu.pipeline_mode<synchronous>, transform_indices = @transform_2, window_bounds = array<i64: 1, 64>}, {pipeline_mode = #tpu.pipeline_mode<synchronous>, transform_indices = @transform_3, window_bounds = array<i64: 1, 64>}, {transform_indices = @transform_4, window_bounds = array<i64: 64, 64>}, {transform_indices = @transform_5, window_bounds = array<i64: 1, 1>}, {transform_indices = @transform_6, window_bounds = array<i64: 16, 64>}, {transform_indices = @transform_7, window_bounds = array<i64: 16, 64>}]} {
    %c0_i32 = arith.constant 0 : i32
    %0 = arith.cmpi eq, %arg1, %c0_i32 : i32
    %1 = arith.extui %0 : i1 to i32
    %c0_i32_0 = arith.constant 0 : i32
    %2 = arith.cmpi ne, %1, %c0_i32_0 : i32
    scf.if %2 {
      %c0_13 = arith.constant 0 : index
      %c0_14 = arith.constant 0 : index
      %16 = vector.load %arg2[%c0_13, %c0_14] : memref<16x64xf32, #tpu.memory_space<vmem>>, vector<16x64xf32>
      %c0_15 = arith.constant 0 : index
      %c0_16 = arith.constant 0 : index
      %17 = vector.load %arg3[%c0_15, %c0_16] : memref<16x64xf32, #tpu.memory_space<vmem>>, vector<16x64xf32>
      %18 = arith.mulf %16, %16 : vector<16x64xf32>
      %cst_17 = arith.constant dense<0.000000e+00> : vector<16xf32>
      %19 = vector.multi_reduction <add>, %18, %cst_17 [1] : vector<16x64xf32> to vector<16xf32>
      %20 = vector.shape_cast %19 : vector<16xf32> to vector<16x1xf32>
      %cst_18 = arith.constant 6.400000e+01 : f32
      %21 = vector.broadcast %cst_18 : f32 to vector<16x1xf32>
      %22 = arith.divf %20, %21 : vector<16x1xf32>
      %cst_19 = arith.constant 9.99999997E-7 : f32
      %23 = vector.broadcast %cst_19 : f32 to vector<16x1xf32>
      %24 = arith.addf %22, %23 : vector<16x1xf32>
      %25 = math.rsqrt %24 : vector<16x1xf32>
      %26 = vector.broadcast %25 : vector<16x1xf32> to vector<16x64xf32>
      %27 = arith.mulf %16, %26 : vector<16x64xf32>
      %c0_20 = arith.constant 0 : index
      %c0_21 = arith.constant 0 : index
      %28 = vector.load %arg4[%c0_20, %c0_21] : memref<1x64xf32, #tpu.memory_space<vmem>>, vector<1x64xf32>
      %29 = vector.broadcast %28 : vector<1x64xf32> to vector<16x64xf32>
      %30 = arith.mulf %27, %29 : vector<16x64xf32>
      %31 = arith.negf %17 : vector<16x64xf32>
      %32 = math.exp %31 : vector<16x64xf32>
      %cst_22 = arith.constant 1.000000e+00 : f32
      %33 = vector.broadcast %cst_22 : f32 to vector<16x64xf32>
      %34 = arith.addf %33, %32 : vector<16x64xf32>
      %35 = arith.divf %33, %34 : vector<16x64xf32>
      %36 = arith.mulf %17, %35 : vector<16x64xf32>
      %37 = arith.mulf %30, %36 : vector<16x64xf32>
      %c0_23 = arith.constant 0 : index
      %c0_24 = arith.constant 0 : index
      %38 = vector.load %arg5[%c0_23, %c0_24] : memref<1x64xf32, #tpu.memory_space<vmem>>, vector<1x64xf32>
      %39 = arith.mulf %37, %37 : vector<16x64xf32>
      %cst_25 = arith.constant dense<0.000000e+00> : vector<16xf32>
      %40 = vector.multi_reduction <add>, %39, %cst_25 [1] : vector<16x64xf32> to vector<16xf32>
      %41 = vector.shape_cast %40 : vector<16xf32> to vector<16x1xf32>
      %cst_26 = arith.constant 6.400000e+01 : f32
      %42 = vector.broadcast %cst_26 : f32 to vector<16x1xf32>
      %43 = arith.divf %41, %42 : vector<16x1xf32>
      %cst_27 = arith.constant 9.99999993E-9 : f32
      %44 = vector.broadcast %cst_27 : f32 to vector<16x1xf32>
      %45 = arith.addf %43, %44 : vector<16x1xf32>
      %46 = math.rsqrt %45 : vector<16x1xf32>
      %47 = vector.broadcast %46 : vector<16x1xf32> to vector<16x64xf32>
      %48 = arith.mulf %37, %47 : vector<16x64xf32>
      %49 = vector.broadcast %38 : vector<1x64xf32> to vector<16x64xf32>
      %50 = arith.mulf %48, %49 : vector<16x64xf32>
      %51 = math.absf %50 : vector<16x64xf32>
      %cst_28 = arith.constant dense<0xFF800000> : vector<16xf32>
      %52 = vector.multi_reduction <maximumf>, %51, %cst_28 [1] : vector<16x64xf32> to vector<16xf32>
      %53 = vector.shape_cast %52 : vector<16xf32> to vector<16x1xf32>
      %cst_29 = arith.constant 9.99999974E-6 : f32
      %54 = vector.broadcast %cst_29 : f32 to vector<16x1xf32>
      %55 = arith.maximumf %53, %54 : vector<16x1xf32>
      %cst_30 = arith.constant 1.270000e+02 : f32
      %56 = vector.broadcast %cst_30 : f32 to vector<16x1xf32>
      %57 = arith.divf %56, %55 : vector<16x1xf32>
      %58 = vector.broadcast %57 : vector<16x1xf32> to vector<16x64xf32>
      %59 = arith.mulf %50, %58 : vector<16x64xf32>
      %60 = math.roundeven %59 : vector<16x64xf32>
      %cst_31 = arith.constant -1.280000e+02 : f32
      %cst_32 = arith.constant 1.270000e+02 : f32
      %61 = vector.broadcast %cst_31 : f32 to vector<16x64xf32>
      %62 = arith.maximumf %61, %60 : vector<16x64xf32>
      %63 = vector.broadcast %cst_32 : f32 to vector<16x64xf32>
      %64 = arith.minimumf %63, %62 : vector<16x64xf32>
      %65 = arith.truncf %64 : vector<16x64xf32> to vector<16x64xbf16>
      %c0_33 = arith.constant 0 : index
      %c0_34 = arith.constant 0 : index
      %66 = vector.load %arg10[%c0_33, %c0_34] : memref<16x64xbf16, #tpu.memory_space<vmem>>, vector<16x64xbf16>
      tpu.vector_store %arg10[%c0_33, %c0_34], %65 {strides = array<i32>} : memref<16x64xbf16, #tpu.memory_space<vmem>>, vector<16x64xbf16>,
      %c0_35 = arith.constant 0 : index
      %c0_36 = arith.constant 0 : index
      %67 = vector.load %arg11[%c0_35, %c0_36] : memref<16x1xf32, #tpu.memory_space<vmem>>, vector<16x1xf32>
      tpu.vector_store %arg11[%c0_35, %c0_36], %55 {strides = array<i32>} : memref<16x1xf32, #tpu.memory_space<vmem>>, vector<16x1xf32>,
    } else {
    }
    %c0 = arith.constant 0 : index
    %c0_1 = arith.constant 0 : index
    %3 = vector.load %arg8[%c0, %c0_1] : memref<16x64xf32, #tpu.memory_space<vmem>>, vector<16x64xf32>
    %c0_2 = arith.constant 0 : index
    %c0_3 = arith.constant 0 : index
    %4 = vector.load %arg10[%c0_2, %c0_3] : memref<16x64xbf16, #tpu.memory_space<vmem>>, vector<16x64xbf16>
    %c0_4 = arith.constant 0 : index
    %c0_5 = arith.constant 0 : index
    %5 = vector.load %arg6[%c0_4, %c0_5] : memref<64x64xbf16, #tpu.memory_space<vmem>>, vector<64x64xbf16>
    %cst = arith.constant dense<0.000000e+00> : vector<16x64xf32>
    %6 = tpu.matmul %4, %5, %cst {dimension_numbers = #tpu.dot_dimension_numbers<[1], [1], [0], [0], [0, 0, 1, 0], [], []>} : vector<16x64xbf16>, vector<64x64xbf16>, vector<16x64xf32> -> vector<16x64xf32>
    %c0_6 = arith.constant 0 : index
    %c0_7 = arith.constant 0 : index
    %7 = vector.load %arg11[%c0_6, %c0_7] : memref<16x1xf32, #tpu.memory_space<vmem>>, vector<16x1xf32>
    %c0_8 = arith.constant 0 : index
    %c0_9 = arith.constant 0 : index
    %8 = memref.load %arg7[%c0_8, %c0_9] : memref<1x1xf32, #tpu.memory_space<smem>>
    %cst_10 = arith.constant 0.00787401571 : f32
    %9 = arith.mulf %8, %cst_10 : f32
    %10 = vector.broadcast %9 : f32 to vector<16x1xf32>
    %11 = arith.mulf %7, %10 : vector<16x1xf32>
    %12 = vector.broadcast %11 : vector<16x1xf32> to vector<16x64xf32>
    %13 = arith.mulf %6, %12 : vector<16x64xf32>
    %14 = arith.addf %3, %13 : vector<16x64xf32>
    %c0_11 = arith.constant 0 : index
    %c0_12 = arith.constant 0 : index
    %15 = vector.load %arg9[%c0_11, %c0_12] : memref<16x64xf32, #tpu.memory_space<vmem>>, vector<16x64xf32>
    tpu.vector_store %arg9[%c0_11, %c0_12], %14 {strides = array<i32>} : memref<16x64xf32, #tpu.memory_space<vmem>>, vector<16x64xf32>,
    return
  }
  func.func @transform_0(%arg0: i32, %arg1: i32) -> (i32, i32) {
    %c0_i32 = arith.constant 0 : i32
    %c0_i32_0 = arith.constant 0 : i32
    return %arg0, %c0_i32 : i32, i32
  }
  func.func @transform_1(%arg0: i32, %arg1: i32) -> (i32, i32) {
    %c0_i32 = arith.constant 0 : i32
    %c0_i32_0 = arith.constant 0 : i32
    return %arg0, %c0_i32 : i32, i32
  }
  func.func @transform_2(%arg0: i32, %arg1: i32) -> (i32, i32) {
    %c0_i32 = arith.constant 0 : i32
    %c0_i32_0 = arith.constant 0 : i32
    %c0_i32_1 = arith.constant 0 : i32
    return %c0_i32, %c0_i32_0 : i32, i32
  }
  func.func @transform_3(%arg0: i32, %arg1: i32) -> (i32, i32) {
    %c0_i32 = arith.constant 0 : i32
    %c0_i32_0 = arith.constant 0 : i32
    %c0_i32_1 = arith.constant 0 : i32
    return %c0_i32, %c0_i32_0 : i32, i32
  }
  func.func @transform_4(%arg0: i32, %arg1: i32) -> (i32, i32) {
    %c0_i32 = arith.constant 0 : i32
    %c0_i32_0 = arith.constant 0 : i32
    return %arg1, %c0_i32 : i32, i32
  }
  func.func @transform_5(%arg0: i32, %arg1: i32) -> (i32, i32) {
    %c0_i32 = arith.constant 0 : i32
    %c0_i32_0 = arith.constant 0 : i32
    %c0_i32_1 = arith.constant 0 : i32
    return %c0_i32, %c0_i32_0 : i32, i32
  }
  func.func @transform_6(%arg0: i32, %arg1: i32) -> (i32, i32) {
    %c0_i32 = arith.constant 0 : i32
    return %arg0, %arg1 : i32, i32
  }
  func.func @transform_7(%arg0: i32, %arg1: i32) -> (i32, i32) {
    %c0_i32 = arith.constant 0 : i32
    return %arg0, %arg1 : i32, i32
  }
}

module attributes {stable_mosaic.version = 11 : i64} {
  func.func @_norm_bitlinear_kernel(%arg0: i32, %arg1: i32, %arg2: memref<16x64xf32, #tpu.memory_space<vmem>>, %arg3: memref<1x64xf32, #tpu.memory_space<vmem>>, %arg4: memref<1x64xf32, #tpu.memory_space<vmem>>, %arg5: memref<512x64xbf16, #tpu.memory_space<vmem>>, %arg6: memref<1x1xf32, #tpu.memory_space<smem>>, %arg7: memref<16x512xf32, #tpu.memory_space<vmem>>, %arg8: memref<16x64xbf16, #tpu.memory_space<vmem>>, %arg9: memref<16x1xf32, #tpu.memory_space<vmem>>) attributes {dimension_semantics = [#tpu.dimension_semantics<parallel>, #tpu.dimension_semantics<arbitrary>], iteration_bounds = array<i64: 1, 1>, scalar_prefetch = 0 : i64, scratch_operands = 2 : i64, tpu.core_type = #tpu.core_type<tc>, window_params = [{transform_indices = @transform_0, window_bounds = array<i64: 16, 64>}, {pipeline_mode = #tpu.pipeline_mode<synchronous>, transform_indices = @transform_1, window_bounds = array<i64: 1, 64>}, {pipeline_mode = #tpu.pipeline_mode<synchronous>, transform_indices = @transform_2, window_bounds = array<i64: 1, 64>}, {transform_indices = @transform_3, window_bounds = array<i64: 512, 64>}, {transform_indices = @transform_4, window_bounds = array<i64: 1, 1>}, {transform_indices = @transform_5, window_bounds = array<i64: 16, 512>}]} {
    %c0_i32 = arith.constant 0 : i32
    %0 = arith.cmpi eq, %arg1, %c0_i32 : i32
    %1 = arith.extui %0 : i1 to i32
    %c0_i32_0 = arith.constant 0 : i32
    %2 = arith.cmpi ne, %1, %c0_i32_0 : i32
    scf.if %2 {
      %c0_11 = arith.constant 0 : index
      %c0_12 = arith.constant 0 : index
      %14 = vector.load %arg2[%c0_11, %c0_12] : memref<16x64xf32, #tpu.memory_space<vmem>>, vector<16x64xf32>
      %15 = arith.mulf %14, %14 : vector<16x64xf32>
      %cst_13 = arith.constant dense<0.000000e+00> : vector<16xf32>
      %16 = vector.multi_reduction <add>, %15, %cst_13 [1] : vector<16x64xf32> to vector<16xf32>
      %17 = vector.shape_cast %16 : vector<16xf32> to vector<16x1xf32>
      %cst_14 = arith.constant 6.400000e+01 : f32
      %18 = vector.broadcast %cst_14 : f32 to vector<16x1xf32>
      %19 = arith.divf %17, %18 : vector<16x1xf32>
      %cst_15 = arith.constant 9.99999997E-7 : f32
      %20 = vector.broadcast %cst_15 : f32 to vector<16x1xf32>
      %21 = arith.addf %19, %20 : vector<16x1xf32>
      %22 = math.rsqrt %21 : vector<16x1xf32>
      %23 = vector.broadcast %22 : vector<16x1xf32> to vector<16x64xf32>
      %24 = arith.mulf %14, %23 : vector<16x64xf32>
      %c0_16 = arith.constant 0 : index
      %c0_17 = arith.constant 0 : index
      %25 = vector.load %arg3[%c0_16, %c0_17] : memref<1x64xf32, #tpu.memory_space<vmem>>, vector<1x64xf32>
      %26 = vector.broadcast %25 : vector<1x64xf32> to vector<16x64xf32>
      %27 = arith.mulf %24, %26 : vector<16x64xf32>
      %c0_18 = arith.constant 0 : index
      %c0_19 = arith.constant 0 : index
      %28 = vector.load %arg4[%c0_18, %c0_19] : memref<1x64xf32, #tpu.memory_space<vmem>>, vector<1x64xf32>
      %29 = arith.mulf %27, %27 : vector<16x64xf32>
      %cst_20 = arith.constant dense<0.000000e+00> : vector<16xf32>
      %30 = vector.multi_reduction <add>, %29, %cst_20 [1] : vector<16x64xf32> to vector<16xf32>
      %31 = vector.shape_cast %30 : vector<16xf32> to vector<16x1xf32>
      %cst_21 = arith.constant 6.400000e+01 : f32
      %32 = vector.broadcast %cst_21 : f32 to vector<16x1xf32>
      %33 = arith.divf %31, %32 : vector<16x1xf32>
      %cst_22 = arith.constant 9.99999993E-9 : f32
      %34 = vector.broadcast %cst_22 : f32 to vector<16x1xf32>
      %35 = arith.addf %33, %34 : vector<16x1xf32>
      %36 = math.rsqrt %35 : vector<16x1xf32>
      %37 = vector.broadcast %36 : vector<16x1xf32> to vector<16x64xf32>
      %38 = arith.mulf %27, %37 : vector<16x64xf32>
      %39 = vector.broadcast %28 : vector<1x64xf32> to vector<16x64xf32>
      %40 = arith.mulf %38, %39 : vector<16x64xf32>
      %41 = math.absf %40 : vector<16x64xf32>
      %cst_23 = arith.constant dense<0xFF800000> : vector<16xf32>
      %42 = vector.multi_reduction <maximumf>, %41, %cst_23 [1] : vector<16x64xf32> to vector<16xf32>
      %43 = vector.shape_cast %42 : vector<16xf32> to vector<16x1xf32>
      %cst_24 = arith.constant 9.99999974E-6 : f32
      %44 = vector.broadcast %cst_24 : f32 to vector<16x1xf32>
      %45 = arith.maximumf %43, %44 : vector<16x1xf32>
      %cst_25 = arith.constant 1.270000e+02 : f32
      %46 = vector.broadcast %cst_25 : f32 to vector<16x1xf32>
      %47 = arith.divf %46, %45 : vector<16x1xf32>
      %48 = vector.broadcast %47 : vector<16x1xf32> to vector<16x64xf32>
      %49 = arith.mulf %40, %48 : vector<16x64xf32>
      %50 = math.roundeven %49 : vector<16x64xf32>
      %cst_26 = arith.constant -1.280000e+02 : f32
      %cst_27 = arith.constant 1.270000e+02 : f32
      %51 = vector.broadcast %cst_26 : f32 to vector<16x64xf32>
      %52 = arith.maximumf %51, %50 : vector<16x64xf32>
      %53 = vector.broadcast %cst_27 : f32 to vector<16x64xf32>
      %54 = arith.minimumf %53, %52 : vector<16x64xf32>
      %55 = arith.truncf %54 : vector<16x64xf32> to vector<16x64xbf16>
      %c0_28 = arith.constant 0 : index
      %c0_29 = arith.constant 0 : index
      %56 = vector.load %arg8[%c0_28, %c0_29] : memref<16x64xbf16, #tpu.memory_space<vmem>>, vector<16x64xbf16>
      tpu.vector_store %arg8[%c0_28, %c0_29], %55 {strides = array<i32>} : memref<16x64xbf16, #tpu.memory_space<vmem>>, vector<16x64xbf16>,
      %c0_30 = arith.constant 0 : index
      %c0_31 = arith.constant 0 : index
      %57 = vector.load %arg9[%c0_30, %c0_31] : memref<16x1xf32, #tpu.memory_space<vmem>>, vector<16x1xf32>
      tpu.vector_store %arg9[%c0_30, %c0_31], %45 {strides = array<i32>} : memref<16x1xf32, #tpu.memory_space<vmem>>, vector<16x1xf32>,
    } else {
    }
    %c0 = arith.constant 0 : index
    %c0_1 = arith.constant 0 : index
    %3 = vector.load %arg8[%c0, %c0_1] : memref<16x64xbf16, #tpu.memory_space<vmem>>, vector<16x64xbf16>
    %c0_2 = arith.constant 0 : index
    %c0_3 = arith.constant 0 : index
    %4 = vector.load %arg5[%c0_2, %c0_3] : memref<512x64xbf16, #tpu.memory_space<vmem>>, vector<512x64xbf16>
    %cst = arith.constant dense<0.000000e+00> : vector<16x512xf32>
    %5 = tpu.matmul %3, %4, %cst {dimension_numbers = #tpu.dot_dimension_numbers<[1], [1], [0], [0], [0, 0, 1, 0], [], []>} : vector<16x64xbf16>, vector<512x64xbf16>, vector<16x512xf32> -> vector<16x512xf32>
    %c0_4 = arith.constant 0 : index
    %c0_5 = arith.constant 0 : index
    %6 = vector.load %arg9[%c0_4, %c0_5] : memref<16x1xf32, #tpu.memory_space<vmem>>, vector<16x1xf32>
    %c0_6 = arith.constant 0 : index
    %c0_7 = arith.constant 0 : index
    %7 = memref.load %arg6[%c0_6, %c0_7] : memref<1x1xf32, #tpu.memory_space<smem>>
    %cst_8 = arith.constant 0.00787401571 : f32
    %8 = arith.mulf %7, %cst_8 : f32
    %9 = vector.broadcast %8 : f32 to vector<16x1xf32>
    %10 = arith.mulf %6, %9 : vector<16x1xf32>
    %11 = vector.broadcast %10 : vector<16x1xf32> to vector<16x512xf32>
    %12 = arith.mulf %5, %11 : vector<16x512xf32>
    %c0_9 = arith.constant 0 : index
    %c0_10 = arith.constant 0 : index
    %13 = vector.load %arg7[%c0_9, %c0_10] : memref<16x512xf32, #tpu.memory_space<vmem>>, vector<16x512xf32>
    tpu.vector_store %arg7[%c0_9, %c0_10], %12 {strides = array<i32>} : memref<16x512xf32, #tpu.memory_space<vmem>>, vector<16x512xf32>,
    return
  }
  func.func @transform_0(%arg0: i32, %arg1: i32) -> (i32, i32) {
    %c0_i32 = arith.constant 0 : i32
    %c0_i32_0 = arith.constant 0 : i32
    return %arg0, %c0_i32 : i32, i32
  }
  func.func @transform_1(%arg0: i32, %arg1: i32) -> (i32, i32) {
    %c0_i32 = arith.constant 0 : i32
    %c0_i32_0 = arith.constant 0 : i32
    %c0_i32_1 = arith.constant 0 : i32
    return %c0_i32, %c0_i32_0 : i32, i32
  }
  func.func @transform_2(%arg0: i32, %arg1: i32) -> (i32, i32) {
    %c0_i32 = arith.constant 0 : i32
    %c0_i32_0 = arith.constant 0 : i32
    %c0_i32_1 = arith.constant 0 : i32
    return %c0_i32, %c0_i32_0 : i32, i32
  }
  func.func @transform_3(%arg0: i32, %arg1: i32) -> (i32, i32) {
    %c0_i32 = arith.constant 0 : i32
    %c0_i32_0 = arith.constant 0 : i32
    return %arg1, %c0_i32 : i32, i32
  }
  func.func @transform_4(%arg0: i32, %arg1: i32) -> (i32, i32) {
    %c0_i32 = arith.constant 0 : i32
    %c0_i32_0 = arith.constant 0 : i32
    %c0_i32_1 = arith.constant 0 : i32
    return %c0_i32, %c0_i32_0 : i32, i32
  }
  func.func @transform_5(%arg0: i32, %arg1: i32) -> (i32, i32) {
    %c0_i32 = arith.constant 0 : i32
    return %arg0, %arg1 : i32, i32
  }
}

module attributes {stable_mosaic.version = 11 : i64} {
  func.func @_swiglu_bitlinear_kernel(%arg0: i32, %arg1: i32, %arg2: memref<16x512xf32, #tpu.memory_space<vmem>>, %arg3: memref<1x256xf32, #tpu.memory_space<vmem>>, %arg4: memref<64x256xbf16, #tpu.memory_space<vmem>>, %arg5: memref<1x1xf32, #tpu.memory_space<smem>>, %arg6: memref<16x64xf32, #tpu.memory_space<vmem>>, %arg7: memref<16x64xf32, #tpu.memory_space<vmem>>, %arg8: memref<16x256xbf16, #tpu.memory_space<vmem>>, %arg9: memref<16x1xf32, #tpu.memory_space<vmem>>) attributes {dimension_semantics = [#tpu.dimension_semantics<parallel>, #tpu.dimension_semantics<arbitrary>], iteration_bounds = array<i64: 1, 1>, scalar_prefetch = 0 : i64, scratch_operands = 2 : i64, tpu.core_type = #tpu.core_type<tc>, window_params = [{transform_indices = @transform_0, window_bounds = array<i64: 16, 512>}, {pipeline_mode = #tpu.pipeline_mode<synchronous>, transform_indices = @transform_1, window_bounds = array<i64: 1, 256>}, {transform_indices = @transform_2, window_bounds = array<i64: 64, 256>}, {transform_indices = @transform_3, window_bounds = array<i64: 1, 1>}, {transform_indices = @transform_4, window_bounds = array<i64: 16, 64>}, {transform_indices = @transform_5, window_bounds = array<i64: 16, 64>}]} {
    %c0_i32 = arith.constant 0 : i32
    %0 = arith.cmpi eq, %arg1, %c0_i32 : i32
    %1 = arith.extui %0 : i1 to i32
    %c0_i32_0 = arith.constant 0 : i32
    %2 = arith.cmpi ne, %1, %c0_i32_0 : i32
    scf.if %2 {
      %c0_13 = arith.constant 0 : index
      %c0_14 = arith.constant 0 : index
      %16 = vector.load %arg2[%c0_13, %c0_14] : memref<16x512xf32, #tpu.memory_space<vmem>>, vector<16x512xf32>
      %17 = vector.extract_strided_slice %16 {offsets = [0, 0], sizes = [16, 256], strides = [1, 1]} : vector<16x512xf32> to vector<16x256xf32>
      %18 = arith.negf %17 : vector<16x256xf32>
      %19 = math.exp %18 : vector<16x256xf32>
      %cst_15 = arith.constant 1.000000e+00 : f32
      %20 = vector.broadcast %cst_15 : f32 to vector<16x256xf32>
      %21 = arith.addf %20, %19 : vector<16x256xf32>
      %22 = arith.divf %20, %21 : vector<16x256xf32>
      %23 = arith.mulf %17, %22 : vector<16x256xf32>
      %24 = vector.extract_strided_slice %16 {offsets = [0, 256], sizes = [16, 256], strides = [1, 1]} : vector<16x512xf32> to vector<16x256xf32>
      %25 = arith.mulf %23, %24 : vector<16x256xf32>
      %c0_16 = arith.constant 0 : index
      %c0_17 = arith.constant 0 : index
      %26 = vector.load %arg3[%c0_16, %c0_17] : memref<1x256xf32, #tpu.memory_space<vmem>>, vector<1x256xf32>
      %27 = arith.mulf %25, %25 : vector<16x256xf32>
      %cst_18 = arith.constant dense<0.000000e+00> : vector<16xf32>
      %28 = vector.multi_reduction <add>, %27, %cst_18 [1] : vector<16x256xf32> to vector<16xf32>
      %29 = vector.shape_cast %28 : vector<16xf32> to vector<16x1xf32>
      %cst_19 = arith.constant 2.560000e+02 : f32
      %30 = vector.broadcast %cst_19 : f32 to vector<16x1xf32>
      %31 = arith.divf %29, %30 : vector<16x1xf32>
      %cst_20 = arith.constant 9.99999993E-9 : f32
      %32 = vector.broadcast %cst_20 : f32 to vector<16x1xf32>
      %33 = arith.addf %31, %32 : vector<16x1xf32>
      %34 = math.rsqrt %33 : vector<16x1xf32>
      %35 = vector.broadcast %34 : vector<16x1xf32> to vector<16x256xf32>
      %36 = arith.mulf %25, %35 : vector<16x256xf32>
      %37 = vector.broadcast %26 : vector<1x256xf32> to vector<16x256xf32>
      %38 = arith.mulf %36, %37 : vector<16x256xf32>
      %39 = math.absf %38 : vector<16x256xf32>
      %cst_21 = arith.constant dense<0xFF800000> : vector<16xf32>
      %40 = vector.multi_reduction <maximumf>, %39, %cst_21 [1] : vector<16x256xf32> to vector<16xf32>
      %41 = vector.shape_cast %40 : vector<16xf32> to vector<16x1xf32>
      %cst_22 = arith.constant 9.99999974E-6 : f32
      %42 = vector.broadcast %cst_22 : f32 to vector<16x1xf32>
      %43 = arith.maximumf %41, %42 : vector<16x1xf32>
      %cst_23 = arith.constant 1.270000e+02 : f32
      %44 = vector.broadcast %cst_23 : f32 to vector<16x1xf32>
      %45 = arith.divf %44, %43 : vector<16x1xf32>
      %46 = vector.broadcast %45 : vector<16x1xf32> to vector<16x256xf32>
      %47 = arith.mulf %38, %46 : vector<16x256xf32>
      %48 = math.roundeven %47 : vector<16x256xf32>
      %cst_24 = arith.constant -1.280000e+02 : f32
      %cst_25 = arith.constant 1.270000e+02 : f32
      %49 = vector.broadcast %cst_24 : f32 to vector<16x256xf32>
      %50 = arith.maximumf %49, %48 : vector<16x256xf32>
      %51 = vector.broadcast %cst_25 : f32 to vector<16x256xf32>
      %52 = arith.minimumf %51, %50 : vector<16x256xf32>
      %53 = arith.truncf %52 : vector<16x256xf32> to vector<16x256xbf16>
      %c0_26 = arith.constant 0 : index
      %c0_27 = arith.constant 0 : index
      %54 = vector.load %arg8[%c0_26, %c0_27] : memref<16x256xbf16, #tpu.memory_space<vmem>>, vector<16x256xbf16>
      tpu.vector_store %arg8[%c0_26, %c0_27], %53 {strides = array<i32>} : memref<16x256xbf16, #tpu.memory_space<vmem>>, vector<16x256xbf16>,
      %c0_28 = arith.constant 0 : index
      %c0_29 = arith.constant 0 : index
      %55 = vector.load %arg9[%c0_28, %c0_29] : memref<16x1xf32, #tpu.memory_space<vmem>>, vector<16x1xf32>
      tpu.vector_store %arg9[%c0_28, %c0_29], %43 {strides = array<i32>} : memref<16x1xf32, #tpu.memory_space<vmem>>, vector<16x1xf32>,
    } else {
    }
    %c0 = arith.constant 0 : index
    %c0_1 = arith.constant 0 : index
    %3 = vector.load %arg6[%c0, %c0_1] : memref<16x64xf32, #tpu.memory_space<vmem>>, vector<16x64xf32>
    %c0_2 = arith.constant 0 : index
    %c0_3 = arith.constant 0 : index
    %4 = vector.load %arg8[%c0_2, %c0_3] : memref<16x256xbf16, #tpu.memory_space<vmem>>, vector<16x256xbf16>
    %c0_4 = arith.constant 0 : index
    %c0_5 = arith.constant 0 : index
    %5 = vector.load %arg4[%c0_4, %c0_5] : memref<64x256xbf16, #tpu.memory_space<vmem>>, vector<64x256xbf16>
    %cst = arith.constant dense<0.000000e+00> : vector<16x64xf32>
    %6 = tpu.matmul %4, %5, %cst {dimension_numbers = #tpu.dot_dimension_numbers<[1], [1], [0], [0], [0, 0, 1, 0], [], []>} : vector<16x256xbf16>, vector<64x256xbf16>, vector<16x64xf32> -> vector<16x64xf32>
    %c0_6 = arith.constant 0 : index
    %c0_7 = arith.constant 0 : index
    %7 = vector.load %arg9[%c0_6, %c0_7] : memref<16x1xf32, #tpu.memory_space<vmem>>, vector<16x1xf32>
    %c0_8 = arith.constant 0 : index
    %c0_9 = arith.constant 0 : index
    %8 = memref.load %arg5[%c0_8, %c0_9] : memref<1x1xf32, #tpu.memory_space<smem>>
    %cst_10 = arith.constant 0.00787401571 : f32
    %9 = arith.mulf %8, %cst_10 : f32
    %10 = vector.broadcast %9 : f32 to vector<16x1xf32>
    %11 = arith.mulf %7, %10 : vector<16x1xf32>
    %12 = vector.broadcast %11 : vector<16x1xf32> to vector<16x64xf32>
    %13 = arith.mulf %6, %12 : vector<16x64xf32>
    %14 = arith.addf %3, %13 : vector<16x64xf32>
    %c0_11 = arith.constant 0 : index
    %c0_12 = arith.constant 0 : index
    %15 = vector.load %arg7[%c0_11, %c0_12] : memref<16x64xf32, #tpu.memory_space<vmem>>, vector<16x64xf32>
    tpu.vector_store %arg7[%c0_11, %c0_12], %14 {strides = array<i32>} : memref<16x64xf32, #tpu.memory_space<vmem>>, vector<16x64xf32>,
    return
  }
  func.func @transform_0(%arg0: i32, %arg1: i32) -> (i32, i32) {
    %c0_i32 = arith.constant 0 : i32
    %c0_i32_0 = arith.constant 0 : i32
    return %arg0, %c0_i32 : i32, i32
  }
  func.func @transform_1(%arg0: i32, %arg1: i32) -> (i32, i32) {
    %c0_i32 = arith.constant 0 : i32
    %c0_i32_0 = arith.constant 0 : i32
    %c0_i32_1 = arith.constant 0 : i32
    return %c0_i32, %c0_i32_0 : i32, i32
  }
  func.func @transform_2(%arg0: i32, %arg1: i32) -> (i32, i32) {
    %c0_i32 = arith.constant 0 : i32
    %c0_i32_0 = arith.constant 0 : i32
    return %arg1, %c0_i32 : i32, i32
  }
  func.func @transform_3(%arg0: i32, %arg1: i32) -> (i32, i32) {
    %c0_i32 = arith.constant 0 : i32
    %c0_i32_0 = arith.constant 0 : i32
    %c0_i32_1 = arith.constant 0 : i32
    return %c0_i32, %c0_i32_0 : i32, i32
  }
  func.func @transform_4(%arg0: i32, %arg1: i32) -> (i32, i32) {
    %c0_i32 = arith.constant 0 : i32
    return %arg0, %arg1 : i32, i32
  }
  func.func @transform_5(%arg0: i32, %arg1: i32) -> (i32, i32) {
    %c0_i32 = arith.constant 0 : i32
    return %arg0, %arg1 : i32, i32
  }
}

</mosaic_0001>

<bundles_post_ra>
// kernel: hgrn_bit_block.10
= control target key start
LH: loop header
LB: loop body
LE: loop exit
PB: predicated region body
PF: predicated region fallthrough
CT: control target
= control target key end

     0   :  { %7 = vsyncpa [#allocation6], 0  ;;  %s534_s0 = inlined_call_operand.hbm [shape: f32[8,1,128], index: 0, kind: input, shape index: {}]   ;;  %s535_s1 = inlined_call_operand.hbm [shape: f32[8,1,128], index: 1, kind: input, shape index: {}]   ;;  %s536_s2 = inlined_call_operand.hbm [shape: f32[8,1,128], index: 2, kind: output, shape index: {}]  }
   0x1   :  { %8 = vsyncpa [#allocation9], 0 }
   0x2   :  { %9 = vsyncpa [#allocation7], 0  ;;  %s436_s9 = smov [#allocation5]   ;;  %s364_s13 = scalar_lea.hbm %s534_s0, 128 }
   0x3   :  { %s15_s10 = sshll.u32 %s436_s9, 4  ;;  %p365_p0 = scmp.ne.s32.totalorder %s534_s0, %s364_s13  ;;  %s16_s10 = int_to_ptr.vmem [resolvable:$true] %s15_s10 }
   0x4   :  { %p368_p1 = scmp.lt.u32.totalorder %s364_s13, %s534_s0 }
   0x6   :  { %p370_p2 = pnand %p368_p1, %p365_p0 }
   0x8   :  { %373 = shalt.err (!%p370_p2)
}
   0x9   :  { %s374_s18 = scalar_lea.vmem %s16_s10, 128  ;;  %p379_p4 = scmp.lt.s32.totalorder %s16_s10, %s16_s10 }
   0xa   :  { %p375_p3 = scmp.ne.s32.totalorder %s16_s10, %s374_s18  ;;  %p380_p5 = scmp.lt.s32.totalorder %s374_s18, %s374_s18 }
   0xc   :  { %p381_p6 = por %p380_p5, %p379_p4 }
   0xe   :  { %p382_p7 = pnand %p381_p6, %p375_p3 }
  0x10   :  { %385 = shalt.err (!%p382_p7)
}
  0x11   :  { %s437_s19 = smov 16   ;;  %s438_s20 = smov 1  }
  0x12   :  { %21 = dma.hbm_to_vmem [thread:$0]  %s534_s0, 128, %s16_s10, [#allocation6], %s437_s19, %s437_s19, %s438_s20  }
  0x13   :  { %s439_s23 = smov [#allocation8]   ;;  %s386_s27 = scalar_lea.hbm %s535_s1, 128 }
  0x14   :  { %s27_s24 = sshll.u32 %s439_s23, 4  ;;  %p387_p8 = scmp.ne.s32.totalorder %s535_s1, %s386_s27  ;;  %s28_s24 = int_to_ptr.vmem [resolvable:$true] %s27_s24 }
  0x15   :  { %p390_p9 = scmp.lt.u32.totalorder %s386_s27, %s535_s1 }
  0x17   :  { %p392_p10 = pnand %p390_p9, %p387_p8 }
  0x19   :  { %395 = shalt.err (!%p392_p10)
}
  0x1a   :  { %s396_s4 = scalar_lea.vmem %s28_s24, 128  ;;  %p401_p12 = scmp.lt.s32.totalorder %s28_s24, %s28_s24 }
  0x1b   :  { %p397_p11 = scmp.ne.s32.totalorder %s28_s24, %s396_s4  ;;  %p402_p13 = scmp.lt.s32.totalorder %s396_s4, %s396_s4 }
  0x1d   :  { %p403_p0 = por %p402_p13, %p401_p12 }
  0x1f   :  { %p404_p1 = pnand %p403_p0, %p397_p11 }
  0x21   :  { %407 = shalt.err (!%p404_p1)
}
  0x22   :  { %33 = dma.hbm_to_vmem [thread:$0]  %s535_s1, 128, %s28_s24, [#allocation9], %s437_s19, %s437_s19, %s438_s20  }
  0x23   :  { %430 = dma.done.wait [#allocation6], 128  }
  0x24   :  { %431 = vsyncadd [#allocation6], 4294967168 }
  0x25   :  { %432 = dma.done.wait [#allocation9], 128  }
  0x26   :  { %433 = vsyncadd [#allocation9], 4294967168  ;;  %v440_v0 = vmov 0.0   ;;  %v53_v1 = vld [vmem:[#allocation8] sm:$0x1]  ;;  %s441_s1 = smov [#allocation10]  }
  0x27   :  { %44 = vst [vmem:[#allocation4] sm:$0x1] %v440_v0  ;;  %v487_v2 = vld [vmem:[#allocation5] sm:$0x1]  ;;  %v54_v3 = vld [vmem:[#allocation8 + $0x1] sm:$0x1] }
  0x28   :  { %v278_v4 = vmul.f32 -1.442695, %v53_v1  ;;  %v286_v5 = vmul.f32 -1.442695, %v487_v2  ;;  %v279_v6 = vmul.f32 -1.442695, %v54_v3 }
  0x29   :  { %v490_v7 = vld [vmem:[#allocation5 + $0x1] sm:$0x1]  ;;  %v55_v8 = vld [vmem:[#allocation8 + $0x2] sm:$0x1]  ;;  %v492_v9 = vld [vmem:[#allocation5 + $0x2] sm:$0x1] }
  0x2a   :  { %300 = vpow2.f32 %v278_v4  ;;  %v287_v10 = vmul.f32 -1.442695, %v490_v7  ;;  %v280_v11 = vmul.f32 -1.442695, %v55_v8  ;;  %v288_v12 = vmul.f32 -1.442695, %v492_v9 }
  0x2b   :  { %302 = vpow2.f32 %v286_v5  ;;  %v56_v13 = vld [vmem:[#allocation8 + $0x3] sm:$0x1]  ;;  %v496_v14 = vld [vmem:[#allocation5 + $0x3] sm:$0x1]  ;;  %v57_v16 = vld [vmem:[#allocation8 + $0x4] sm:$0x1] }
  0x2c   :  { %304 = vpow2.f32 %v279_v6  ;;  %v281_v15 = vmul.f32 -1.442695, %v56_v13  ;;  %v289_v17 = vmul.f32 -1.442695, %v496_v14  ;;  %v499_v18 = vld [vmem:[#allocation5 + $0x4] sm:$0x1] }
  0x2d   :  { %306 = vpow2.f32 %v287_v10  ;;  %v58_v19 = vld [vmem:[#allocation8 + $0x5] sm:$0x1]  ;;  %v282_v20 = vmul.f32 -1.442695, %v57_v16  ;;  %v501_v21 = vld [vmem:[#allocation5 + $0x5] sm:$0x1] }
  0x2e   :  { %308 = vpow2.f32 %v280_v11  ;;  %v290_v22 = vmul.f32 -1.442695, %v499_v18  ;;  %v59_v23 = vld [vmem:[#allocation8 + $0x6] sm:$0x1]  ;;  %v283_v24 = vmul.f32 -1.442695, %v58_v19 }
  0x2f   :  { %310 = vpow2.f32 %v288_v12  ;;  %v291_v25 = vmul.f32 -1.442695, %v501_v21  ;;  %v284_v26 = vmul.f32 -1.442695, %v59_v23  ;;  %v505_v46 = vld [vmem:[#allocation5 + $0x6] sm:$0x1] }
  0x30   :  { %312 = vpow2.f32 %v281_v15  ;;  %v60_v49 = vld [vmem:[#allocation8 + $0x7] sm:$0x1]  ;;  %v507_v52 = vld [vmem:[#allocation5 + $0x7] sm:$0x1]  ;;  %v292_v55 = vmul.f32 -1.442695, %v505_v46 }
  0x31   :  { %314 = vpow2.f32 %v289_v17  ;;  %v285_v58 = vmul.f32 -1.442695, %v60_v49  ;;  %v293_v61 = vmul.f32 -1.442695, %v507_v52  ;;  %v197_v13 = vld [vmem:[#allocation4] sm:$0x1] }
  0x32   :  { %316 = vpow2.f32 %v282_v20  ;;  %s265_s6 = sshll.u32 %s441_s1, 4  ;;  %s266_s6 = int_to_ptr.vmem [resolvable:$true] %s265_s6 }
  0x33   :  { %318 = vpow2.f32 %v290_v22  ;;  %s408_s7 = scalar_lea.vmem %s266_s6, 128  ;;  %p413_p3 = scmp.lt.s32.totalorder %s266_s6, %s266_s6 }
  0x34   :  { %v301_v27 = vpop.eup %300  ;;  %320 = vpow2.f32 %v283_v24  ;;  %p409_p2 = scmp.ne.s32.totalorder %s266_s6, %s408_s7  ;;  %p414_p4 = scmp.lt.s32.totalorder %s408_s7, %s408_s7 }
  0x35   :  { %v303_v28 = vpop.eup %302  ;;  %v85_v29 = vadd.f32 1.0, %v301_v27  ;;  %322 = vpow2.f32 %v291_v25 }
  0x36   :  { %v305_v30 = vpop.eup %304  ;;  %v141_v31 = vadd.f32 1.0, %v303_v28  ;;  %324 = vpow2.f32 %v284_v26  ;;  %p415_p5 = por %p414_p4, %p413_p3 }
  0x37   :  { %v307_v32 = vpop.eup %306  ;;  %326 = vrcp.f32 %v85_v29  ;;  %v86_v33 = vadd.f32 1.0, %v305_v30 }
  0x38   :  { %v309_v34 = vpop.eup %308  ;;  %328 = vrcp.f32 %v141_v31  ;;  %v142_v35 = vadd.f32 1.0, %v307_v32  ;;  %p416_p6 = pnand %p415_p5, %p409_p2 }
  0x39   :  { %v311_v36 = vpop.eup %310  ;;  %330 = vrcp.f32 %v86_v33  ;;  %v87_v37 = vadd.f32 1.0, %v309_v34 }
  0x3a   :  { %v313_v38 = vpop.eup %312  ;;  %332 = vrcp.f32 %v142_v35  ;;  %v143_v39 = vadd.f32 1.0, %v311_v36 }
  0x3b   :  { %v315_v40 = vpop.eup %314  ;;  %334 = vrcp.f32 %v87_v37  ;;  %v88_v41 = vadd.f32 1.0, %v313_v38 }
  0x3c   :  { %v317_v42 = vpop.eup %316  ;;  %336 = vrcp.f32 %v143_v39  ;;  %v144_v43 = vadd.f32 1.0, %v315_v40 }
  0x3d   :  { %v319_v44 = vpop.eup %318  ;;  %338 = vrcp.f32 %v88_v41  ;;  %v89_v45 = vadd.f32 1.0, %v317_v42 }
  0x3e   :  { %v321_v47 = vpop.eup %320  ;;  %340 = vrcp.f32 %v144_v43  ;;  %v145_v48 = vadd.f32 1.0, %v319_v44 }
  0x3f   :  { %v323_v50 = vpop.eup %322  ;;  %342 = vrcp.f32 %v89_v45  ;;  %v90_v51 = vadd.f32 1.0, %v321_v47 }
  0x40   :  { %v325_v53 = vpop.eup %324  ;;  %344 = vrcp.f32 %v145_v48  ;;  %v146_v54 = vadd.f32 1.0, %v323_v50 }
  0x41   :  { %v327_v56 = vpop.eup %326  ;;  %346 = vrcp.f32 %v90_v51  ;;  %v91_v57 = vadd.f32 1.0, %v325_v53 }
  0x42   :  { %v329_v59 = vpop.eup %328  ;;  %109 = vst [vmem:[#allocation2] sm:$0x1] %v327_v56  ;;  %v173_v60 = vsub.f32 1.0, %v327_v56  ;;  %348 = vrcp.f32 %v146_v54 }
  0x43   :  { %v331_v62 = vpop.eup %330  ;;  %v165_v63 = vmul.f32 %v329_v59, %v487_v2  ;;  %350 = vrcp.f32 %v91_v57 }
  0x44   :  { %v333_v0 = vpop.eup %332  ;;  %110 = vst [vmem:[#allocation2 + $0x1] sm:$0x1] %v331_v62  ;;  %v174_v1 = vsub.f32 1.0, %v331_v62  ;;  %352 = vpow2.f32 %v292_v55 }
  0x45   :  { %v335_v3 = vpop.eup %334  ;;  %v181_v4 = vmul.f32 %v173_v60, %v165_v63  ;;  %v166_v5 = vmul.f32 %v333_v0, %v490_v7  ;;  %354 = vpow2.f32 %v285_v58 }
  0x46   :  { %v337_v6 = vpop.eup %336  ;;  %111 = vst [vmem:[#allocation2 + $0x2] sm:$0x1] %v335_v3  ;;  %v175_v8 = vsub.f32 1.0, %v335_v3  ;;  %356 = vpow2.f32 %v293_v61 }
  0x47   :  { %v339_v10 = vpop.eup %338  ;;  %189 = vst [vmem:[#allocation3] sm:$0x1] %v181_v4  ;;  %v182_v11 = vmul.f32 %v174_v1, %v166_v5  ;;  %v167_v12 = vmul.f32 %v337_v6, %v492_v9 }
  0x48   :  { %v341_v2 = vpop.eup %340  ;;  %112 = vst [vmem:[#allocation2 + $0x3] sm:$0x1] %v339_v10  ;;  %v176_v15 = vsub.f32 1.0, %v339_v10 }
  0x49   :  { %v343_v16 = vpop.eup %342  ;;  %190 = vst [vmem:[#allocation3 + $0x1] sm:$0x1] %v182_v11  ;;  %v183_v17 = vmul.f32 %v175_v8, %v167_v12  ;;  %v198_v19 = vld [vmem:[#allocation2] sm:$0x1]  ;;  %v168_v7 = vmul.f32 %v341_v2, %v496_v14 }
  0x4a   :  { %v345_v20 = vpop.eup %344  ;;  %113 = vst [vmem:[#allocation2 + $0x4] sm:$0x1] %v343_v16  ;;  %v177_v22 = vsub.f32 1.0, %v343_v16  ;;  %v199_v24 = vmul.f32 %v198_v19, %v197_v13 }
  0x4b   :  { %v347_v23 = vpop.eup %346  ;;  %191 = vst [vmem:[#allocation3 + $0x2] sm:$0x1] %v183_v17  ;;  %v184_v25 = vmul.f32 %v176_v15, %v168_v7  ;;  %v169_v26 = vmul.f32 %v345_v20, %v499_v18  ;;  %v204_v14 = vld [vmem:[#allocation2 + $0x1] sm:$0x1] }
  0x4c   :  { %v349_v9 = vpop.eup %348  ;;  %114 = vst [vmem:[#allocation2 + $0x5] sm:$0x1] %v347_v23  ;;  %v178_v27 = vsub.f32 1.0, %v347_v23 }
  0x4d   :  { %v351_v28 = vpop.eup %350  ;;  %192 = vst [vmem:[#allocation3 + $0x3] sm:$0x1] %v184_v25  ;;  %v185_v29 = vmul.f32 %v177_v22, %v169_v26  ;;  %v170_v30 = vmul.f32 %v349_v9, %v501_v21  ;;  %v212_v41 = vld [vmem:[#allocation2 + $0x2] sm:$0x1] }
  0x4e   :  { %v353_v31 = vpop.eup %352  ;;  %v200_v32 = vld [vmem:[#allocation3] sm:$0x1]  ;;  %115 = vst [vmem:[#allocation2 + $0x6] sm:$0x1] %v351_v28  ;;  %v179_v49 = vsub.f32 1.0, %v351_v28 }
  0x4f   :  { %v355_v33 = vpop.eup %354  ;;  %v201_v34 = vadd.f32 %v200_v32, %v199_v24  ;;  %193 = vst [vmem:[#allocation3 + $0x4] sm:$0x1] %v185_v29  ;;  %v186_v35 = vmul.f32 %v178_v27, %v170_v30  ;;  %v147_v36 = vadd.f32 1.0, %v353_v31  ;;  %v220_v44 = vld [vmem:[#allocation2 + $0x3] sm:$0x1] }
  0x50   :  { %v357_v37 = vpop.eup %356  ;;  %v207_v38 = vld [vmem:[#allocation3 + $0x1] sm:$0x1]  ;;  %v92_v18 = vadd.f32 1.0, %v355_v33 }
  0x51   :  { %202 = vst [vmem:[#allocation10] sm:$0x1] %v201_v34  ;;  %v205_v39 = vmul.f32 %v204_v14, %v201_v34  ;;  %194 = vst [vmem:[#allocation3 + $0x5] sm:$0x1] %v186_v35  ;;  %358 = vrcp.f32 %v147_v36  ;;  %v148_v40 = vadd.f32 1.0, %v357_v37 }
  0x52   :  { %360 = vrcp.f32 %v92_v18  ;;  %v215_v42 = vld [vmem:[#allocation3 + $0x2] sm:$0x1]  ;;  %v228_v50 = vld [vmem:[#allocation2 + $0x4] sm:$0x1] }
  0x53   :  { %v208_v21 = vadd.f32 %v207_v38, %v205_v39  ;;  %362 = vrcp.f32 %v148_v40  ;;  %v236_v62 = vld [vmem:[#allocation2 + $0x5] sm:$0x1] }
  0x54   :  { %v223_v47 = vld [vmem:[#allocation3 + $0x3] sm:$0x1] }
  0x55   :  { %210 = vst [vmem:[#allocation10 + $0x1] sm:$0x1] %v208_v21  ;;  %v213_v43 = vmul.f32 %v212_v41, %v208_v21  ;;  %v244_v4 = vld [vmem:[#allocation2 + $0x6] sm:$0x1] }
  0x56   :  { %v231_v56 = vld [vmem:[#allocation3 + $0x4] sm:$0x1] }
  0x57   :  { %v216_v45 = vadd.f32 %v215_v42, %v213_v43 }
  0x58   :  { %v239_v1 = vld [vmem:[#allocation3 + $0x5] sm:$0x1] }
  0x59   :  { %218 = vst [vmem:[#allocation10 + $0x2] sm:$0x1] %v216_v45  ;;  %v221_v48 = vmul.f32 %v220_v44, %v216_v45 }
  0x5b   :  { %v359_v51 = vpop.eup %358  ;;  %v224_v53 = vadd.f32 %v223_v47, %v221_v48 }
  0x5c   :  { %v361_v54 = vpop.eup %360  ;;  %v171_v55 = vmul.f32 %v359_v51, %v505_v46 }
  0x5d   :  { %v363_v57 = vpop.eup %362  ;;  %226 = vst [vmem:[#allocation10 + $0x3] sm:$0x1] %v224_v53  ;;  %116 = vst [vmem:[#allocation2 + $0x7] sm:$0x1] %v361_v54  ;;  %v229_v58 = vmul.f32 %v228_v50, %v224_v53  ;;  %v180_v59 = vsub.f32 1.0, %v361_v54 }
  0x5e   :  { %v187_v60 = vmul.f32 %v179_v49, %v171_v55  ;;  %v172_v61 = vmul.f32 %v363_v57, %v507_v52 }
  0x5f   :  { %v232_v63 = vadd.f32 %v231_v56, %v229_v58 }
  0x60   :  { %195 = vst [vmem:[#allocation3 + $0x6] sm:$0x1] %v187_v60  ;;  %v188_v0 = vmul.f32 %v180_v59, %v172_v61 }
  0x61   :  { %234 = vst [vmem:[#allocation10 + $0x4] sm:$0x1] %v232_v63  ;;  %v237_v3 = vmul.f32 %v236_v62, %v232_v63 }
  0x62   :  { %196 = vst [vmem:[#allocation3 + $0x7] sm:$0x1] %v188_v0 }
  0x63   :  { %v240_v5 = vadd.f32 %v239_v1, %v237_v3 }
  0x64   :  { %v252_v8 = vld [vmem:[#allocation2 + $0x7] sm:$0x1] }
  0x65   :  { %242 = vst [vmem:[#allocation10 + $0x5] sm:$0x1] %v240_v5  ;;  %v245_v46 = vmul.f32 %v244_v4, %v240_v5 }
  0x67   :  { %v247_v6 = vld [vmem:[#allocation3 + $0x6] sm:$0x1] }
  0x68   :  { %v248_v10 = vadd.f32 %v247_v6, %v245_v46 }
  0x69   :  { %v255_v11 = vld [vmem:[#allocation3 + $0x7] sm:$0x1] }
  0x6a   :  { %250 = vst [vmem:[#allocation10 + $0x6] sm:$0x1] %v248_v10  ;;  %v253_v52 = vmul.f32 %v252_v8, %v248_v10 }
  0x6c   :  { %v256_v12 = vadd.f32 %v255_v11, %v253_v52 }
  0x6e   :  { %258 = vst [vmem:[#allocation10 + $0x7] sm:$0x1] %v256_v12  ;;  %259 = vst [vmem:[#allocation4] sm:$0x1] %v256_v12 }
  0x6f   :  { %419 = shalt.err (!%p416_p6)
}
  0x70   :  { %s420_s10 = scalar_lea.hbm %s536_s2, 128 }
  0x71   :  { %p421_p7 = scmp.ne.s32.totalorder %s536_s2, %s420_s10  ;;  %p424_p8 = scmp.lt.u32.totalorder %s420_s10, %s536_s2 }
  0x73   :  { %p426_p9 = pnand %p424_p8, %p421_p7 }
  0x75   :  { %429 = shalt.err (!%p426_p9)
}
  0x76   :  { %271 = dma.vmem_to_hbm [thread:$0]  %s266_s6, 128, %s536_s2, [#allocation7], %s437_s19, %s437_s19, %s438_s20  }
  0x77   :  { %434 = dma.done.wait [#allocation7], 128  }
  0x78   :  { %435 = vsyncadd [#allocation7], 4294967168 }
  0x79   :  { %275 = vsyncpa [#allocation6], 1 }
  0x7a   :  { %276 = vsyncpa [#allocation9], 1 }
  0x7b   :  { %277 = vsyncpa [#allocation7], 1 }

// kernel: hgrn_bit_block.7
= control target key start
LH: loop header
LB: loop body
LE: loop exit
PB: predicated region body
PF: predicated region fallthrough
CT: control target
= control target key end

     0   :  { %11 = vsyncpa [#allocation6], 0  ;;  %s598_s0 = inlined_call_operand.hbm [shape: f32[16,64], index: 0, kind: input, shape index: {}]   ;;  %s599_s1 = inlined_call_operand.hbm [shape: f32[1,64], index: 1, kind: input, shape index: {}]   ;;  %s600_s2 = inlined_call_operand.hbm [shape: f32[1,64], index: 2, kind: input, shape index: {}]   ;;  %s601_s3 = inlined_call_operand.hbm [shape: bf16[64,64], index: 3, kind: input, shape index: {}]   ;;  %s602_s4 = inlined_call_operand.<no memory space> [shape: f32[1,1], index: 4, kind: input, shape index: {}]   ;;  %s603_s5 = inlined_call_operand.hbm [shape: f32[16,64], index: 5, kind: output, shape index: {}]  }
   0x1   :  { %12 = vsyncpa [#allocation9], 0 }
   0x2   :  { %13 = vsyncpa [#allocation12], 0 }
   0x3   :  { %14 = vsyncpa [#allocation7], 0  ;;  %s459_s18 = smov [#allocation8]   ;;  %s460_s20 = smov [#allocation5]  }
   0x4   :  { %s33_s19 = sshll.u32 %s459_s18, 4  ;;  %s20_s21 = sshll.u32 %s460_s20, 4  ;;  %s34_s19 = int_to_ptr.vmem [resolvable:$true] %s33_s19  ;;  %s501_s21 = int_to_ptr.vmem [resolvable:$true] %s20_s21 }
   0x5   :  { %s341_s24 = scalar_lea.hbm %s599_s1, 16 }
   0x6   :  { %p342_p0 = scmp.ne.s32.totalorder %s599_s1, %s341_s24  ;;  %p345_p1 = scmp.lt.u32.totalorder %s341_s24, %s599_s1 }
   0x8   :  { %p347_p2 = pnand %p345_p1, %p342_p0 }
   0xa   :  { %350 = shalt.err (!%p347_p2)
}
   0xb   :  { %s351_s29 = scalar_lea.vmem %s34_s19, 16  ;;  %s355_s30 = scalar_lea.vmem %s34_s19, 32 }
   0xc   :  { %p352_p3 = scmp.ne.s32.totalorder %s34_s19, %s351_s29  ;;  %p356_p4 = scmp.lt.s32.totalorder %s34_s19, %s34_s19 }
   0xd   :  { %p357_p5 = scmp.lt.s32.totalorder %s355_s30, %s351_s29 }
   0xf   :  { %p358_p6 = por %p357_p5, %p356_p4 }
  0x11   :  { %p359_p7 = pnand %p358_p6, %p352_p3 }
  0x13   :  { %362 = shalt.err (!%p359_p7)
}
  0x14   :  { %36 = dma.hbm_to_vmem [thread:$0]  %s599_s1, 16, %s34_s19, [#allocation9]  }
  0x15   :  { %s363_s10 = scalar_lea.hbm %s598_s0, 256 }
  0x16   :  { %p364_p8 = scmp.ne.s32.totalorder %s598_s0, %s363_s10  ;;  %p367_p9 = scmp.lt.u32.totalorder %s363_s10, %s598_s0 }
  0x18   :  { %p369_p10 = pnand %p367_p9, %p364_p8 }
  0x1a   :  { %372 = shalt.err (!%p369_p10)
}
  0x1b   :  { %s373_s15 = scalar_lea.vmem %s501_s21, 256  ;;  %p378_p12 = scmp.lt.s32.totalorder %s501_s21, %s501_s21 }
  0x1c   :  { %p374_p11 = scmp.ne.s32.totalorder %s501_s21, %s373_s15  ;;  %p379_p13 = scmp.lt.s32.totalorder %s373_s15, %s373_s15 }
  0x1e   :  { %p380_p0 = por %p379_p13, %p378_p12 }
  0x20   :  { %p381_p1 = pnand %p380_p0, %p374_p11 }
  0x22   :  { %384 = shalt.err (!%p381_p1)
}
  0x23   :  { %s461_s1 = smov 128   ;;  %s462_s16 = smov 8  }
  0x24   :  { %26 = dma.hbm_to_vmem [thread:$0]  %s598_s0, 256, %s501_s21, [#allocation6], %s461_s1, %s461_s1, %s462_s16  }
  0x25   :  { %s463_s19 = smov [#allocation10]   ;;  %s464_s22 = smov [#allocation11]  }
  0x26   :  { %s43_s20 = sshll.u32 %s463_s19, 4  ;;  %s52_s23 = sshll.u32 %s464_s22, 4  ;;  %s44_s20 = int_to_ptr.vmem [resolvable:$true] %s43_s20  ;;  %s535_s23 = int_to_ptr.vmem [resolvable:$true] %s52_s23 }
  0x27   :  { %s385_s26 = scalar_lea.hbm %s600_s2, 16 }
  0x28   :  { %p386_p2 = scmp.ne.s32.totalorder %s600_s2, %s385_s26  ;;  %p389_p3 = scmp.lt.u32.totalorder %s385_s26, %s600_s2 }
  0x2a   :  { %p391_p4 = pnand %p389_p3, %p386_p2 }
  0x2c   :  { %394 = shalt.err (!%p391_p4)
}
  0x2d   :  { %s395_s0 = scalar_lea.vmem %s44_s20, 16  ;;  %s399_s21 = scalar_lea.vmem %s44_s20, 32 }
  0x2e   :  { %p396_p5 = scmp.ne.s32.totalorder %s44_s20, %s395_s0  ;;  %p400_p6 = scmp.lt.s32.totalorder %s44_s20, %s44_s20 }
  0x2f   :  { %p401_p7 = scmp.lt.s32.totalorder %s399_s21, %s395_s0 }
  0x31   :  { %p402_p8 = por %p401_p7, %p400_p6 }
  0x33   :  { %p403_p9 = pnand %p402_p8, %p396_p5 }
  0x35   :  { %406 = shalt.err (!%p403_p9)
}
  0x36   :  { %46 = dma.hbm_to_vmem [thread:$0]  %s600_s2, 16, %s44_s20, [#allocation9]  }
  0x37   :  { %s407_s10 = scalar_lea.hbm %s601_s3, 512 }
  0x38   :  { %p408_p10 = scmp.ne.s32.totalorder %s601_s3, %s407_s10  ;;  %p411_p11 = scmp.lt.u32.totalorder %s407_s10, %s601_s3 }
  0x3a   :  { %p413_p12 = pnand %p411_p11, %p408_p10 }
  0x3c   :  { %416 = shalt.err (!%p413_p12)
}
  0x3d   :  { %s417_s15 = scalar_lea.vmem %s535_s23, 512  ;;  %p422_p0 = scmp.lt.s32.totalorder %s535_s23, %s535_s23 }
  0x3e   :  { %p418_p13 = scmp.ne.s32.totalorder %s535_s23, %s417_s15  ;;  %p423_p1 = scmp.lt.s32.totalorder %s417_s15, %s417_s15 }
  0x40   :  { %p424_p2 = por %p423_p1, %p422_p0 }
  0x42   :  { %p425_p3 = pnand %p424_p2, %p418_p13 }
  0x44   :  { %428 = shalt.err (!%p425_p3)
}
  0x45   :  { %s465_s2 = smov 64   ;;  %s466_s17 = smov 4  }
  0x46   :  { %58 = dma.hbm_to_vmem [thread:$0]  %s601_s3, 512, %s535_s23, [#allocation12], %s465_s2, %s465_s2, %s466_s17  }
  0x47   :  { %451 = dma.done.wait [#allocation6], 256  }
  0x48   :  { %452 = vsyncadd [#allocation6], 4294967040 }
  0x49   :  { %453 = dma.done.wait [#allocation9], 32  }
  0x4a   :  { %454 = vsyncadd [#allocation9], 4294967264 }
  0x4b   :  { %455 = dma.done.wait [#allocation12], 512  }
  0x4c   :  { %456 = vsyncadd [#allocation12], 4294966784  ;;  %v78_v0 = vld [vmem:[#allocation5] sm:$0xff]  ;;  %vm82_vm0 = vcmask 523264   ;;  %v79_v1 = vld [vmem:[#allocation5 + $0x8] sm:$0xff]  ;;  %v467_v41 = vmov 0.0  }
  0x4d   :  { %v80_v2 = vmul.f32 %v78_v0, %v78_v0  ;;  %v81_v3 = vmul.f32 %v79_v1, %v79_v1  ;;  %v285_v13 = vld [vmem:[#allocation8] ss:$0 sm:$0xff]  ;;  %v286_v30 = vld [vmem:[#allocation10] ss:$0 sm:$0xff]  ;;  %v325_v40 = vld [vmem:[#allocation11] sm:$0xff]   ;;  %297 = vmatprep.subr.bf16.mxu0 %v467_v41  ;;  %v468_v43 = vmov 0  }
  0x4e   :  { %v193_v42 = vsel %vm82_vm0, %v325_v40, 0  ;;  %323 = vset.pattern.permute.xlu0 %v468_v43  ;;  %v326_v44 = vld [vmem:[#allocation11 + $0x8] sm:$0xff]   ;;  %324 = vset.pattern.permute.xlu1 %v468_v43  ;;  %v327_v46 = vld [vmem:[#allocation11 + $0x10] sm:$0xff]   ;;  %v328_v48 = vld [vmem:[#allocation11 + $0x18] sm:$0xff]   ;;  %vm469_vm1 = vmmov 0   ;;  %vm156_vm2 = vcmask 7168  }
  0x4f   :  { %v83_v4 = vsel %vm82_vm0, %v80_v2, 0.0  ;;  %v86_v5 = vsel %vm82_vm0, %v81_v3, 0.0  ;;  %298 = vmatpush3.bf16.xpose.msra.mxu0 %v193_v42  ;;  %v196_v45 = vsel %vm82_vm0, %v326_v44, 0  ;;  %v199_v47 = vsel %vm82_vm0, %v327_v46, 0  ;;  %305 = vmatprep.mubr.msk.bf16.mxu0 %vm469_vm1, %v467_v41  ;;  %s248_s22 = smul.f32 0.007874016, %s602_s4 }
  0x50   :  { %84 = vadd.xlane.f32.xlu0 %v83_v4  ;;  %299 = vmatprep.subr.bf16.mxu0 %v467_v41  ;;  %v202_v49 = vsel %vm82_vm0, %v328_v48, 0  ;;  %s470_s4 = smov [#allocation13]  }
  0x51   :  { %v249_v54 = vstv %s248_s22  ;;  %s271_s23 = sshll.u32 %s470_s4, 4  ;;  %s272_s23 = int_to_ptr.vmem [resolvable:$true] %s271_s23 }
  0x52   :  { %s429_s24 = scalar_lea.vmem %s272_s23, 256  ;;  %p434_p5 = scmp.lt.s32.totalorder %s272_s23, %s272_s23 }
  0x53   :  { %p430_p4 = scmp.ne.s32.totalorder %s272_s23, %s429_s24  ;;  %p435_p6 = scmp.lt.s32.totalorder %s429_s24, %s429_s24 }
  0x54   :  { %87 = vadd.xlane.f32.xlu0 %v86_v5 }
  0x55   :  { %p436_p7 = por %p435_p6, %p434_p5 }
  0x57   :  { %300 = vmatpush3.bf16.xpose.msra.mxu0 %v196_v45  ;;  %p437_p8 = pnand %p436_p7, %p430_p4 }
  0x58   :  { %301 = vmatprep.subr.bf16.mxu0 %v467_v41 }
  0x5f   :  { %302 = vmatpush3.bf16.xpose.msra.mxu0 %v199_v47 }
  0x60   :  { %303 = vmatprep.subr.bf16.mxu0 %v467_v41 }
  0x67   :  { %304 = vmatpush3.bf16.xpose.msra.mxu0 %v202_v49 }
  0xdd   :  { %v85_v6 = vpop.xlane.xlu0 %84 }
  0xde   :  { %v90_v7 = vmul.f32 0.015625, %v85_v6 }
  0xe0   :  { %v92_v8 = vadd.f32 1e-06, %v90_v7 }
  0xe1   :  { %v88_v9 = vpop.xlane.xlu0 %87 }
  0xe2   :  { %329 = vrsqrt.f32 %v92_v8  ;;  %v91_v10 = vmul.f32 0.015625, %v88_v9 }
  0xe4   :  { %v93_v11 = vadd.f32 1e-06, %v91_v10 }
  0xe6   :  { %331 = vrsqrt.f32 %v93_v11 }
  0xec   :  { %v330_v12 = vpop.eup %329 }
  0xed   :  { %v96_v14 = vmul.f32 %v330_v12, %v78_v0 }
  0xef   :  { %v105_v15 = vmul.f32 %v285_v13, %v96_v14 }
  0xf0   :  { %v332_v16 = vpop.eup %331 }
  0xf1   :  { %v108_v17 = vmul.f32 %v105_v15, %v105_v15  ;;  %v97_v18 = vmul.f32 %v332_v16, %v79_v1 }
  0xf3   :  { %v110_v19 = vsel %vm82_vm0, %v108_v17, 0.0  ;;  %v106_v20 = vmul.f32 %v285_v13, %v97_v18 }
  0xf4   :  { %111 = vadd.xlane.f32.xlu1 %v110_v19 }
  0xf5   :  { %v109_v21 = vmul.f32 %v106_v20, %v106_v20 }
  0xf7   :  { %v113_v22 = vsel %vm82_vm0, %v109_v21, 0.0 }
  0xf8   :  { %114 = vadd.xlane.f32.xlu1 %v113_v22 }
 0x181   :  { %v112_v23 = vpop.xlane.xlu1 %111 }
 0x182   :  { %v116_v24 = vmul.f32 0.015625, %v112_v23 }
 0x184   :  { %v118_v25 = vadd.f32 1e-08, %v116_v24 }
 0x185   :  { %v115_v26 = vpop.xlane.xlu1 %114 }
 0x186   :  { %333 = vrsqrt.f32 %v118_v25  ;;  %v117_v27 = vmul.f32 0.015625, %v115_v26 }
 0x188   :  { %v119_v28 = vadd.f32 1e-08, %v117_v27 }
 0x18a   :  { %335 = vrsqrt.f32 %v119_v28 }
 0x190   :  { %v334_v29 = vpop.eup %333 }
 0x191   :  { %v122_v31 = vmul.f32 %v334_v29, %v105_v15 }
 0x193   :  { %v130_v32 = vmul.f32 %v286_v30, %v122_v31 }
 0x194   :  { %v336_v33 = vpop.eup %335 }
 0x195   :  { %v132_v34 = vand.u32 2147483647, %v130_v32  ;;  %v123_v35 = vmul.f32 %v336_v33, %v106_v20 }
 0x197   :  { %v134_v36 = vsel %vm82_vm0, %v132_v34, -inf  ;;  %v131_v37 = vmul.f32 %v286_v30, %v123_v35 }
 0x198   :  { %135 = vmax.xlane.f32.xlu0 %v134_v36 }
 0x199   :  { %v133_v38 = vand.u32 2147483647, %v131_v37 }
 0x19b   :  { %v137_v39 = vsel %vm82_vm0, %v133_v38, -inf }
 0x19c   :  { %138 = vmax.xlane.f32.xlu1 %v137_v39 }
 0x225   :  { %v136_v50 = vpop.xlane.xlu0 %135 }
 0x226   :  { %v140_v51 = vmax.f32 %v136_v50, 1e-05 }
 0x228   :  { %337 = vrcp.f32 %v140_v51  ;;  %157 = vst.msk [vmem:[#allocation3] sm:$0xff] %vm156_vm2, %v140_v51 }
 0x229   :  { %v139_v52 = vpop.xlane.xlu1 %138 }
 0x22a   :  { %v141_v53 = vmax.f32 %v139_v52, 1e-05 }
 0x22c   :  { %339 = vrcp.f32 %v141_v53  ;;  %158 = vst.msk [vmem:[#allocation3 + $0x8] sm:$0xff] %vm156_vm2, %v141_v53 }
 0x22f   :  { %v245_v55 = vld [vmem:[#allocation3] sm:$0xff] }
 0x230   :  { %v250_v56 = vmul.f32 %v249_v54, %v245_v55 }
 0x232   :  { %v338_v57 = vpop.eup %337  ;;  %254 = vperm.xlu0 %323, %v250_v56  }
 0x233   :  { %v143_v58 = vmul.f32 127.0, %v338_v57  ;;  %v246_v59 = vld [vmem:[#allocation3 + $0x8] sm:$0xff] }
 0x234   :  { %v251_v60 = vmul.f32 %v249_v54, %v246_v59 }
 0x235   :  { %v146_v61 = vmul.f32 %v143_v58, %v130_v32 }
 0x236   :  { %v340_v62 = vpop.eup %339  ;;  %259 = vperm.xlu1 %324, %v251_v60  }
 0x237   :  { %v309_v63 = vround.rtne.f32 %v146_v61  ;;  %v145_v0 = vmul.f32 127.0, %v340_v62 }
 0x239   :  { %v147_v1 = vmul.f32 %v145_v0, %v131_v37  ;;  %v150_v2 = vmax.f32 %v309_v63, -128.0 }
 0x23b   :  { %v310_v3 = vround.rtne.f32 %v147_v1  ;;  %v152_v5 = vmin.f32 %v150_v2, 127.0 }
 0x23d   :  { %v151_v4 = vmax.f32 %v310_v3, -128.0 }
 0x23f   :  { %v153_v6 = vmin.f32 %v151_v4, 127.0 }
 0x241   :  { %v154_v7 = vpack.c.bf16 %v153_v6, %v152_v5 }
 0x243   :  { %155 = vst.msk [vmem:[#allocation2] sm:$0xff] %vm82_vm0, %v154_v7 }
 0x24a   :  { %v159_v8 = vld [vmem:[#allocation2] sm:$0xff] }
 0x24b   :  { %306 = vmatmul.mubr.msk.bf16.vlgmr.msra.gmra.mrb[0].mxu0 %vm82_vm0, %v159_v8 }
 0x2b1   :  { %v255_v9 = vpop.permute.xlu0 %254 }
 0x2b5   :  { %v260_v13 = vpop.permute.xlu1 %259 }
 0x31e   :  { %v238_v10 = vpop.f32.mrb[0].mxu0 }
 0x31f   :  { %v262_v11 = vmul.f32 %v255_v9, %v238_v10  ;;  %v307_v12 = vpop.f32.mrb[1].mxu0 }
 0x320   :  { %v241_v14 = vpop.f32.mrb[2].mxu0 }
 0x321   :  { %264 = vst.msk [vmem:[#allocation13] sm:$0xff] %vm82_vm0, %v262_v11  ;;  %v263_v15 = vmul.f32 %v260_v13, %v241_v14  ;;  %v308_v16 = vpop.f32.mrb[3].mxu0 }
 0x323   :  { %265 = vst.msk [vmem:[#allocation13 + $0x8] sm:$0xff] %vm82_vm0, %v263_v15 }
 0x324   :  { %440 = shalt.err (!%p437_p8)
}
 0x325   :  { %s441_s27 = scalar_lea.hbm %s603_s5, 256 }
 0x326   :  { %p442_p9 = scmp.ne.s32.totalorder %s603_s5, %s441_s27  ;;  %p445_p10 = scmp.lt.u32.totalorder %s441_s27, %s603_s5 }
 0x328   :  { %p447_p11 = pnand %p445_p10, %p442_p9 }
 0x32a   :  { %450 = shalt.err (!%p447_p11)
}
 0x32b   :  { %277 = dma.vmem_to_hbm [thread:$0]  %s272_s23, 256, %s603_s5, [#allocation7], %s461_s1, %s461_s1, %s462_s16  }
 0x32c   :  { %457 = dma.done.wait [#allocation7], 256  }
 0x32d   :  { %458 = vsyncadd [#allocation7], 4294967040 }
 0x32e   :  { %281 = vsyncpa [#allocation6], 1 }
 0x32f   :  { %282 = vsyncpa [#allocation9], 1 }
 0x330   :  { %283 = vsyncpa [#allocation12], 1 }
 0x331   :  { %284 = vsyncpa [#allocation7], 1 }

// kernel: hgrn_bit_block.11
= control target key start
LH: loop header
LB: loop body
LE: loop exit
PB: predicated region body
PF: predicated region fallthrough
CT: control target
= control target key end

     0   :  { %13 = vsyncpa [#allocation6], 0  ;;  %s748_s0 = inlined_call_operand.hbm [shape: f32[16,64], index: 0, kind: input, shape index: {}]   ;;  %s749_s1 = inlined_call_operand.hbm [shape: f32[16,64], index: 1, kind: input, shape index: {}]   ;;  %s750_s2 = inlined_call_operand.hbm [shape: f32[1,64], index: 2, kind: input, shape index: {}]   ;;  %s751_s3 = inlined_call_operand.hbm [shape: f32[1,64], index: 3, kind: input, shape index: {}]   ;;  %s752_s4 = inlined_call_operand.hbm [shape: bf16[64,64], index: 4, kind: input, shape index: {}]   ;;  %s753_s5 = inlined_call_operand.<no memory space> [shape: f32[1,1], index: 5, kind: input, shape index: {}]   ;;  %s754_s6 = inlined_call_operand.hbm [shape: f32[16,64], index: 6, kind: input, shape index: {}]   ;;  %s755_s7 = inlined_call_operand.hbm [shape: f32[16,64], index: 7, kind: output, shape index: {}]  }
   0x1   :  { %14 = vsyncpa [#allocation9], 0 }
   0x2   :  { %15 = vsyncpa [#allocation12], 0 }
   0x3   :  { %16 = vsyncpa [#allocation15], 0 }
   0x4   :  { %17 = vsyncpa [#allocation7], 0  ;;  %s573_s24 = smov [#allocation8]   ;;  %s574_s26 = smov [#allocation11]  }
   0x5   :  { %s35_s25 = sshll.u32 %s573_s24, 4  ;;  %s58_s27 = sshll.u32 %s574_s26, 4  ;;  %s36_s25 = int_to_ptr.vmem [resolvable:$true] %s35_s25  ;;  %s627_s27 = int_to_ptr.vmem [resolvable:$true] %s58_s27 }
   0x6   :  { %s409_s30 = scalar_lea.hbm %s749_s1, 256 }
   0x7   :  { %p410_p0 = scmp.ne.s32.totalorder %s749_s1, %s409_s30  ;;  %p413_p1 = scmp.lt.u32.totalorder %s409_s30, %s749_s1 }
   0x9   :  { %p415_p2 = pnand %p413_p1, %p410_p0 }
   0xb   :  { %418 = shalt.err (!%p415_p2)
}
   0xc   :  { %s419_s12 = scalar_lea.vmem %s36_s25, 256  ;;  %p424_p4 = scmp.lt.s32.totalorder %s36_s25, %s36_s25 }
   0xd   :  { %p420_p3 = scmp.ne.s32.totalorder %s36_s25, %s419_s12  ;;  %p425_p5 = scmp.lt.s32.totalorder %s419_s12, %s419_s12 }
   0xf   :  { %p426_p6 = por %p425_p5, %p424_p4 }
  0x11   :  { %p427_p7 = pnand %p426_p6, %p420_p3 }
  0x13   :  { %430 = shalt.err (!%p427_p7)
}
  0x14   :  { %s575_s13 = smov 128   ;;  %s576_s14 = smov 8  }
  0x15   :  { %41 = dma.hbm_to_vmem [thread:$0]  %s749_s1, 256, %s36_s25, [#allocation9], %s575_s13, %s575_s13, %s576_s14  }
  0x16   :  { %s431_s19 = scalar_lea.hbm %s751_s3, 16 }
  0x17   :  { %p432_p8 = scmp.ne.s32.totalorder %s751_s3, %s431_s19  ;;  %p435_p9 = scmp.lt.u32.totalorder %s431_s19, %s751_s3 }
  0x19   :  { %p437_p10 = pnand %p435_p9, %p432_p8 }
  0x1b   :  { %440 = shalt.err (!%p437_p10)
}
  0x1c   :  { %s441_s24 = scalar_lea.vmem %s627_s27, 16  ;;  %s445_s1 = scalar_lea.vmem %s627_s27, 32 }
  0x1d   :  { %p442_p11 = scmp.ne.s32.totalorder %s627_s27, %s441_s24  ;;  %p446_p12 = scmp.lt.s32.totalorder %s627_s27, %s627_s27 }
  0x1e   :  { %p447_p13 = scmp.lt.s32.totalorder %s445_s1, %s441_s24 }
  0x20   :  { %p448_p0 = por %p447_p13, %p446_p12 }
  0x22   :  { %p449_p1 = pnand %p448_p0, %p442_p11 }
  0x24   :  { %452 = shalt.err (!%p449_p1)
}
  0x25   :  { %61 = dma.hbm_to_vmem [thread:$0]  %s751_s3, 16, %s627_s27, [#allocation12]  }
  0x26   :  { %s577_s28 = smov [#allocation5]   ;;  %s578_s30 = smov [#allocation10]  }
  0x27   :  { %s23_s29 = sshll.u32 %s577_s28, 4  ;;  %s48_s8 = sshll.u32 %s578_s30, 4  ;;  %s24_s29 = int_to_ptr.vmem [resolvable:$true] %s23_s29  ;;  %s49_s8 = int_to_ptr.vmem [resolvable:$true] %s48_s8 }
  0x28   :  { %s453_s11 = scalar_lea.hbm %s748_s0, 256 }
  0x29   :  { %p454_p2 = scmp.ne.s32.totalorder %s748_s0, %s453_s11  ;;  %p457_p3 = scmp.lt.u32.totalorder %s453_s11, %s748_s0 }
  0x2b   :  { %p459_p4 = pnand %p457_p3, %p454_p2 }
  0x2d   :  { %462 = shalt.err (!%p459_p4)
}
  0x2e   :  { %s463_s3 = scalar_lea.vmem %s24_s29, 256  ;;  %p468_p6 = scmp.lt.s32.totalorder %s24_s29, %s24_s29 }
  0x2f   :  { %p464_p5 = scmp.ne.s32.totalorder %s24_s29, %s463_s3  ;;  %p469_p7 = scmp.lt.s32.totalorder %s463_s3, %s463_s3 }
  0x31   :  { %p470_p8 = por %p469_p7, %p468_p6 }
  0x33   :  { %p471_p9 = pnand %p470_p8, %p464_p5 }
  0x35   :  { %474 = shalt.err (!%p471_p9)
}
  0x36   :  { %29 = dma.hbm_to_vmem [thread:$0]  %s748_s0, 256, %s24_s29, [#allocation6], %s575_s13, %s575_s13, %s576_s14  }
  0x37   :  { %s475_s21 = scalar_lea.hbm %s750_s2, 16 }
  0x38   :  { %p476_p10 = scmp.ne.s32.totalorder %s750_s2, %s475_s21  ;;  %p479_p11 = scmp.lt.u32.totalorder %s475_s21, %s750_s2 }
  0x3a   :  { %p481_p12 = pnand %p479_p11, %p476_p10 }
  0x3c   :  { %484 = shalt.err (!%p481_p12)
}
  0x3d   :  { %s485_s25 = scalar_lea.vmem %s49_s8, 16  ;;  %s489_s26 = scalar_lea.vmem %s49_s8, 32 }
  0x3e   :  { %p486_p13 = scmp.ne.s32.totalorder %s49_s8, %s485_s25  ;;  %p490_p0 = scmp.lt.s32.totalorder %s49_s8, %s49_s8 }
  0x3f   :  { %p491_p1 = scmp.lt.s32.totalorder %s489_s26, %s485_s25 }
  0x41   :  { %p492_p2 = por %p491_p1, %p490_p0 }
  0x43   :  { %p493_p3 = pnand %p492_p2, %p486_p13 }
  0x45   :  { %496 = shalt.err (!%p493_p3)
}
  0x46   :  { %51 = dma.hbm_to_vmem [thread:$0]  %s750_s2, 16, %s49_s8, [#allocation9]  }
  0x47   :  { %s579_s29 = smov [#allocation13]   ;;  %s497_s11 = scalar_lea.hbm %s752_s4, 512 }
  0x48   :  { %s67_s30 = sshll.u32 %s579_s29, 4  ;;  %p498_p4 = scmp.ne.s32.totalorder %s752_s4, %s497_s11  ;;  %s68_s30 = int_to_ptr.vmem [resolvable:$true] %s67_s30 }
  0x49   :  { %p501_p5 = scmp.lt.u32.totalorder %s497_s11, %s752_s4 }
  0x4b   :  { %p503_p6 = pnand %p501_p5, %p498_p4 }
  0x4d   :  { %506 = shalt.err (!%p503_p6)
}
  0x4e   :  { %s507_s3 = scalar_lea.vmem %s68_s30, 512  ;;  %p512_p8 = scmp.lt.s32.totalorder %s68_s30, %s68_s30 }
  0x4f   :  { %p508_p7 = scmp.ne.s32.totalorder %s68_s30, %s507_s3  ;;  %p513_p9 = scmp.lt.s32.totalorder %s507_s3, %s507_s3 }
  0x51   :  { %p514_p10 = por %p513_p9, %p512_p8 }
  0x53   :  { %p515_p11 = pnand %p514_p10, %p508_p7 }
  0x55   :  { %518 = shalt.err (!%p515_p11)
}
  0x56   :  { %s580_s2 = smov 64   ;;  %s581_s8 = smov 4  }
  0x57   :  { %73 = dma.hbm_to_vmem [thread:$0]  %s752_s4, 512, %s68_s30, [#allocation12], %s580_s2, %s580_s2, %s581_s8  }
  0x58   :  { %s582_s19 = smov [#allocation14]   ;;  %s519_s23 = scalar_lea.hbm %s754_s6, 256 }
  0x59   :  { %s81_s20 = sshll.u32 %s582_s19, 4  ;;  %p520_p12 = scmp.ne.s32.totalorder %s754_s6, %s519_s23  ;;  %s82_s20 = int_to_ptr.vmem [resolvable:$true] %s81_s20 }
  0x5a   :  { %p523_p13 = scmp.lt.u32.totalorder %s519_s23, %s754_s6 }
  0x5c   :  { %p525_p0 = pnand %p523_p13, %p520_p12 }
  0x5e   :  { %528 = shalt.err (!%p525_p0)
}
  0x5f   :  { %s529_s0 = scalar_lea.vmem %s82_s20, 256  ;;  %p534_p2 = scmp.lt.s32.totalorder %s82_s20, %s82_s20 }
  0x60   :  { %p530_p1 = scmp.ne.s32.totalorder %s82_s20, %s529_s0  ;;  %p535_p3 = scmp.lt.s32.totalorder %s529_s0, %s529_s0 }
  0x62   :  { %p536_p4 = por %p535_p3, %p534_p2 }
  0x64   :  { %p537_p5 = pnand %p536_p4, %p530_p1 }
  0x66   :  { %540 = shalt.err (!%p537_p5)
}
  0x67   :  { %87 = dma.hbm_to_vmem [thread:$0]  %s754_s6, 256, %s82_s20, [#allocation15], %s575_s13, %s575_s13, %s576_s14  }
  0x68   :  { %563 = dma.done.wait [#allocation6], 256  }
  0x69   :  { %564 = vsyncadd [#allocation6], 4294967040 }
  0x6a   :  { %565 = dma.done.wait [#allocation9], 272  }
  0x6b   :  { %566 = vsyncadd [#allocation9], 4294967024 }
  0x6c   :  { %567 = dma.done.wait [#allocation12], 528  }
  0x6d   :  { %568 = vsyncadd [#allocation12], 4294966768 }
  0x6e   :  { %569 = dma.done.wait [#allocation15], 256  }
  0x6f   :  { %570 = vsyncadd [#allocation15], 4294967040  ;;  %v111_v0 = vld [vmem:[#allocation5] sm:$0xff]  ;;  %vm117_vm0 = vcmask 523264   ;;  %v112_v1 = vld [vmem:[#allocation5 + $0x8] sm:$0xff]  ;;  %v583_v55 = vmov 0.0  }
  0x70   :  { %v115_v2 = vmul.f32 %v111_v0, %v111_v0  ;;  %v116_v3 = vmul.f32 %v112_v1, %v112_v1  ;;  %v113_v6 = vld [vmem:[#allocation8] sm:$0xff]  ;;  %v114_v8 = vld [vmem:[#allocation8 + $0x8] sm:$0xff]  ;;  %v341_v22 = vld [vmem:[#allocation10] ss:$0 sm:$0xff]  ;;  %355 = vmatprep.subr.bf16.mxu0 %v583_v55  ;;  %v584_v57 = vmov 0   ;;  %vm585_vm1 = vmmov 0  }
  0x71   :  { %v342_v7 = vmul.f32 -1.442695, %v113_v6  ;;  %v343_v9 = vmul.f32 -1.442695, %v114_v8  ;;  %v344_v44 = vld [vmem:[#allocation11] ss:$0 sm:$0xff]  ;;  %383 = vset.pattern.permute.xlu0 %v584_v57  ;;  %384 = vset.pattern.permute.xlu1 %v584_v57 }
  0x72   :  { %v118_v4 = vsel %vm117_vm0, %v115_v2, 0.0  ;;  %v121_v5 = vsel %vm117_vm0, %v116_v3, 0.0  ;;  %v385_v54 = vld [vmem:[#allocation13] sm:$0xff]   ;;  %v386_v58 = vld [vmem:[#allocation13 + $0x8] sm:$0xff]   ;;  %v387_v60 = vld [vmem:[#allocation13 + $0x10] sm:$0xff]   ;;  %363 = vmatprep.mubr.msk.bf16.mxu0 %vm585_vm1, %v583_v55  ;;  %vm207_vm2 = vcmask 7168  }
  0x73   :  { %119 = vadd.xlane.f32.xlu0 %v118_v4  ;;  %389 = vpow2.f32 %v342_v7  ;;  %v246_v56 = vsel %vm117_vm0, %v385_v54, 0  ;;  %v249_v59 = vsel %vm117_vm0, %v386_v58, 0  ;;  %v252_v61 = vsel %vm117_vm0, %v387_v60, 0  ;;  %v388_v62 = vld [vmem:[#allocation13 + $0x18] sm:$0xff]   ;;  %s301_s30 = smul.f32 0.007874016, %s753_s5 }
  0x74   :  { %391 = vpow2.f32 %v343_v9  ;;  %356 = vmatpush3.bf16.xpose.msra.mxu0 %v246_v56  ;;  %v255_v63 = vsel %vm117_vm0, %v388_v62, 0  ;;  %s586_s5 = smov [#allocation16]  }
  0x75   :  { %357 = vmatprep.subr.bf16.mxu0 %v583_v55  ;;  %v302_v4 = vstv %s301_s30  ;;  %s326_s9 = sshll.u32 %s586_s5, 4  ;;  %s327_s9 = int_to_ptr.vmem [resolvable:$true] %s326_s9 }
  0x76   :  { %s541_s10 = scalar_lea.vmem %s327_s9, 256  ;;  %p546_p7 = scmp.lt.s32.totalorder %s327_s9, %s327_s9 }
  0x77   :  { %122 = vadd.xlane.f32.xlu0 %v121_v5  ;;  %p542_p6 = scmp.ne.s32.totalorder %s327_s9, %s541_s10  ;;  %p547_p8 = scmp.lt.s32.totalorder %s541_s10, %s541_s10 }
  0x79   :  { %p548_p9 = por %p547_p8, %p546_p7 }
  0x7b   :  { %p549_p10 = pnand %p548_p9, %p542_p6 }
  0x7c   :  { %358 = vmatpush3.bf16.xpose.msra.mxu0 %v249_v59 }
  0x7d   :  { %v390_v10 = vpop.eup %389  ;;  %359 = vmatprep.subr.bf16.mxu0 %v583_v55 }
  0x7e   :  { %v148_v11 = vadd.f32 1.0, %v390_v10  ;;  %v392_v12 = vpop.eup %391 }
  0x7f   :  { %v149_v16 = vadd.f32 1.0, %v392_v12 }
  0x80   :  { %393 = vrcp.f32 %v148_v11 }
  0x84   :  { %360 = vmatpush3.bf16.xpose.msra.mxu0 %v252_v61 }
  0x85   :  { %361 = vmatprep.subr.bf16.mxu0 %v583_v55 }
  0x8a   :  { %v394_v20 = vpop.eup %393 }
  0x8b   :  { %v154_v24 = vmul.f32 %v394_v20, %v113_v6 }
  0x8c   :  { %362 = vmatpush3.bf16.xpose.msra.mxu0 %v255_v63 }
 0x100   :  { %v120_v13 = vpop.xlane.xlu0 %119 }
 0x101   :  { %v125_v14 = vmul.f32 0.015625, %v120_v13 }
 0x103   :  { %v127_v15 = vadd.f32 1e-06, %v125_v14 }
 0x104   :  { %v123_v17 = vpop.xlane.xlu0 %122 }
 0x105   :  { %395 = vrsqrt.f32 %v127_v15  ;;  %v126_v18 = vmul.f32 0.015625, %v123_v17 }
 0x106   :  { %397 = vrcp.f32 %v149_v16 }
 0x107   :  { %v128_v19 = vadd.f32 1e-06, %v126_v18 }
 0x109   :  { %399 = vrsqrt.f32 %v128_v19 }
 0x10f   :  { %v396_v21 = vpop.eup %395 }
 0x110   :  { %v131_v23 = vmul.f32 %v396_v21, %v111_v0  ;;  %v398_v25 = vpop.eup %397 }
 0x111   :  { %v155_v30 = vmul.f32 %v398_v25, %v114_v8 }
 0x112   :  { %v140_v26 = vmul.f32 %v341_v22, %v131_v23 }
 0x113   :  { %v400_v27 = vpop.eup %399 }
 0x114   :  { %v156_v28 = vmul.f32 %v154_v24, %v140_v26  ;;  %v132_v29 = vmul.f32 %v400_v27, %v112_v1  ;;  %v210_v24 = vld [vmem:[#allocation14] sm:$0xff] }
 0x116   :  { %v159_v31 = vmul.f32 %v156_v28, %v156_v28  ;;  %v141_v32 = vmul.f32 %v341_v22, %v132_v29  ;;  %v211_v29 = vld [vmem:[#allocation14 + $0x8] sm:$0xff] }
 0x118   :  { %v161_v33 = vsel %vm117_vm0, %v159_v31, 0.0  ;;  %v157_v34 = vmul.f32 %v155_v30, %v141_v32 }
 0x119   :  { %162 = vadd.xlane.f32.xlu1 %v161_v33 }
 0x11a   :  { %v160_v35 = vmul.f32 %v157_v34, %v157_v34 }
 0x11c   :  { %v164_v36 = vsel %vm117_vm0, %v160_v35, 0.0 }
 0x11d   :  { %165 = vadd.xlane.f32.xlu1 %v164_v36 }
 0x1a6   :  { %v163_v37 = vpop.xlane.xlu1 %162 }
 0x1a7   :  { %v167_v38 = vmul.f32 0.015625, %v163_v37 }
 0x1a9   :  { %v169_v39 = vadd.f32 1e-08, %v167_v38 }
 0x1aa   :  { %v166_v40 = vpop.xlane.xlu1 %165 }
 0x1ab   :  { %401 = vrsqrt.f32 %v169_v39  ;;  %v168_v41 = vmul.f32 0.015625, %v166_v40 }
 0x1ad   :  { %v170_v42 = vadd.f32 1e-08, %v168_v41 }
 0x1af   :  { %403 = vrsqrt.f32 %v170_v42 }
 0x1b5   :  { %v402_v43 = vpop.eup %401 }
 0x1b6   :  { %v173_v45 = vmul.f32 %v402_v43, %v156_v28 }
 0x1b8   :  { %v181_v46 = vmul.f32 %v344_v44, %v173_v45 }
 0x1b9   :  { %v404_v47 = vpop.eup %403 }
 0x1ba   :  { %v183_v48 = vand.u32 2147483647, %v181_v46  ;;  %v174_v49 = vmul.f32 %v404_v47, %v157_v34 }
 0x1bc   :  { %v185_v50 = vsel %vm117_vm0, %v183_v48, -inf  ;;  %v182_v51 = vmul.f32 %v344_v44, %v174_v49 }
 0x1bd   :  { %186 = vmax.xlane.f32.xlu0 %v185_v50 }
 0x1be   :  { %v184_v52 = vand.u32 2147483647, %v182_v51 }
 0x1c0   :  { %v188_v53 = vsel %vm117_vm0, %v184_v52, -inf }
 0x1c1   :  { %189 = vmax.xlane.f32.xlu1 %v188_v53 }
 0x24a   :  { %v187_v0 = vpop.xlane.xlu0 %186 }
 0x24b   :  { %v191_v1 = vmax.f32 %v187_v0, 1e-05 }
 0x24d   :  { %405 = vrcp.f32 %v191_v1  ;;  %208 = vst.msk [vmem:[#allocation3] sm:$0xff] %vm207_vm2, %v191_v1 }
 0x24e   :  { %v190_v2 = vpop.xlane.xlu1 %189 }
 0x24f   :  { %v192_v3 = vmax.f32 %v190_v2, 1e-05 }
 0x251   :  { %407 = vrcp.f32 %v192_v3  ;;  %209 = vst.msk [vmem:[#allocation3 + $0x8] sm:$0xff] %vm207_vm2, %v192_v3 }
 0x254   :  { %v298_v5 = vld [vmem:[#allocation3] sm:$0xff] }
 0x255   :  { %v303_v6 = vmul.f32 %v302_v4, %v298_v5 }
 0x257   :  { %v406_v7 = vpop.eup %405  ;;  %307 = vperm.xlu0 %383, %v303_v6  }
 0x258   :  { %v194_v8 = vmul.f32 127.0, %v406_v7  ;;  %v299_v9 = vld [vmem:[#allocation3 + $0x8] sm:$0xff] }
 0x259   :  { %v304_v10 = vmul.f32 %v302_v4, %v299_v9 }
 0x25a   :  { %v197_v11 = vmul.f32 %v194_v8, %v181_v46 }
 0x25b   :  { %v408_v12 = vpop.eup %407  ;;  %312 = vperm.xlu1 %384, %v304_v10  }
 0x25c   :  { %v367_v13 = vround.rtne.f32 %v197_v11  ;;  %v196_v14 = vmul.f32 127.0, %v408_v12 }
 0x25e   :  { %v198_v15 = vmul.f32 %v196_v14, %v182_v51  ;;  %v201_v16 = vmax.f32 %v367_v13, -128.0 }
 0x260   :  { %v368_v17 = vround.rtne.f32 %v198_v15  ;;  %v203_v19 = vmin.f32 %v201_v16, 127.0 }
 0x262   :  { %v202_v18 = vmax.f32 %v368_v17, -128.0 }
 0x264   :  { %v204_v20 = vmin.f32 %v202_v18, 127.0 }
 0x266   :  { %v205_v21 = vpack.c.bf16 %v204_v20, %v203_v19 }
 0x268   :  { %206 = vst.msk [vmem:[#allocation2] sm:$0xff] %vm117_vm0, %v205_v21 }
 0x26f   :  { %v212_v22 = vld [vmem:[#allocation2] sm:$0xff] }
 0x270   :  { %364 = vmatmul.mubr.msk.bf16.vlgmr.msra.gmra.mrb[0].mxu0 %vm117_vm0, %v212_v22 }
 0x2d6   :  { %v308_v23 = vpop.permute.xlu0 %307 }
 0x2da   :  { %v313_v28 = vpop.permute.xlu1 %312 }
 0x343   :  { %v291_v25 = vpop.f32.mrb[0].mxu0 }
 0x344   :  { %v315_v26 = vmul.f32 %v308_v23, %v291_v25  ;;  %v365_v27 = vpop.f32.mrb[1].mxu0 }
 0x345   :  { %v294_v30 = vpop.f32.mrb[2].mxu0 }
 0x346   :  { %v317_v31 = vadd.f32 %v315_v26, %v210_v24  ;;  %v316_v32 = vmul.f32 %v313_v28, %v294_v30  ;;  %v366_v33 = vpop.f32.mrb[3].mxu0 }
 0x348   :  { %319 = vst.msk [vmem:[#allocation16] sm:$0xff] %vm117_vm0, %v317_v31  ;;  %v318_v34 = vadd.f32 %v316_v32, %v211_v29 }
 0x34a   :  { %320 = vst.msk [vmem:[#allocation16 + $0x8] sm:$0xff] %vm117_vm0, %v318_v34 }
 0x34b   :  { %552 = shalt.err (!%p549_p10)
}
 0x34c   :  { %s553_s15 = scalar_lea.hbm %s755_s7, 256 }
 0x34d   :  { %p554_p11 = scmp.ne.s32.totalorder %s755_s7, %s553_s15  ;;  %p557_p12 = scmp.lt.u32.totalorder %s553_s15, %s755_s7 }
 0x34f   :  { %p559_p13 = pnand %p557_p12, %p554_p11 }
 0x351   :  { %562 = shalt.err (!%p559_p13)
}
 0x352   :  { %332 = dma.vmem_to_hbm [thread:$0]  %s327_s9, 256, %s755_s7, [#allocation7], %s575_s13, %s575_s13, %s576_s14  }
 0x353   :  { %571 = dma.done.wait [#allocation7], 256  }
 0x354   :  { %572 = vsyncadd [#allocation7], 4294967040 }
 0x355   :  { %336 = vsyncpa [#allocation6], 1 }
 0x356   :  { %337 = vsyncpa [#allocation9], 1 }
 0x357   :  { %338 = vsyncpa [#allocation12], 1 }
 0x358   :  { %339 = vsyncpa [#allocation15], 1 }
 0x359   :  { %340 = vsyncpa [#allocation7], 1 }

// kernel: hgrn_bit_block.12
= control target key start
LH: loop header
LB: loop body
LE: loop exit
PB: predicated region body
PF: predicated region fallthrough
CT: control target
= control target key end

     0   :  { %11 = vsyncpa [#allocation6], 0  ;;  %s1058_s0 = inlined_call_operand.hbm [shape: f32[16,64], index: 0, kind: input, shape index: {}]   ;;  %s1059_s1 = inlined_call_operand.hbm [shape: f32[1,64], index: 1, kind: input, shape index: {}]   ;;  %s1060_s2 = inlined_call_operand.hbm [shape: f32[1,64], index: 2, kind: input, shape index: {}]   ;;  %s1061_s3 = inlined_call_operand.hbm [shape: bf16[512,64], index: 3, kind: input, shape index: {}]   ;;  %s1062_s4 = inlined_call_operand.<no memory space> [shape: f32[1,1], index: 4, kind: input, shape index: {}]   ;;  %s1063_s5 = inlined_call_operand.hbm [shape: f32[16,512], index: 5, kind: output, shape index: {}]  }
   0x1   :  { %12 = vsyncpa [#allocation9], 0 }
   0x2   :  { %13 = vsyncpa [#allocation12], 0 }
   0x3   :  { %14 = vsyncpa [#allocation7], 0  ;;  %s888_s18 = smov [#allocation8]   ;;  %s889_s20 = smov [#allocation5]  }
   0x4   :  { %s33_s19 = sshll.u32 %s888_s18, 4  ;;  %s20_s21 = sshll.u32 %s889_s20, 4  ;;  %s34_s19 = int_to_ptr.vmem [resolvable:$true] %s33_s19  ;;  %s930_s21 = int_to_ptr.vmem [resolvable:$true] %s20_s21 }
   0x5   :  { %s770_s24 = scalar_lea.hbm %s1059_s1, 16 }
   0x6   :  { %p771_p0 = scmp.ne.s32.totalorder %s1059_s1, %s770_s24  ;;  %p774_p1 = scmp.lt.u32.totalorder %s770_s24, %s1059_s1 }
   0x8   :  { %p776_p2 = pnand %p774_p1, %p771_p0 }
   0xa   :  { %779 = shalt.err (!%p776_p2)
}
   0xb   :  { %s780_s29 = scalar_lea.vmem %s34_s19, 16  ;;  %s784_s30 = scalar_lea.vmem %s34_s19, 32 }
   0xc   :  { %p781_p3 = scmp.ne.s32.totalorder %s34_s19, %s780_s29  ;;  %p785_p4 = scmp.lt.s32.totalorder %s34_s19, %s34_s19 }
   0xd   :  { %p786_p5 = scmp.lt.s32.totalorder %s784_s30, %s780_s29 }
   0xf   :  { %p787_p6 = por %p786_p5, %p785_p4 }
  0x11   :  { %p788_p7 = pnand %p787_p6, %p781_p3 }
  0x13   :  { %791 = shalt.err (!%p788_p7)
}
  0x14   :  { %36 = dma.hbm_to_vmem [thread:$0]  %s1059_s1, 16, %s34_s19, [#allocation9]  }
  0x15   :  { %s792_s10 = scalar_lea.hbm %s1058_s0, 256 }
  0x16   :  { %p793_p8 = scmp.ne.s32.totalorder %s1058_s0, %s792_s10  ;;  %p796_p9 = scmp.lt.u32.totalorder %s792_s10, %s1058_s0 }
  0x18   :  { %p798_p10 = pnand %p796_p9, %p793_p8 }
  0x1a   :  { %801 = shalt.err (!%p798_p10)
}
  0x1b   :  { %s802_s15 = scalar_lea.vmem %s930_s21, 256  ;;  %p807_p12 = scmp.lt.s32.totalorder %s930_s21, %s930_s21 }
  0x1c   :  { %p803_p11 = scmp.ne.s32.totalorder %s930_s21, %s802_s15  ;;  %p808_p13 = scmp.lt.s32.totalorder %s802_s15, %s802_s15 }
  0x1e   :  { %p809_p0 = por %p808_p13, %p807_p12 }
  0x20   :  { %p810_p1 = pnand %p809_p0, %p803_p11 }
  0x22   :  { %813 = shalt.err (!%p810_p1)
}
  0x23   :  { %s890_s1 = smov 128   ;;  %s891_s16 = smov 8  }
  0x24   :  { %26 = dma.hbm_to_vmem [thread:$0]  %s1058_s0, 256, %s930_s21, [#allocation6], %s890_s1, %s890_s1, %s891_s16  }
  0x25   :  { %s892_s19 = smov [#allocation10]   ;;  %s893_s22 = smov [#allocation11]  }
  0x26   :  { %s43_s20 = sshll.u32 %s892_s19, 4  ;;  %s52_s23 = sshll.u32 %s893_s22, 4  ;;  %s44_s20 = int_to_ptr.vmem [resolvable:$true] %s43_s20  ;;  %s961_s23 = int_to_ptr.vmem [resolvable:$true] %s52_s23 }
  0x27   :  { %s814_s26 = scalar_lea.hbm %s1060_s2, 16 }
  0x28   :  { %p815_p2 = scmp.ne.s32.totalorder %s1060_s2, %s814_s26  ;;  %p818_p3 = scmp.lt.u32.totalorder %s814_s26, %s1060_s2 }
  0x2a   :  { %p820_p4 = pnand %p818_p3, %p815_p2 }
  0x2c   :  { %823 = shalt.err (!%p820_p4)
}
  0x2d   :  { %s824_s0 = scalar_lea.vmem %s44_s20, 16  ;;  %s828_s21 = scalar_lea.vmem %s44_s20, 32 }
  0x2e   :  { %p825_p5 = scmp.ne.s32.totalorder %s44_s20, %s824_s0  ;;  %p829_p6 = scmp.lt.s32.totalorder %s44_s20, %s44_s20 }
  0x2f   :  { %p830_p7 = scmp.lt.s32.totalorder %s828_s21, %s824_s0 }
  0x31   :  { %p831_p8 = por %p830_p7, %p829_p6 }
  0x33   :  { %p832_p9 = pnand %p831_p8, %p825_p5 }
  0x35   :  { %835 = shalt.err (!%p832_p9)
}
  0x36   :  { %46 = dma.hbm_to_vmem [thread:$0]  %s1060_s2, 16, %s44_s20, [#allocation9]  }
  0x37   :  { %s836_s10 = scalar_lea.hbm %s1061_s3, 4096 }
  0x38   :  { %p837_p10 = scmp.ne.s32.totalorder %s1061_s3, %s836_s10  ;;  %p840_p11 = scmp.lt.u32.totalorder %s836_s10, %s1061_s3 }
  0x3a   :  { %p842_p12 = pnand %p840_p11, %p837_p10 }
  0x3c   :  { %845 = shalt.err (!%p842_p12)
}
  0x3d   :  { %s846_s15 = scalar_lea.vmem %s961_s23, 4096  ;;  %p851_p0 = scmp.lt.s32.totalorder %s961_s23, %s961_s23 }
  0x3e   :  { %p847_p13 = scmp.ne.s32.totalorder %s961_s23, %s846_s15  ;;  %p852_p1 = scmp.lt.s32.totalorder %s846_s15, %s846_s15 }
  0x40   :  { %p853_p2 = por %p852_p1, %p851_p0 }
  0x42   :  { %p854_p3 = pnand %p853_p2, %p847_p13 }
  0x44   :  { %857 = shalt.err (!%p854_p3)
}
  0x45   :  { %s894_s2 = smov 64   ;;  %s895_s1 = smov 4  }
  0x46   :  { %58 = dma.hbm_to_vmem [thread:$0]  %s1061_s3, 4096, %s961_s23, [#allocation12], %s894_s2, %s894_s2, %s895_s1  }
  0x47   :  { %880 = dma.done.wait [#allocation6], 256  }
  0x48   :  { %881 = vsyncadd [#allocation6], 4294967040 }
  0x49   :  { %882 = dma.done.wait [#allocation9], 32  }
  0x4a   :  { %883 = vsyncadd [#allocation9], 4294967264 }
  0x4b   :  { %884 = dma.done.wait [#allocation12], 4096  }
  0x4c   :  { %885 = vsyncadd [#allocation12], 4294963200  ;;  %v78_v0 = vld [vmem:[#allocation5] sm:$0xff]  ;;  %vm82_vm0 = vcmask 523264   ;;  %v79_v1 = vld [vmem:[#allocation5 + $0x8] sm:$0xff]  ;;  %vm156_vm1 = vcmask 7168  }
  0x4d   :  { %v80_v2 = vmul.f32 %v78_v0, %v78_v0  ;;  %v81_v3 = vmul.f32 %v79_v1, %v79_v1  ;;  %v622_v13 = vld [vmem:[#allocation8] ss:$0 sm:$0xff]  ;;  %v726_v23 = vld [vmem:[#allocation11 + $0x40] sm:$0xff]   ;;  %v730_v27 = vld [vmem:[#allocation11 + $0x48] sm:$0xff]   ;;  %s573_s19 = smul.f32 0.007874016, %s1062_s4 }
  0x4e   :  { %v727_v24 = vld [vmem:[#allocation11 + $0xc0] sm:$0xff]   ;;  %v731_v28 = vld [vmem:[#allocation11 + $0xc8] sm:$0xff]   ;;  %694 = vmatprep.subr.msk.bf16.mxu0 %vm82_vm0, %v726_v23  ;;  %v734_v34 = vld [vmem:[#allocation11 + $0x50] sm:$0xff]   ;;  %s897_s4 = smov [#allocation13]  }
  0x4f   :  { %v83_v4 = vsel %vm82_vm0, %v80_v2, 0.0  ;;  %v86_v5 = vsel %vm82_vm0, %v81_v3, 0.0  ;;  %v728_v25 = vld [vmem:[#allocation11] sm:$0xff]   ;;  %702 = vmatprep.subr.msk.bf16.mxu1 %vm82_vm0, %v727_v24  ;;  %v732_v31 = vld [vmem:[#allocation11 + $0x8] sm:$0xff]   ;;  %v735_v36 = vld [vmem:[#allocation11 + $0xd0] sm:$0xff]   ;;  %s608_s20 = sshll.u32 %s897_s4, 4  ;;  %s609_s20 = int_to_ptr.vmem [resolvable:$true] %s608_s20 }
  0x50   :  { %84 = vadd.xlane.f32.xlu0 %v83_v4  ;;  %v729_v26 = vld [vmem:[#allocation11 + $0x80] sm:$0xff]   ;;  %v389_v29 = vsel %vm82_vm0, %v728_v25, 0  ;;  %v733_v32 = vld [vmem:[#allocation11 + $0x88] sm:$0xff]   ;;  %v392_v33 = vsel %vm82_vm0, %v732_v31, 0  ;;  %v736_v37 = vld [vmem:[#allocation11 + $0x10] sm:$0xff]   ;;  %s858_s22 = scalar_lea.vmem %s609_s20, 1024  ;;  %p863_p5 = scmp.lt.s32.totalorder %s609_s20, %s609_s20 }
  0x51   :  { %659 = vmatpush3.bf16.xpose.msra.mxu0 %v389_v29  ;;  %v437_v30 = vsel %vm82_vm0, %v729_v26, 0  ;;  %v440_v35 = vsel %vm82_vm0, %v733_v32, 0  ;;  %v737_v38 = vld [vmem:[#allocation11 + $0x90] sm:$0xff]   ;;  %v395_v39 = vsel %vm82_vm0, %v736_v37, 0  ;;  %v738_v40 = vld [vmem:[#allocation11 + $0x58] sm:$0xff]   ;;  %v744_v2 = vld [vmem:[#allocation11 + $0x20] sm:$0xff]   ;;  %v574_v29 = vstv %s573_s19  ;;  %p859_p4 = scmp.ne.s32.totalorder %s609_s20, %s858_s22  ;;  %p864_p6 = scmp.lt.s32.totalorder %s858_s22, %s858_s22 }
  0x52   :  { %677 = vmatpush3.bf16.xpose.msra.mxu1 %v437_v30  ;;  %695 = vmatprep.subr.msk.bf16.mxu0 %vm82_vm0, %v730_v27  ;;  %v443_v41 = vsel %vm82_vm0, %v737_v38, 0  ;;  %v739_v42 = vld [vmem:[#allocation11 + $0xd8] sm:$0xff]   ;;  %v745_v3 = vld [vmem:[#allocation11 + $0xa0] sm:$0xff]   ;;  %v401_v4 = vsel %vm82_vm0, %v744_v2, 0 }
  0x53   :  { %703 = vmatprep.subr.msk.bf16.mxu1 %vm82_vm0, %v731_v28  ;;  %v740_v43 = vld [vmem:[#allocation11 + $0x18] sm:$0xff]   ;;  %p865_p7 = por %p864_p6, %p863_p5 }
  0x54   :  { %87 = vadd.xlane.f32.xlu0 %v86_v5  ;;  %v741_v44 = vld [vmem:[#allocation11 + $0x98] sm:$0xff]   ;;  %v398_v45 = vsel %vm82_vm0, %v740_v43, 0  ;;  %v449_v5 = vsel %vm82_vm0, %v745_v3, 0 }
  0x55   :  { %v446_v46 = vsel %vm82_vm0, %v741_v44, 0  ;;  %v623_v54 = vld [vmem:[#allocation10] ss:$0 sm:$0xff]  ;;  %p866_p8 = pnand %p865_p7, %p859_p4 }
  0x59   :  { %661 = vmatpush3.bf16.xpose.msra.mxu0 %v392_v33 }
  0x5a   :  { %679 = vmatpush3.bf16.xpose.msra.mxu1 %v440_v35  ;;  %696 = vmatprep.subr.msk.bf16.mxu0 %vm82_vm0, %v734_v34 }
  0x5b   :  { %704 = vmatprep.subr.msk.bf16.mxu1 %vm82_vm0, %v735_v36 }
  0x61   :  { %663 = vmatpush3.bf16.xpose.msra.mxu0 %v395_v39 }
  0x62   :  { %681 = vmatpush3.bf16.xpose.msra.mxu1 %v443_v41  ;;  %697 = vmatprep.subr.msk.bf16.mxu0 %vm82_vm0, %v738_v40 }
  0x63   :  { %705 = vmatprep.subr.msk.bf16.mxu1 %vm82_vm0, %v739_v42 }
  0x69   :  { %665 = vmatpush3.bf16.xpose.msra.mxu0 %v398_v45 }
  0x6a   :  { %683 = vmatpush3.bf16.xpose.msra.mxu1 %v446_v46 }
  0xdd   :  { %v85_v6 = vpop.xlane.xlu0 %84 }
  0xde   :  { %v90_v7 = vmul.f32 0.015625, %v85_v6  ;;  %v896_v6 = vmov 0  }
  0xdf   :  { %724 = vset.pattern.permute.xlu0 %v896_v6  ;;  %725 = vset.pattern.permute.xlu1 %v896_v6 }
  0xe0   :  { %v92_v8 = vadd.f32 1e-06, %v90_v7  ;;  %v746_v7 = vld [vmem:[#allocation11 + $0x68] sm:$0xff]  }
  0xe1   :  { %v88_v9 = vpop.xlane.xlu0 %87 }
  0xe2   :  { %758 = vrsqrt.f32 %v92_v8  ;;  %v91_v10 = vmul.f32 0.015625, %v88_v9  ;;  %v747_v8 = vld [vmem:[#allocation11 + $0xe8] sm:$0xff]  }
  0xe3   :  { %v748_v9 = vld [vmem:[#allocation11 + $0x28] sm:$0xff]  }
  0xe4   :  { %v93_v11 = vadd.f32 1e-06, %v91_v10  ;;  %v749_v10 = vld [vmem:[#allocation11 + $0xa8] sm:$0xff]  }
  0xe6   :  { %760 = vrsqrt.f32 %v93_v11  ;;  %v404_v11 = vsel %vm82_vm0, %v748_v9, 0 }
  0xec   :  { %v759_v12 = vpop.eup %758 }
  0xed   :  { %v96_v14 = vmul.f32 %v759_v12, %v78_v0  ;;  %v742_v0 = vld [vmem:[#allocation11 + $0x60] sm:$0xff]   ;;  %v452_v12 = vsel %vm82_vm0, %v749_v10, 0 }
  0xee   :  { %698 = vmatprep.subr.msk.bf16.mxu0 %vm82_vm0, %v742_v0 }
  0xef   :  { %v105_v15 = vmul.f32 %v622_v13, %v96_v14  ;;  %667 = vmatpush3.bf16.xpose.msra.mxu0 %v401_v4  ;;  %v751_v14 = vld [vmem:[#allocation11 + $0xf0] sm:$0xff]  }
  0xf0   :  { %v761_v16 = vpop.eup %760  ;;  %699 = vmatprep.subr.msk.bf16.mxu0 %vm82_vm0, %v746_v7 }
  0xf1   :  { %v108_v17 = vmul.f32 %v105_v15, %v105_v15  ;;  %v97_v18 = vmul.f32 %v761_v16, %v79_v1  ;;  %v743_v1 = vld [vmem:[#allocation11 + $0xe0] sm:$0xff]   ;;  %v753_v16 = vld [vmem:[#allocation11 + $0xb0] sm:$0xff]  }
  0xf2   :  { %706 = vmatprep.subr.msk.bf16.mxu1 %vm82_vm0, %v743_v1 }
  0xf3   :  { %v110_v19 = vsel %vm82_vm0, %v108_v17, 0.0  ;;  %v106_v20 = vmul.f32 %v622_v13, %v97_v18  ;;  %685 = vmatpush3.bf16.xpose.msra.mxu1 %v449_v5  ;;  %v750_v13 = vld [vmem:[#allocation11 + $0x70] sm:$0xff]   ;;  %v455_v18 = vsel %vm82_vm0, %v753_v16, 0 }
  0xf4   :  { %111 = vadd.xlane.f32.xlu1 %v110_v19  ;;  %707 = vmatprep.subr.msk.bf16.mxu1 %vm82_vm0, %v747_v8  ;;  %v754_v19 = vld [vmem:[#allocation11 + $0x78] sm:$0xff]  }
  0xf5   :  { %v109_v21 = vmul.f32 %v106_v20, %v106_v20 }
  0xf7   :  { %v113_v22 = vsel %vm82_vm0, %v109_v21, 0.0  ;;  %669 = vmatpush3.bf16.xpose.msra.mxu0 %v404_v11  ;;  %v756_v21 = vld [vmem:[#allocation11 + $0x38] sm:$0xff]  }
  0xf8   :  { %114 = vadd.xlane.f32.xlu1 %v113_v22  ;;  %700 = vmatprep.subr.msk.bf16.mxu0 %vm82_vm0, %v750_v13  ;;  %v757_v22 = vld [vmem:[#allocation11 + $0xb8] sm:$0xff]   ;;  %v410_v23 = vsel %vm82_vm0, %v756_v21, 0 }
  0xf9   :  { %v458_v24 = vsel %vm82_vm0, %v757_v22, 0 }
  0xfb   :  { %687 = vmatpush3.bf16.xpose.msra.mxu1 %v452_v12 }
  0xfc   :  { %708 = vmatprep.subr.msk.bf16.mxu1 %vm82_vm0, %v751_v14 }
 0x103   :  { %689 = vmatpush3.bf16.xpose.msra.mxu1 %v455_v18 }
 0x181   :  { %v112_v47 = vpop.xlane.xlu1 %111 }
 0x182   :  { %v116_v48 = vmul.f32 0.015625, %v112_v47 }
 0x184   :  { %v118_v49 = vadd.f32 1e-08, %v116_v48 }
 0x185   :  { %v115_v50 = vpop.xlane.xlu1 %114 }
 0x186   :  { %762 = vrsqrt.f32 %v118_v49  ;;  %v117_v51 = vmul.f32 0.015625, %v115_v50 }
 0x188   :  { %v119_v52 = vadd.f32 1e-08, %v117_v51 }
 0x18a   :  { %764 = vrsqrt.f32 %v119_v52 }
 0x190   :  { %v763_v53 = vpop.eup %762 }
 0x191   :  { %v122_v55 = vmul.f32 %v763_v53, %v105_v15  ;;  %v752_v15 = vld [vmem:[#allocation11 + $0x30] sm:$0xff]  }
 0x192   :  { %v407_v17 = vsel %vm82_vm0, %v752_v15, 0 }
 0x193   :  { %v1012_v56 = vmul.f32 %v623_v54, %v122_v55  ;;  %671 = vmatpush3.bf16.xpose.msra.mxu0 %v407_v17 }
 0x194   :  { %v765_v57 = vpop.eup %764  ;;  %701 = vmatprep.subr.msk.bf16.mxu0 %vm82_vm0, %v754_v19 }
 0x195   :  { %v132_v58 = vand.u32 2147483647, %v1012_v56  ;;  %v123_v59 = vmul.f32 %v765_v57, %v106_v20  ;;  %v755_v20 = vld [vmem:[#allocation11 + $0xf8] sm:$0xff]  }
 0x196   :  { %709 = vmatprep.subr.msk.bf16.mxu1 %vm82_vm0, %v755_v20 }
 0x197   :  { %v134_v60 = vsel %vm82_vm0, %v132_v58, -inf  ;;  %v1016_v61 = vmul.f32 %v623_v54, %v123_v59  ;;  %691 = vmatpush3.bf16.xpose.msra.mxu1 %v458_v24 }
 0x198   :  { %135 = vmax.xlane.f32.xlu0 %v134_v60 }
 0x199   :  { %v133_v62 = vand.u32 2147483647, %v1016_v61 }
 0x19b   :  { %v137_v63 = vsel %vm82_vm0, %v133_v62, -inf  ;;  %673 = vmatpush3.bf16.xpose.msra.mxu0 %v410_v23 }
 0x19c   :  { %138 = vmax.xlane.f32.xlu1 %v137_v63 }
 0x225   :  { %v136_v25 = vpop.xlane.xlu0 %135 }
 0x226   :  { %v140_v26 = vmax.f32 %v136_v25, 1e-05 }
 0x228   :  { %766 = vrcp.f32 %v140_v26  ;;  %157 = vst.msk [vmem:[#allocation3] sm:$0xff] %vm156_vm1, %v140_v26 }
 0x229   :  { %v139_v27 = vpop.xlane.xlu1 %138 }
 0x22a   :  { %v141_v28 = vmax.f32 %v139_v27, 1e-05 }
 0x22c   :  { %768 = vrcp.f32 %v141_v28  ;;  %158 = vst.msk [vmem:[#allocation3 + $0x8] sm:$0xff] %vm156_vm1, %v141_v28 }
 0x22f   :  { %v570_v30 = vld [vmem:[#allocation3] sm:$0xff] }
 0x230   :  { %v575_v31 = vmul.f32 %v574_v29, %v570_v30 }
 0x232   :  { %v767_v32 = vpop.eup %766  ;;  %579 = vperm.xlu0 %724, %v575_v31  }
 0x233   :  { %v143_v33 = vmul.f32 127.0, %v767_v32  ;;  %v571_v34 = vld [vmem:[#allocation3 + $0x8] sm:$0xff] }
 0x234   :  { %v576_v35 = vmul.f32 %v574_v29, %v571_v34 }
 0x235   :  { %v146_v36 = vmul.f32 %v143_v33, %v1012_v56 }
 0x236   :  { %v769_v37 = vpop.eup %768  ;;  %584 = vperm.xlu1 %725, %v576_v35  }
 0x237   :  { %v710_v38 = vround.rtne.f32 %v146_v36  ;;  %v145_v39 = vmul.f32 127.0, %v769_v37 }
 0x239   :  { %v147_v40 = vmul.f32 %v145_v39, %v1016_v61  ;;  %v150_v41 = vmax.f32 %v710_v38, -128.0 }
 0x23b   :  { %v711_v42 = vround.rtne.f32 %v147_v40  ;;  %v152_v44 = vmin.f32 %v150_v41, 127.0 }
 0x23d   :  { %v151_v43 = vmax.f32 %v711_v42, -128.0 }
 0x23f   :  { %v153_v45 = vmin.f32 %v151_v43, 127.0 }
 0x241   :  { %v154_v46 = vpack.c.bf16 %v153_v45, %v152_v44 }
 0x243   :  { %155 = vst.msk [vmem:[#allocation2] sm:$0xff] %vm82_vm0, %v154_v46 }
 0x24a   :  { %v159_v47 = vld [vmem:[#allocation2] sm:$0xff] }
 0x24b   :  { %674 = vmatprep.mubr.msk.bf16.mxu0 %vm82_vm0, %v159_v47  ;;  %692 = vmatprep.mubr.msk.bf16.mxu1 %vm82_vm0, %v159_v47 }
 0x24c   :  { %675 = vmatmul.mubr.msk.bf16.vlgmr.msra.gmra.mrb[0].mxu0 %vm82_vm0, %v159_v47  ;;  %693 = vmatmul.mubr.msk.bf16.vlgmr.msra.gmra.mrb[0].mxu1 %vm82_vm0, %v159_v47 }
 0x2b1   :  { %v580_v48 = vpop.permute.xlu0 %579 }
 0x2b5   :  { %v585_v49 = vpop.permute.xlu1 %584 }
 0x31f   :  { %v518_v50 = vpop.f32.mrb[0].mxu0  ;;  %v561_v51 = vpop.f32.mrb[0].mxu1 }
 0x320   :  { %v587_v52 = vmul.f32 %v580_v48, %v518_v50  ;;  %v589_v53 = vmul.f32 %v580_v48, %v561_v51  ;;  %v520_v54 = vpop.f32.mrb[1].mxu0  ;;  %v563_v55 = vpop.f32.mrb[1].mxu1 }
 0x321   :  { %v588_v56 = vmul.f32 %v580_v48, %v520_v54  ;;  %v590_v57 = vmul.f32 %v580_v48, %v563_v55  ;;  %v522_v58 = vpop.f32.mrb[2].mxu0  ;;  %v565_v59 = vpop.f32.mrb[2].mxu1 }
 0x322   :  { %595 = vst [vmem:[#allocation13] sm:$0xff] %v587_v52  ;;  %597 = vst [vmem:[#allocation13 + $0x10] sm:$0xff] %v589_v53  ;;  %v591_v60 = vmul.f32 %v585_v49, %v522_v58  ;;  %v593_v61 = vmul.f32 %v585_v49, %v565_v59  ;;  %v524_v62 = vpop.f32.mrb[3].mxu0  ;;  %v567_v63 = vpop.f32.mrb[3].mxu1 }
 0x323   :  { %596 = vst [vmem:[#allocation13 + $0x8] sm:$0xff] %v588_v56  ;;  %598 = vst [vmem:[#allocation13 + $0x18] sm:$0xff] %v590_v57  ;;  %v592_v0 = vmul.f32 %v585_v49, %v524_v62  ;;  %v594_v1 = vmul.f32 %v585_v49, %v567_v63 }
 0x324   :  { %599 = vst [vmem:[#allocation13 + $0x20] sm:$0xff] %v591_v60  ;;  %601 = vst [vmem:[#allocation13 + $0x30] sm:$0xff] %v593_v61 }
 0x325   :  { %600 = vst [vmem:[#allocation13 + $0x28] sm:$0xff] %v592_v0  ;;  %602 = vst [vmem:[#allocation13 + $0x38] sm:$0xff] %v594_v1 }
 0x326   :  { %869 = shalt.err (!%p866_p8)
}
 0x327   :  { %s870_s25 = scalar_lea.hbm %s1063_s5, 1024 }
 0x328   :  { %p871_p9 = scmp.ne.s32.totalorder %s1063_s5, %s870_s25  ;;  %p874_p10 = scmp.lt.u32.totalorder %s870_s25, %s1063_s5 }
 0x32a   :  { %p876_p11 = pnand %p874_p10, %p871_p9 }
 0x32c   :  { %879 = shalt.err (!%p876_p11)
}
 0x32d   :  { %s898_s30 = smov 512   ;;  %s899_s0 = smov 32  }
 0x32e   :  { %614 = dma.vmem_to_hbm [thread:$0]  %s609_s20, 1024, %s1063_s5, [#allocation7], %s898_s30, %s898_s30, %s899_s0  }
 0x32f   :  { %886 = dma.done.wait [#allocation7], 1024  }
 0x330   :  { %887 = vsyncadd [#allocation7], 4294966272 }
 0x331   :  { %618 = vsyncpa [#allocation6], 1 }
 0x332   :  { %619 = vsyncpa [#allocation9], 1 }
 0x333   :  { %620 = vsyncpa [#allocation12], 1 }
 0x334   :  { %621 = vsyncpa [#allocation7], 1 }

// kernel: hgrn_bit_block.13
= control target key start
LH: loop header
LB: loop body
LE: loop exit
PB: predicated region body
PF: predicated region fallthrough
CT: control target
= control target key end

     0   :  { %11 = vsyncpa [#allocation6], 0  ;;  %s633_s0 = inlined_call_operand.hbm [shape: f32[16,512], index: 0, kind: input, shape index: {}]   ;;  %s634_s1 = inlined_call_operand.hbm [shape: f32[1,256], index: 1, kind: input, shape index: {}]   ;;  %s635_s2 = inlined_call_operand.hbm [shape: bf16[64,256], index: 2, kind: input, shape index: {}]   ;;  %s636_s3 = inlined_call_operand.<no memory space> [shape: f32[1,1], index: 3, kind: input, shape index: {}]   ;;  %s637_s4 = inlined_call_operand.hbm [shape: f32[16,64], index: 4, kind: input, shape index: {}]   ;;  %s638_s5 = inlined_call_operand.hbm [shape: f32[16,64], index: 5, kind: output, shape index: {}]  }
   0x1   :  { %12 = vsyncpa [#allocation9], 0 }
   0x2   :  { %13 = vsyncpa [#allocation12], 0 }
   0x3   :  { %14 = vsyncpa [#allocation7], 0  ;;  %s514_s18 = smov [#allocation8]   ;;  %s515_s20 = smov [#allocation5]  }
   0x4   :  { %s33_s19 = sshll.u32 %s514_s18, 4  ;;  %s20_s21 = sshll.u32 %s515_s20, 4  ;;  %s34_s19 = int_to_ptr.vmem [resolvable:$true] %s33_s19  ;;  %s554_s21 = int_to_ptr.vmem [resolvable:$true] %s20_s21 }
   0x5   :  { %s396_s24 = scalar_lea.hbm %s634_s1, 32 }
   0x6   :  { %p397_p0 = scmp.ne.s32.totalorder %s634_s1, %s396_s24  ;;  %p400_p1 = scmp.lt.u32.totalorder %s396_s24, %s634_s1 }
   0x8   :  { %p402_p2 = pnand %p400_p1, %p397_p0 }
   0xa   :  { %405 = shalt.err (!%p402_p2)
}
   0xb   :  { %s406_s29 = scalar_lea.vmem %s34_s19, 32  ;;  %p411_p4 = scmp.lt.s32.totalorder %s34_s19, %s34_s19 }
   0xc   :  { %p407_p3 = scmp.ne.s32.totalorder %s34_s19, %s406_s29  ;;  %p412_p5 = scmp.lt.s32.totalorder %s406_s29, %s406_s29 }
   0xe   :  { %p413_p6 = por %p412_p5, %p411_p4 }
  0x10   :  { %p414_p7 = pnand %p413_p6, %p407_p3 }
  0x12   :  { %417 = shalt.err (!%p414_p7)
}
  0x13   :  { %36 = dma.hbm_to_vmem [thread:$0]  %s634_s1, 32, %s34_s19, [#allocation9]  }
  0x14   :  { %s418_s9 = scalar_lea.hbm %s633_s0, 1024 }
  0x15   :  { %p419_p8 = scmp.ne.s32.totalorder %s633_s0, %s418_s9  ;;  %p422_p9 = scmp.lt.u32.totalorder %s418_s9, %s633_s0 }
  0x17   :  { %p424_p10 = pnand %p422_p9, %p419_p8 }
  0x19   :  { %427 = shalt.err (!%p424_p10)
}
  0x1a   :  { %s428_s14 = scalar_lea.vmem %s554_s21, 1024  ;;  %p433_p12 = scmp.lt.s32.totalorder %s554_s21, %s554_s21 }
  0x1b   :  { %p429_p11 = scmp.ne.s32.totalorder %s554_s21, %s428_s14  ;;  %p434_p13 = scmp.lt.s32.totalorder %s428_s14, %s428_s14 }
  0x1d   :  { %p435_p0 = por %p434_p13, %p433_p12 }
  0x1f   :  { %p436_p1 = pnand %p435_p0, %p429_p11 }
  0x21   :  { %439 = shalt.err (!%p436_p1)
}
  0x22   :  { %s516_s1 = smov 512   ;;  %s517_s15 = smov 32  }
  0x23   :  { %26 = dma.hbm_to_vmem [thread:$0]  %s633_s0, 1024, %s554_s21, [#allocation6], %s516_s1, %s516_s1, %s517_s15  }
  0x24   :  { %s518_s18 = smov [#allocation10]   ;;  %s440_s23 = scalar_lea.hbm %s635_s2, 1024 }
  0x25   :  { %s42_s19 = sshll.u32 %s518_s18, 4  ;;  %p441_p2 = scmp.ne.s32.totalorder %s635_s2, %s440_s23  ;;  %s43_s19 = int_to_ptr.vmem [resolvable:$true] %s42_s19 }
  0x26   :  { %p444_p3 = scmp.lt.u32.totalorder %s440_s23, %s635_s2 }
  0x28   :  { %p446_p4 = pnand %p444_p3, %p441_p2 }
  0x2a   :  { %449 = shalt.err (!%p446_p4)
}
  0x2b   :  { %s450_s28 = scalar_lea.vmem %s43_s19, 1024  ;;  %p455_p6 = scmp.lt.s32.totalorder %s43_s19, %s43_s19 }
  0x2c   :  { %p451_p5 = scmp.ne.s32.totalorder %s43_s19, %s450_s28  ;;  %p456_p7 = scmp.lt.s32.totalorder %s450_s28, %s450_s28 }
  0x2e   :  { %p457_p8 = por %p456_p7, %p455_p6 }
  0x30   :  { %p458_p9 = pnand %p457_p8, %p451_p5 }
  0x32   :  { %461 = shalt.err (!%p458_p9)
}
  0x33   :  { %s519_s0 = smov 128   ;;  %s520_s21 = smov 8  }
  0x34   :  { %48 = dma.hbm_to_vmem [thread:$0]  %s635_s2, 1024, %s43_s19, [#allocation9], %s519_s0, %s519_s0, %s520_s21  }
  0x35   :  { %s521_s6 = smov [#allocation11]   ;;  %s462_s10 = scalar_lea.hbm %s637_s4, 256 }
  0x36   :  { %s56_s7 = sshll.u32 %s521_s6, 4  ;;  %p463_p10 = scmp.ne.s32.totalorder %s637_s4, %s462_s10  ;;  %s57_s7 = int_to_ptr.vmem [resolvable:$true] %s56_s7 }
  0x37   :  { %p466_p11 = scmp.lt.u32.totalorder %s462_s10, %s637_s4 }
  0x39   :  { %p468_p12 = pnand %p466_p11, %p463_p10 }
  0x3b   :  { %471 = shalt.err (!%p468_p12)
}
  0x3c   :  { %s472_s1 = scalar_lea.vmem %s57_s7, 256  ;;  %p477_p0 = scmp.lt.s32.totalorder %s57_s7, %s57_s7 }
  0x3d   :  { %p473_p13 = scmp.ne.s32.totalorder %s57_s7, %s472_s1  ;;  %p478_p1 = scmp.lt.s32.totalorder %s472_s1, %s472_s1 }
  0x3f   :  { %p479_p2 = por %p478_p1, %p477_p0 }
  0x41   :  { %p480_p3 = pnand %p479_p2, %p473_p13 }
  0x43   :  { %483 = shalt.err (!%p480_p3)
}
  0x44   :  { %62 = dma.hbm_to_vmem [thread:$0]  %s637_s4, 256, %s57_s7, [#allocation12], %s519_s0, %s519_s0, %s520_s21  }
  0x45   :  { %506 = dma.done.wait [#allocation6], 1024  }
  0x46   :  { %507 = vsyncadd [#allocation6], 4294966272 }
  0x47   :  { %508 = dma.done.wait [#allocation9], 1056  }
  0x48   :  { %509 = vsyncadd [#allocation9], 4294966240 }
  0x49   :  { %510 = dma.done.wait [#allocation12], 256  }
  0x4a   :  { %511 = vsyncadd [#allocation12], 4294967040  ;;  %v80_v0 = vld [vmem:[#allocation5] sm:$0xff]  ;;  %v81_v1 = vld [vmem:[#allocation5 + $0x8] sm:$0xff]  ;;  %v143_v42 = vlaneseq  ;;  %vm193_vm0 = vcmask 7168   ;;  %vm310_vm1 = vcmask 523264  }
  0x4b   :  { %v332_v2 = vmul.f32 -1.442695, %v80_v0  ;;  %v333_v3 = vmul.f32 -1.442695, %v81_v1  ;;  %v84_v4 = vld [vmem:[#allocation5 + $0x20] sm:$0xff]  ;;  %v85_v5 = vld [vmem:[#allocation5 + $0x28] sm:$0xff] }
  0x4c   :  { %v334_v6 = vmul.f32 -1.442695, %v84_v4  ;;  %v335_v7 = vmul.f32 -1.442695, %v85_v5  ;;  %v82_v17 = vld [vmem:[#allocation5 + $0x10] sm:$0xff]  ;;  %v83_v19 = vld [vmem:[#allocation5 + $0x18] sm:$0xff] }
  0x4d   :  { %372 = vpow2.f32 %v332_v2  ;;  %v86_v23 = vld [vmem:[#allocation5 + $0x30] sm:$0xff]  ;;  %v87_v26 = vld [vmem:[#allocation5 + $0x38] sm:$0xff]  ;;  %v362_v39 = vld [vmem:[#allocation10] ss:$8 sps:$4 sm:$0xff]   ;;  %v144_v46 = vshrl.u32 %v143_v42, 7 }
  0x4e   :  { %374 = vpow2.f32 %v333_v3  ;;  %v360_v38 = vld [vmem:[#allocation10 + $0x4] ss:$8 sps:$4 sm:$0xff]   ;;  %v120_v50 = vld [vmem:[#allocation8] sm:$0x3]  ;;  %s292_s17 = smul.f32 0.007874016, %s636_s3 }
  0x4f   :  { %376 = vpow2.f32 %v334_v6  ;;  %248 = vmatprep.subr.bf16.mxu0 %v360_v38  ;;  %v145_v48 = vsub.s32 0, %v144_v46  ;;  %v149_v49 = vsub.s32 1, %v144_v46  ;;  %v365_v6 = vld [vmem:[#allocation10 + $0x10] ss:$8 sps:$4 sm:$0xff]   ;;  %s523_s3 = smov [#allocation13]  }
  0x50   :  { %378 = vpow2.f32 %v335_v7  ;;  %249 = vmatpush1.bf16.xpose.msra.mxu0 %v362_v39  ;;  %v522_v7 = vmov 0   ;;  %s318_s18 = sshll.u32 %s523_s3, 4  ;;  %s319_s18 = int_to_ptr.vmem [resolvable:$true] %s318_s18 }
  0x51   :  { %v146_v51 = vrot.slane %v120_v50, %v145_v48  ;;  %v150_v52 = vrot.slane %v120_v50, %v149_v49  ;;  %358 = vset.pattern.permute.xlu0 %v522_v7  ;;  %359 = vset.pattern.permute.xlu1 %v522_v7  ;;  %v197_v49 = vld [vmem:[#allocation11 + $0x8] sm:$0xff]  ;;  %s484_s19 = scalar_lea.vmem %s319_s18, 256  ;;  %p489_p5 = scmp.lt.s32.totalorder %s319_s18, %s319_s18 }
  0x52   :  { %p485_p4 = scmp.ne.s32.totalorder %s319_s18, %s484_s19  ;;  %p490_p6 = scmp.lt.s32.totalorder %s484_s19, %s484_s19 }
  0x54   :  { %p491_p7 = por %p490_p6, %p489_p5 }
  0x56   :  { %p492_p8 = pnand %p491_p7, %p485_p4 }
  0x57   :  { %v373_v8 = vpop.eup %372 }
  0x58   :  { %v375_v9 = vpop.eup %374  ;;  %v100_v10 = vadd.f32 1.0, %v373_v8  ;;  %v366_v8 = vld [vmem:[#allocation10 + $0x24] ss:$8 sps:$4 sm:$0xff]  }
  0x59   :  { %v377_v11 = vpop.eup %376  ;;  %v101_v12 = vadd.f32 1.0, %v375_v9  ;;  %v368_v9 = vld [vmem:[#allocation10 + $0x20] ss:$8 sps:$4 sm:$0xff]  }
  0x5a   :  { %v379_v13 = vpop.eup %378  ;;  %380 = vrcp.f32 %v100_v10  ;;  %v102_v14 = vadd.f32 1.0, %v377_v11  ;;  %v369_v10 = vld [vmem:[#allocation10 + $0x34] ss:$8 sps:$4 sm:$0xff]   ;;  %v371_v11 = vld [vmem:[#allocation10 + $0x30] ss:$8 sps:$4 sm:$0xff]  }
  0x5b   :  { %382 = vrcp.f32 %v101_v12  ;;  %v103_v15 = vadd.f32 1.0, %v379_v13 }
  0x5c   :  { %384 = vrcp.f32 %v102_v14 }
  0x5d   :  { %386 = vrcp.f32 %v103_v15 }
  0x64   :  { %v381_v16 = vpop.eup %380 }
  0x65   :  { %v383_v18 = vpop.eup %382  ;;  %v112_v20 = vmul.f32 %v381_v16, %v80_v0  ;;  %v293_v16 = vstv %s292_s17 }
  0x66   :  { %v385_v21 = vpop.eup %384  ;;  %v113_v22 = vmul.f32 %v383_v18, %v81_v1 }
  0x67   :  { %v387_v24 = vpop.eup %386  ;;  %v116_v25 = vmul.f32 %v112_v20, %v82_v17  ;;  %v114_v27 = vmul.f32 %v385_v21, %v84_v4 }
  0x68   :  { %v117_v28 = vmul.f32 %v113_v22, %v83_v19  ;;  %v115_v29 = vmul.f32 %v387_v24, %v85_v5  ;;  %v363_v5 = vld [vmem:[#allocation10 + $0x14] ss:$8 sps:$4 sm:$0xff]  }
  0x69   :  { %v121_v30 = vmul.f32 %v116_v25, %v116_v25  ;;  %v118_v31 = vmul.f32 %v114_v27, %v86_v23  ;;  %250 = vmatprep.subr.bf16.mxu0 %v363_v5 }
  0x6a   :  { %v122_v32 = vmul.f32 %v117_v28, %v117_v28  ;;  %v119_v33 = vmul.f32 %v115_v29, %v87_v26  ;;  %251 = vmatpush1.bf16.xpose.msra.mxu0 %v365_v6 }
  0x6b   :  { %v123_v34 = vmul.f32 %v118_v31, %v118_v31  ;;  %252 = vmatprep.subr.bf16.mxu0 %v366_v8 }
  0x6c   :  { %v125_v35 = vadd.f32 %v122_v32, %v121_v30  ;;  %v124_v36 = vmul.f32 %v119_v33, %v119_v33 }
  0x6e   :  { %126 = vadd.xlane.f32.xlu0 %v125_v35  ;;  %v128_v37 = vadd.f32 %v124_v36, %v123_v34 }
  0x72   :  { %129 = vadd.xlane.f32.xlu0 %v128_v37  ;;  %253 = vmatpush1.bf16.xpose.msra.mxu0 %v368_v9 }
  0x73   :  { %254 = vmatprep.subr.bf16.mxu0 %v369_v10 }
  0x7a   :  { %255 = vmatpush1.bf16.xpose.msra.mxu0 %v371_v11 }
  0xfb   :  { %v127_v40 = vpop.xlane.xlu0 %126 }
  0xfc   :  { %v132_v41 = vmul.f32 0.00390625, %v127_v40 }
  0xfe   :  { %v134_v43 = vadd.f32 1e-08, %v132_v41 }
  0xff   :  { %v130_v44 = vpop.xlane.xlu0 %129 }
 0x100   :  { %388 = vrsqrt.f32 %v134_v43  ;;  %v133_v45 = vmul.f32 0.00390625, %v130_v44  ;;  %v196_v44 = vld [vmem:[#allocation11] sm:$0xff] }
 0x102   :  { %v135_v47 = vadd.f32 1e-08, %v133_v45 }
 0x104   :  { %390 = vrsqrt.f32 %v135_v47 }
 0x10a   :  { %v389_v53 = vpop.eup %388 }
 0x10b   :  { %v138_v54 = vmul.f32 %v389_v53, %v116_v25  ;;  %v139_v55 = vmul.f32 %v389_v53, %v117_v28 }
 0x10d   :  { %v153_v56 = vmul.f32 %v146_v51, %v138_v54  ;;  %v154_v57 = vmul.f32 %v150_v52, %v139_v55 }
 0x10e   :  { %v391_v58 = vpop.eup %390 }
 0x10f   :  { %v157_v59 = vand.u32 2147483647, %v153_v56  ;;  %v158_v60 = vand.u32 2147483647, %v154_v57  ;;  %v140_v61 = vmul.f32 %v391_v58, %v118_v31  ;;  %v141_v62 = vmul.f32 %v391_v58, %v119_v33 }
 0x111   :  { %v161_v63 = vmax.f32.f32 %v157_v59, %v158_v60  ;;  %v155_v0 = vmul.f32 %v146_v51, %v140_v61  ;;  %v156_v1 = vmul.f32 %v150_v52, %v141_v62 }
 0x113   :  { %162 = vmax.xlane.f32.xlu1 %v161_v63  ;;  %v159_v2 = vand.u32 2147483647, %v155_v0  ;;  %v160_v3 = vand.u32 2147483647, %v156_v1 }
 0x115   :  { %v164_v4 = vmax.f32.f32 %v159_v2, %v160_v3 }
 0x117   :  { %165 = vmax.xlane.f32.xlu1 %v164_v4 }
 0x1a0   :  { %v163_v12 = vpop.xlane.xlu1 %162 }
 0x1a1   :  { %v167_v13 = vmax.f32 %v163_v12, 1e-05 }
 0x1a3   :  { %392 = vrcp.f32 %v167_v13  ;;  %194 = vst.msk [vmem:[#allocation3] sm:$0xff] %vm193_vm0, %v167_v13 }
 0x1a4   :  { %v166_v14 = vpop.xlane.xlu1 %165 }
 0x1a5   :  { %v168_v15 = vmax.f32 %v166_v14, 1e-05 }
 0x1a7   :  { %394 = vrcp.f32 %v168_v15  ;;  %195 = vst.msk [vmem:[#allocation3 + $0x8] sm:$0xff] %vm193_vm0, %v168_v15 }
 0x1aa   :  { %v289_v17 = vld [vmem:[#allocation3] sm:$0xff] }
 0x1ab   :  { %v294_v18 = vmul.f32 %v293_v16, %v289_v17 }
 0x1ad   :  { %v393_v19 = vpop.eup %392  ;;  %298 = vperm.xlu0 %358, %v294_v18  }
 0x1ae   :  { %v170_v20 = vmul.f32 127.0, %v393_v19  ;;  %v290_v21 = vld [vmem:[#allocation3 + $0x8] sm:$0xff] }
 0x1af   :  { %v295_v22 = vmul.f32 %v293_v16, %v290_v21 }
 0x1b0   :  { %v173_v23 = vmul.f32 %v170_v20, %v153_v56  ;;  %v174_v24 = vmul.f32 %v170_v20, %v154_v57 }
 0x1b1   :  { %v395_v25 = vpop.eup %394  ;;  %303 = vperm.xlu1 %359, %v295_v22  }
 0x1b2   :  { %v172_v26 = vmul.f32 127.0, %v395_v25  ;;  %v345_v27 = vround.rtne.f32 %v174_v24  ;;  %v344_v28 = vround.rtne.f32 %v173_v23 }
 0x1b4   :  { %v175_v29 = vmul.f32 %v172_v26, %v155_v0  ;;  %v176_v30 = vmul.f32 %v172_v26, %v156_v1  ;;  %v182_v32 = vmax.f32 %v345_v27, -128.0  ;;  %v181_v34 = vmax.f32 %v344_v28, -128.0 }
 0x1b6   :  { %v347_v31 = vround.rtne.f32 %v176_v30  ;;  %v346_v33 = vround.rtne.f32 %v175_v29  ;;  %v186_v37 = vmin.f32 %v182_v32, 127.0  ;;  %v185_v39 = vmin.f32 %v181_v34, 127.0 }
 0x1b8   :  { %v184_v35 = vmax.f32 %v347_v31, -128.0  ;;  %v183_v36 = vmax.f32 %v346_v33, -128.0 }
 0x1ba   :  { %v188_v38 = vmin.f32 %v184_v35, 127.0  ;;  %v187_v40 = vmin.f32 %v183_v36, 127.0 }
 0x1bc   :  { %v190_v41 = vpack.c.bf16 %v188_v38, %v186_v37  ;;  %v189_v42 = vpack.c.bf16 %v187_v40, %v185_v39 }
 0x1be   :  { %280 = vmatprep.mubr.bf16.mxu0 %v190_v41 }
 0x1bf   :  { %281 = vmatmul.mubr.bf16.vlgmr.msra.gmra.mrb[0].mxu0 %v189_v42 }
 0x22c   :  { %v299_v43 = vpop.permute.xlu0 %298 }
 0x230   :  { %v304_v48 = vpop.permute.xlu1 %303 }
 0x292   :  { %v282_v45 = vpop.f32.mrb[0].mxu0 }
 0x293   :  { %v306_v46 = vmul.f32 %v299_v43, %v282_v45  ;;  %v284_v47 = vpop.f32.mrb[1].mxu0 }
 0x294   :  { %v285_v50 = vpop.f32.mrb[2].mxu0 }
 0x295   :  { %v308_v51 = vadd.f32 %v306_v46, %v196_v44  ;;  %v307_v52 = vmul.f32 %v304_v48, %v285_v50  ;;  %v287_v53 = vpop.f32.mrb[3].mxu0 }
 0x297   :  { %v309_v54 = vadd.f32 %v307_v52, %v197_v49  ;;  %311 = vst.msk [vmem:[#allocation13] sm:$0xff] %vm310_vm1, %v308_v51 }
 0x299   :  { %312 = vst.msk [vmem:[#allocation13 + $0x8] sm:$0xff] %vm310_vm1, %v309_v54 }
 0x29a   :  { %495 = shalt.err (!%p492_p8)
}
 0x29b   :  { %s496_s23 = scalar_lea.hbm %s638_s5, 256 }
 0x29c   :  { %p497_p9 = scmp.ne.s32.totalorder %s638_s5, %s496_s23  ;;  %p500_p10 = scmp.lt.u32.totalorder %s496_s23, %s638_s5 }
 0x29e   :  { %p502_p11 = pnand %p500_p10, %p497_p9 }
 0x2a0   :  { %505 = shalt.err (!%p502_p11)
}
 0x2a1   :  { %324 = dma.vmem_to_hbm [thread:$0]  %s319_s18, 256, %s638_s5, [#allocation7], %s519_s0, %s519_s0, %s520_s21  }
 0x2a2   :  { %512 = dma.done.wait [#allocation7], 256  }
 0x2a3   :  { %513 = vsyncadd [#allocation7], 4294967040 }
 0x2a4   :  { %328 = vsyncpa [#allocation6], 1 }
 0x2a5   :  { %329 = vsyncpa [#allocation9], 1 }
 0x2a6   :  { %330 = vsyncpa [#allocation12], 1 }
 0x2a7   :  { %331 = vsyncpa [#allocation7], 1 }

</bundles_post_ra>
